<compile_context>
chip_gen: v7x
topology: tpu7x:2x2x1
jax: 0.10.0
libtpu: 0.0.40
codegen_flags: <defaults>
</compile_context>

<pallas_src>
import functools

import jax
import jax.numpy as jnp
from jax.experimental import pallas as pl
from jax.experimental.pallas import tpu as pltpu

HIDDEN = 50
IN_FEATS = 3
OUT_FEATS = 1
LANE = 128

# Packed-parameter slab column layout: (HIDDEN, PCOLS) f32.
PCOLS = 128
C_W2 = 0                    # [0, 50)   : w2^T            (50, 50)
C_W1 = 50                   # [50, 53)  : w1^T            (50, 3)
C_B1 = 53                   # [53, 54)  : b1              (50, 1)
C_R1 = 54                   # [54, 60)  : rowdy1 [w,b+pi/2,v,c,alpha,beta]
C_B2 = 60                   # [60, 61)  : b2              (50, 1)
C_R2 = 61                   # [61, 67)  : rowdy2
C_W3 = 67                   # [67, 68)  : w3              (50, 1)
C_B3 = 68                   # [68, 69)  : b3 (row 0 only)

# --- fast sin: Cody-Waite reduction to [-pi/2, pi/2] + odd deg-11 polynomial.
_INV_PI = 0.3183098861837907
_PI_HI = 3.140625                 # 13 significant bits -> k*PI_HI exact
_PI_LO = 9.6765358979e-4          # pi - PI_HI
_S3 = -1.0 / 6.0
_S5 = 1.0 / 120.0
_S7 = -1.0 / 5040.0
_S9 = 1.0 / 362880.0
_S11 = -1.0 / 39916800.0


def _fast_sin(x):
    """sin(x) for moderate |x| (VPU-only, ~17 ops, abs err ~1e-7)."""
    k = jnp.floor(x * _INV_PI + 0.5)          # nearest multiple of pi
    r = x - k * _PI_HI
    r = r - k * _PI_LO                        # r in [-pi/2, pi/2]
    r2 = r * r
    p = _S11
    p = p * r2 + _S9
    p = p * r2 + _S7
    p = p * r2 + _S5
    p = p * r2 + _S3
    s = r + (r * r2) * p
    parity = k - 2.0 * jnp.floor(k * 0.5)     # 0.0 or 1.0 exactly
    sign = 1.0 - 2.0 * parity                 # (-1)^k
    return s * sign


def _rowdy_fm(h, p):
    # Feature-major Rowdy.  h: (F, TN); p: (F, 6) cols = [w, b+pi/2, v, c, alpha, beta].
    # cos was folded into sin via the +pi/2 phase on the host.
    w = p[:, 0:1]
    b = p[:, 1:2]
    v = p[:, 2:3]
    c = p[:, 3:4]
    alpha = p[:, 4:5]
    beta = p[:, 5:6]
    return jnp.tanh(h) + alpha * _fast_sin(w * h + b) + beta * _fast_sin(v * h + c)


def _pinn_kernel(x_ref, p_ref, o_ref):
    x = x_ref[...]                                     # (3, TN) batch on lanes

    w2 = p_ref[:, C_W2:C_W2 + HIDDEN]                  # (50, 50)
    w1 = p_ref[:, C_W1:C_W1 + IN_FEATS]                # (50, 3)
    b1 = p_ref[:, C_B1:C_B1 + 1]                       # (50, 1)
    r1 = p_ref[:, C_R1:C_R1 + 6]                       # (50, 6)
    b2 = p_ref[:, C_B2:C_B2 + 1]                       # (50, 1)
    r2 = p_ref[:, C_R2:C_R2 + 6]                       # (50, 6)
    w3 = p_ref[:, C_W3:C_W3 + 1]                       # (50, 1)
    b3 = p_ref[0:1, C_B3:C_B3 + 1]                     # (1, 1)

    # Layer 1 (3->50): MXU (idle unit) instead of VPU broadcast FMAs.
    h1 = jnp.dot(w1, x, preferred_element_type=jnp.float32) + b1   # (50, TN)
    h1 = _rowdy_fm(h1, r1)

    # Layer 2 (50x50): MXU, batch fills all lanes.
    h2 = jnp.dot(w2, h1, preferred_element_type=jnp.float32) + b2  # (50, TN)
    h2 = _rowdy_fm(h2, r2)

    # Layer 3 (50->1): VPU multiply + XLU sublane reduce (tiny VALU cost).
    out = jnp.sum(h2 * w3, axis=0, keepdims=True) + b3
    o_ref[...] = out.astype(o_ref.dtype)               # (1, TN) lane-dense


def _num_tensorcores():
    """Best-effort TensorCore-per-device count (2 on megacore chips)."""
    try:
        kind = jax.devices()[0].device_kind.lower()
    except Exception:
        return 1
    if "v7" in kind or "v4" in kind or "v5p" in kind:
        return 2
    return 1


def _choose_tiling(n, max_tile_n, num_cores):
    """Pick (n_pad, tile_n): tile_n a multiple of 128; even step count on 2-TC chips."""
    n128 = ((max(n, 1) + LANE - 1) // LANE) * LANE
    if num_cores > 1:
        steps = (n128 + max_tile_n - 1) // max_tile_n
        steps = ((steps + num_cores - 1) // num_cores) * num_cores
        tile_n = ((n128 + steps * LANE - 1) // (steps * LANE)) * LANE
        tile_n = min(tile_n, max_tile_n)
        steps = (n128 + tile_n - 1) // tile_n
        steps = ((steps + num_cores - 1) // num_cores) * num_cores
        n_pad = steps * tile_n
    else:
        # Single TensorCore (v5e/v6e): one full-size tile when it fits.
        tile_n = min(n128, max_tile_n)
        n_pad = ((n128 + tile_n - 1) // tile_n) * tile_n
    return n_pad, tile_n


@functools.partial(jax.jit, static_argnames=("max_tile_n", "num_cores"))
def _forward_impl(x, y, t, params, max_tile_n, num_cores):
    w1, b1, r1, w2, b2, r2, w3, b3 = params
    n = x.shape[0]
    max_tile_n = max(LANE, (int(max_tile_n) // LANE) * LANE)
    n_pad, tile_n = _choose_tiling(n, max_tile_n, num_cores)

    # Feature-major input (3, n_pad): batch on the 128-lane axis.
    xyz = jnp.stack([x[:, 0], y[:, 0], t[:, 0]], axis=0).astype(jnp.float32)
    if n_pad != n:
        xyz = jnp.pad(xyz, ((0, 0), (0, n_pad - n)))

    def pack_rowdy(r):
        # (6, F) rows [w, b, v, c, alpha, beta] -> (F, 6); fold cos -> sin(+pi/2).
        r = r.astype(jnp.float32).T
        return r.at[:, 1].add(jnp.pi / 2)

    # Pack all tiny parameters into one (HIDDEN, PCOLS) slab -> single DMA.
    p = jnp.zeros((HIDDEN, PCOLS), jnp.float32)
    p = p.at[:, C_W2:C_W2 + HIDDEN].set(w2.T.astype(jnp.float32))
    p = p.at[:, C_W1:C_W1 + IN_FEATS].set(w1.T.astype(jnp.float32))
    p = p.at[:, C_B1:C_B1 + 1].set(b1.reshape(HIDDEN, 1).astype(jnp.float32))
    p = p.at[:, C_R1:C_R1 + 6].set(pack_rowdy(r1))
    p = p.at[:, C_B2:C_B2 + 1].set(b2.reshape(HIDDEN, 1).astype(jnp.float32))
    p = p.at[:, C_R2:C_R2 + 6].set(pack_rowdy(r2))
    p = p.at[:, C_W3:C_W3 + 1].set(w3.astype(jnp.float32))
    p = p.at[0, C_B3].set(b3.reshape(-1)[0].astype(jnp.float32))

    grid = (n_pad // tile_n,)
    out = pl.pallas_call(
        _pinn_kernel,
        out_shape=jax.ShapeDtypeStruct((OUT_FEATS, n_pad), jnp.float32),
        grid_spec=pltpu.PrefetchScalarGridSpec(
            num_scalar_prefetch=0,
            grid=grid,
            in_specs=[
                pl.BlockSpec((IN_FEATS, tile_n), lambda i: (0, i)),   # xyz (3, TN)
                pl.BlockSpec((HIDDEN, PCOLS), lambda i: (0, 0)),      # packed params
            ],
            out_specs=pl.BlockSpec((OUT_FEATS, tile_n), lambda i: (0, i)),
        ),
        compiler_params=pltpu.CompilerParams(
            dimension_semantics=("parallel",)),
    )(xyz, p)

    # Back to batch-major (N, 1); drop padded tail lanes.
    return out[0, :n][:, None]


def pinn2dwave_rowdy_forward(x, y, t, params, max_tile_n=1024):
    return _forward_impl(x, y, t, params,
                         max_tile_n=max_tile_n,
                         num_cores=_num_tensorcores())


def init_params(key):
    """Deterministic parameter init matching the module's shapes."""
    ks = jax.random.split(key, 12)

    def linear(kw, kb, fan_in, fan_out):
        bound = 1.0 / jnp.sqrt(fan_in)
        w = jax.random.uniform(kw, (fan_in, fan_out), jnp.float32,
                               -bound, bound)
        b = jax.random.uniform(kb, (1, fan_out), jnp.float32, -bound, bound)
        return w, b

    def rowdy_params(k, feats):
        kw, kb, kv, kc = jax.random.split(k, 4)
        w = jax.random.normal(kw, (feats,), jnp.float32)
        b = jax.random.normal(kb, (feats,), jnp.float32)
        v = jax.random.normal(kv, (feats,), jnp.float32)
        c = jax.random.normal(kc, (feats,), jnp.float32)
        alpha = jnp.ones((feats,), jnp.float32) * 0.1
        beta = jnp.ones((feats,), jnp.float32) * 0.1
        return jnp.stack([w, b, v, c, alpha, beta], axis=0)  # (6, feats)

    w1, b1 = linear(ks[0], ks[1], IN_FEATS, HIDDEN)
    r1 = rowdy_params(ks[2], HIDDEN)
    w2, b2 = linear(ks[3], ks[4], HIDDEN, HIDDEN)
    r2 = rowdy_params(ks[5], HIDDEN)
    w3, b3 = linear(ks[6], ks[7], HIDDEN, OUT_FEATS)
    return (w1, b1, r1, w2, b2, r2, w3, b3)


def reference_forward(x, y, t, params):
    """Pure-JAX reference (matches the PyTorch forward semantics)."""
    w1, b1, r1, w2, b2, r2, w3, b3 = params
    h = jnp.concatenate([x, y, t], axis=1)

    def rowdy(h, p):
        return (jnp.tanh(h)
                + p[4] * jnp.cos(p[0] * h + p[1])
                + p[5] * jnp.sin(p[2] * h + p[3]))

    h = h @ w1 + b1[0]
    h = rowdy(h, r1)
    h = h @ w2 + b2[0]
    h = rowdy(h, r2)
    return h @ w3 + b3[0]


if __name__ == "__main__":
    key = jax.random.PRNGKey(0)
    kp, kx, ky, kt = jax.random.split(key, 4)

    params = init_params(kp)

    N = 256  # small batch of collocation points
    x = jax.random.uniform(kx, (N, 1), jnp.float32)
    y = jax.random.uniform(ky, (N, 1), jnp.float32)
    t = jax.random.uniform(kt, (N, 1), jnp.float32)

    out = pinn2dwave_rowdy_forward(x, y, t, params)
    out = jax.block_until_ready(out)

    ref = reference_forward(x, y, t, params)
    assert out.shape == (N, 1)
    assert jnp.allclose(out, ref, rtol=1e-4, atol=2e-5), "mismatch vs reference"

    print("KERNEL_OK")
</pallas_src>

<mosaic_0001>
module attributes {stable_mosaic.version = 11 : i64} {
  func.func @_pinn_kernel(%arg0: i32, %arg1: memref<3x256xf32, #tpu.memory_space<vmem>>, %arg2: memref<50x128xf32, #tpu.memory_space<vmem>>, %arg3: memref<1x256xf32, #tpu.memory_space<vmem>>) attributes {dimension_semantics = [#tpu.dimension_semantics<parallel>], iteration_bounds = array<i64: 1>, scalar_prefetch = 0 : i64, scratch_operands = 0 : i64, tpu.core_type = #tpu.core_type<tc>, window_params = [{transform_indices = @transform_0, window_bounds = array<i64: 3, 256>}, {pipeline_mode = #tpu.pipeline_mode<synchronous>, transform_indices = @transform_1, window_bounds = array<i64: 50, 128>}, {transform_indices = @transform_2, window_bounds = array<i64: 1, 256>}]} {
    %c0 = arith.constant 0 : index
    %c0_0 = arith.constant 0 : index
    %0 = vector.load %arg1[%c0, %c0_0] : memref<3x256xf32, #tpu.memory_space<vmem>>, vector<3x256xf32>
    %c0_1 = arith.constant 0 : index
    %c0_2 = arith.constant 0 : index
    %1 = vector.load %arg2[%c0_1, %c0_2] : memref<50x128xf32, #tpu.memory_space<vmem>>, vector<50x50xf32>
    %c0_3 = arith.constant 0 : index
    %c50 = arith.constant 50 : index
    %2 = vector.load %arg2[%c0_3, %c50] : memref<50x128xf32, #tpu.memory_space<vmem>>, vector<50x3xf32>
    %c0_4 = arith.constant 0 : index
    %c53 = arith.constant 53 : index
    %3 = vector.load %arg2[%c0_4, %c53] : memref<50x128xf32, #tpu.memory_space<vmem>>, vector<50x1xf32>
    %c0_5 = arith.constant 0 : index
    %c54 = arith.constant 54 : index
    %4 = vector.load %arg2[%c0_5, %c54] : memref<50x128xf32, #tpu.memory_space<vmem>>, vector<50x6xf32>
    %c0_6 = arith.constant 0 : index
    %c60 = arith.constant 60 : index
    %5 = vector.load %arg2[%c0_6, %c60] : memref<50x128xf32, #tpu.memory_space<vmem>>, vector<50x1xf32>
    %c0_7 = arith.constant 0 : index
    %c61 = arith.constant 61 : index
    %6 = vector.load %arg2[%c0_7, %c61] : memref<50x128xf32, #tpu.memory_space<vmem>>, vector<50x6xf32>
    %c0_8 = arith.constant 0 : index
    %c67 = arith.constant 67 : index
    %7 = vector.load %arg2[%c0_8, %c67] : memref<50x128xf32, #tpu.memory_space<vmem>>, vector<50x1xf32>
    %c0_9 = arith.constant 0 : index
    %c68 = arith.constant 68 : index
    %8 = vector.load %arg2[%c0_9, %c68] : memref<50x128xf32, #tpu.memory_space<vmem>>, vector<1x1xf32>
    %cst = arith.constant dense<0.000000e+00> : vector<50x256xf32>
    %9 = tpu.matmul %2, %0, %cst {dimension_numbers = #tpu.dot_dimension_numbers<[1], [0], [0], [1], [0, 0, 1, 1], [], []>} : vector<50x3xf32>, vector<3x256xf32>, vector<50x256xf32> -> vector<50x256xf32>
    %10 = vector.broadcast %3 : vector<50x1xf32> to vector<50x256xf32>
    %11 = arith.addf %9, %10 : vector<50x256xf32>
    %12 = vector.extract_strided_slice %4 {offsets = [0, 0], sizes = [50, 1], strides = [1, 1]} : vector<50x6xf32> to vector<50x1xf32>
    %13 = vector.extract_strided_slice %4 {offsets = [0, 1], sizes = [50, 1], strides = [1, 1]} : vector<50x6xf32> to vector<50x1xf32>
    %14 = vector.extract_strided_slice %4 {offsets = [0, 2], sizes = [50, 1], strides = [1, 1]} : vector<50x6xf32> to vector<50x1xf32>
    %15 = vector.extract_strided_slice %4 {offsets = [0, 3], sizes = [50, 1], strides = [1, 1]} : vector<50x6xf32> to vector<50x1xf32>
    %16 = vector.extract_strided_slice %4 {offsets = [0, 4], sizes = [50, 1], strides = [1, 1]} : vector<50x6xf32> to vector<50x1xf32>
    %17 = vector.extract_strided_slice %4 {offsets = [0, 5], sizes = [50, 1], strides = [1, 1]} : vector<50x6xf32> to vector<50x1xf32>
    %18 = math.tanh %11 : vector<50x256xf32>
    %19 = vector.broadcast %12 : vector<50x1xf32> to vector<50x256xf32>
    %20 = arith.mulf %19, %11 : vector<50x256xf32>
    %21 = vector.broadcast %13 : vector<50x1xf32> to vector<50x256xf32>
    %22 = arith.addf %20, %21 : vector<50x256xf32>
    %cst_10 = arith.constant 0.318309873 : f32
    %23 = vector.broadcast %cst_10 : f32 to vector<50x256xf32>
    %24 = arith.mulf %22, %23 : vector<50x256xf32>
    %cst_11 = arith.constant 5.000000e-01 : f32
    %25 = vector.broadcast %cst_11 : f32 to vector<50x256xf32>
    %26 = arith.addf %24, %25 : vector<50x256xf32>
    %27 = math.floor %26 : vector<50x256xf32>
    %cst_12 = arith.constant 3.140625 : f32
    %28 = vector.broadcast %cst_12 : f32 to vector<50x256xf32>
    %29 = arith.mulf %27, %28 : vector<50x256xf32>
    %30 = arith.subf %22, %29 : vector<50x256xf32>
    %cst_13 = arith.constant 9.67653584E-4 : f32
    %31 = vector.broadcast %cst_13 : f32 to vector<50x256xf32>
    %32 = arith.mulf %27, %31 : vector<50x256xf32>
    %33 = arith.subf %30, %32 : vector<50x256xf32>
    %34 = arith.mulf %33, %33 : vector<50x256xf32>
    %cst_14 = arith.constant -2.50521079E-8 : f32
    %35 = vector.broadcast %cst_14 : f32 to vector<50x256xf32>
    %36 = arith.mulf %35, %34 : vector<50x256xf32>
    %cst_15 = arith.constant 2.75573188E-6 : f32
    %37 = vector.broadcast %cst_15 : f32 to vector<50x256xf32>
    %38 = arith.addf %36, %37 : vector<50x256xf32>
    %39 = arith.mulf %38, %34 : vector<50x256xf32>
    %cst_16 = arith.constant -1.98412701E-4 : f32
    %40 = vector.broadcast %cst_16 : f32 to vector<50x256xf32>
    %41 = arith.addf %39, %40 : vector<50x256xf32>
    %42 = arith.mulf %41, %34 : vector<50x256xf32>
    %cst_17 = arith.constant 0.00833333377 : f32
    %43 = vector.broadcast %cst_17 : f32 to vector<50x256xf32>
    %44 = arith.addf %42, %43 : vector<50x256xf32>
    %45 = arith.mulf %44, %34 : vector<50x256xf32>
    %cst_18 = arith.constant -0.166666672 : f32
    %46 = vector.broadcast %cst_18 : f32 to vector<50x256xf32>
    %47 = arith.addf %45, %46 : vector<50x256xf32>
    %48 = arith.mulf %33, %34 : vector<50x256xf32>
    %49 = arith.mulf %48, %47 : vector<50x256xf32>
    %50 = arith.addf %33, %49 : vector<50x256xf32>
    %cst_19 = arith.constant 5.000000e-01 : f32
    %51 = vector.broadcast %cst_19 : f32 to vector<50x256xf32>
    %52 = arith.mulf %27, %51 : vector<50x256xf32>
    %53 = math.floor %52 : vector<50x256xf32>
    %cst_20 = arith.constant 2.000000e+00 : f32
    %54 = vector.broadcast %cst_20 : f32 to vector<50x256xf32>
    %55 = arith.mulf %54, %53 : vector<50x256xf32>
    %56 = arith.subf %27, %55 : vector<50x256xf32>
    %cst_21 = arith.constant 2.000000e+00 : f32
    %57 = vector.broadcast %cst_21 : f32 to vector<50x256xf32>
    %58 = arith.mulf %57, %56 : vector<50x256xf32>
    %cst_22 = arith.constant 1.000000e+00 : f32
    %59 = vector.broadcast %cst_22 : f32 to vector<50x256xf32>
    %60 = arith.subf %59, %58 : vector<50x256xf32>
    %61 = arith.mulf %50, %60 : vector<50x256xf32>
    %62 = vector.broadcast %16 : vector<50x1xf32> to vector<50x256xf32>
    %63 = arith.mulf %62, %61 : vector<50x256xf32>
    %64 = arith.addf %18, %63 : vector<50x256xf32>
    %65 = vector.broadcast %14 : vector<50x1xf32> to vector<50x256xf32>
    %66 = arith.mulf %65, %11 : vector<50x256xf32>
    %67 = vector.broadcast %15 : vector<50x1xf32> to vector<50x256xf32>
    %68 = arith.addf %66, %67 : vector<50x256xf32>
    %cst_23 = arith.constant 0.318309873 : f32
    %69 = vector.broadcast %cst_23 : f32 to vector<50x256xf32>
    %70 = arith.mulf %68, %69 : vector<50x256xf32>
    %cst_24 = arith.constant 5.000000e-01 : f32
    %71 = vector.broadcast %cst_24 : f32 to vector<50x256xf32>
    %72 = arith.addf %70, %71 : vector<50x256xf32>
    %73 = math.floor %72 : vector<50x256xf32>
    %cst_25 = arith.constant 3.140625 : f32
    %74 = vector.broadcast %cst_25 : f32 to vector<50x256xf32>
    %75 = arith.mulf %73, %74 : vector<50x256xf32>
    %76 = arith.subf %68, %75 : vector<50x256xf32>
    %cst_26 = arith.constant 9.67653584E-4 : f32
    %77 = vector.broadcast %cst_26 : f32 to vector<50x256xf32>
    %78 = arith.mulf %73, %77 : vector<50x256xf32>
    %79 = arith.subf %76, %78 : vector<50x256xf32>
    %80 = arith.mulf %79, %79 : vector<50x256xf32>
    %cst_27 = arith.constant -2.50521079E-8 : f32
    %81 = vector.broadcast %cst_27 : f32 to vector<50x256xf32>
    %82 = arith.mulf %81, %80 : vector<50x256xf32>
    %cst_28 = arith.constant 2.75573188E-6 : f32
    %83 = vector.broadcast %cst_28 : f32 to vector<50x256xf32>
    %84 = arith.addf %82, %83 : vector<50x256xf32>
    %85 = arith.mulf %84, %80 : vector<50x256xf32>
    %cst_29 = arith.constant -1.98412701E-4 : f32
    %86 = vector.broadcast %cst_29 : f32 to vector<50x256xf32>
    %87 = arith.addf %85, %86 : vector<50x256xf32>
    %88 = arith.mulf %87, %80 : vector<50x256xf32>
    %cst_30 = arith.constant 0.00833333377 : f32
    %89 = vector.broadcast %cst_30 : f32 to vector<50x256xf32>
    %90 = arith.addf %88, %89 : vector<50x256xf32>
    %91 = arith.mulf %90, %80 : vector<50x256xf32>
    %cst_31 = arith.constant -0.166666672 : f32
    %92 = vector.broadcast %cst_31 : f32 to vector<50x256xf32>
    %93 = arith.addf %91, %92 : vector<50x256xf32>
    %94 = arith.mulf %79, %80 : vector<50x256xf32>
    %95 = arith.mulf %94, %93 : vector<50x256xf32>
    %96 = arith.addf %79, %95 : vector<50x256xf32>
    %cst_32 = arith.constant 5.000000e-01 : f32
    %97 = vector.broadcast %cst_32 : f32 to vector<50x256xf32>
    %98 = arith.mulf %73, %97 : vector<50x256xf32>
    %99 = math.floor %98 : vector<50x256xf32>
    %cst_33 = arith.constant 2.000000e+00 : f32
    %100 = vector.broadcast %cst_33 : f32 to vector<50x256xf32>
    %101 = arith.mulf %100, %99 : vector<50x256xf32>
    %102 = arith.subf %73, %101 : vector<50x256xf32>
    %cst_34 = arith.constant 2.000000e+00 : f32
    %103 = vector.broadcast %cst_34 : f32 to vector<50x256xf32>
    %104 = arith.mulf %103, %102 : vector<50x256xf32>
    %cst_35 = arith.constant 1.000000e+00 : f32
    %105 = vector.broadcast %cst_35 : f32 to vector<50x256xf32>
    %106 = arith.subf %105, %104 : vector<50x256xf32>
    %107 = arith.mulf %96, %106 : vector<50x256xf32>
    %108 = vector.broadcast %17 : vector<50x1xf32> to vector<50x256xf32>
    %109 = arith.mulf %108, %107 : vector<50x256xf32>
    %110 = arith.addf %64, %109 : vector<50x256xf32>
    %cst_36 = arith.constant dense<0.000000e+00> : vector<50x256xf32>
    %111 = tpu.matmul %1, %110, %cst_36 {dimension_numbers = #tpu.dot_dimension_numbers<[1], [0], [0], [1], [0, 0, 1, 1], [], []>} : vector<50x50xf32>, vector<50x256xf32>, vector<50x256xf32> -> vector<50x256xf32>
    %112 = vector.broadcast %5 : vector<50x1xf32> to vector<50x256xf32>
    %113 = arith.addf %111, %112 : vector<50x256xf32>
    %114 = vector.extract_strided_slice %6 {offsets = [0, 0], sizes = [50, 1], strides = [1, 1]} : vector<50x6xf32> to vector<50x1xf32>
    %115 = vector.extract_strided_slice %6 {offsets = [0, 1], sizes = [50, 1], strides = [1, 1]} : vector<50x6xf32> to vector<50x1xf32>
    %116 = vector.extract_strided_slice %6 {offsets = [0, 2], sizes = [50, 1], strides = [1, 1]} : vector<50x6xf32> to vector<50x1xf32>
    %117 = vector.extract_strided_slice %6 {offsets = [0, 3], sizes = [50, 1], strides = [1, 1]} : vector<50x6xf32> to vector<50x1xf32>
    %118 = vector.extract_strided_slice %6 {offsets = [0, 4], sizes = [50, 1], strides = [1, 1]} : vector<50x6xf32> to vector<50x1xf32>
    %119 = vector.extract_strided_slice %6 {offsets = [0, 5], sizes = [50, 1], strides = [1, 1]} : vector<50x6xf32> to vector<50x1xf32>
    %120 = math.tanh %113 : vector<50x256xf32>
    %121 = vector.broadcast %114 : vector<50x1xf32> to vector<50x256xf32>
    %122 = arith.mulf %121, %113 : vector<50x256xf32>
    %123 = vector.broadcast %115 : vector<50x1xf32> to vector<50x256xf32>
    %124 = arith.addf %122, %123 : vector<50x256xf32>
    %cst_37 = arith.constant 0.318309873 : f32
    %125 = vector.broadcast %cst_37 : f32 to vector<50x256xf32>
    %126 = arith.mulf %124, %125 : vector<50x256xf32>
    %cst_38 = arith.constant 5.000000e-01 : f32
    %127 = vector.broadcast %cst_38 : f32 to vector<50x256xf32>
    %128 = arith.addf %126, %127 : vector<50x256xf32>
    %129 = math.floor %128 : vector<50x256xf32>
    %cst_39 = arith.constant 3.140625 : f32
    %130 = vector.broadcast %cst_39 : f32 to vector<50x256xf32>
    %131 = arith.mulf %129, %130 : vector<50x256xf32>
    %132 = arith.subf %124, %131 : vector<50x256xf32>
    %cst_40 = arith.constant 9.67653584E-4 : f32
    %133 = vector.broadcast %cst_40 : f32 to vector<50x256xf32>
    %134 = arith.mulf %129, %133 : vector<50x256xf32>
    %135 = arith.subf %132, %134 : vector<50x256xf32>
    %136 = arith.mulf %135, %135 : vector<50x256xf32>
    %cst_41 = arith.constant -2.50521079E-8 : f32
    %137 = vector.broadcast %cst_41 : f32 to vector<50x256xf32>
    %138 = arith.mulf %137, %136 : vector<50x256xf32>
    %cst_42 = arith.constant 2.75573188E-6 : f32
    %139 = vector.broadcast %cst_42 : f32 to vector<50x256xf32>
    %140 = arith.addf %138, %139 : vector<50x256xf32>
    %141 = arith.mulf %140, %136 : vector<50x256xf32>
    %cst_43 = arith.constant -1.98412701E-4 : f32
    %142 = vector.broadcast %cst_43 : f32 to vector<50x256xf32>
    %143 = arith.addf %141, %142 : vector<50x256xf32>
    %144 = arith.mulf %143, %136 : vector<50x256xf32>
    %cst_44 = arith.constant 0.00833333377 : f32
    %145 = vector.broadcast %cst_44 : f32 to vector<50x256xf32>
    %146 = arith.addf %144, %145 : vector<50x256xf32>
    %147 = arith.mulf %146, %136 : vector<50x256xf32>
    %cst_45 = arith.constant -0.166666672 : f32
    %148 = vector.broadcast %cst_45 : f32 to vector<50x256xf32>
    %149 = arith.addf %147, %148 : vector<50x256xf32>
    %150 = arith.mulf %135, %136 : vector<50x256xf32>
    %151 = arith.mulf %150, %149 : vector<50x256xf32>
    %152 = arith.addf %135, %151 : vector<50x256xf32>
    %cst_46 = arith.constant 5.000000e-01 : f32
    %153 = vector.broadcast %cst_46 : f32 to vector<50x256xf32>
    %154 = arith.mulf %129, %153 : vector<50x256xf32>
    %155 = math.floor %154 : vector<50x256xf32>
    %cst_47 = arith.constant 2.000000e+00 : f32
    %156 = vector.broadcast %cst_47 : f32 to vector<50x256xf32>
    %157 = arith.mulf %156, %155 : vector<50x256xf32>
    %158 = arith.subf %129, %157 : vector<50x256xf32>
    %cst_48 = arith.constant 2.000000e+00 : f32
    %159 = vector.broadcast %cst_48 : f32 to vector<50x256xf32>
    %160 = arith.mulf %159, %158 : vector<50x256xf32>
    %cst_49 = arith.constant 1.000000e+00 : f32
    %161 = vector.broadcast %cst_49 : f32 to vector<50x256xf32>
    %162 = arith.subf %161, %160 : vector<50x256xf32>
    %163 = arith.mulf %152, %162 : vector<50x256xf32>
    %164 = vector.broadcast %118 : vector<50x1xf32> to vector<50x256xf32>
    %165 = arith.mulf %164, %163 : vector<50x256xf32>
    %166 = arith.addf %120, %165 : vector<50x256xf32>
    %167 = vector.broadcast %116 : vector<50x1xf32> to vector<50x256xf32>
    %168 = arith.mulf %167, %113 : vector<50x256xf32>
    %169 = vector.broadcast %117 : vector<50x1xf32> to vector<50x256xf32>
    %170 = arith.addf %168, %169 : vector<50x256xf32>
    %cst_50 = arith.constant 0.318309873 : f32
    %171 = vector.broadcast %cst_50 : f32 to vector<50x256xf32>
    %172 = arith.mulf %170, %171 : vector<50x256xf32>
    %cst_51 = arith.constant 5.000000e-01 : f32
    %173 = vector.broadcast %cst_51 : f32 to vector<50x256xf32>
    %174 = arith.addf %172, %173 : vector<50x256xf32>
    %175 = math.floor %174 : vector<50x256xf32>
    %cst_52 = arith.constant 3.140625 : f32
    %176 = vector.broadcast %cst_52 : f32 to vector<50x256xf32>
    %177 = arith.mulf %175, %176 : vector<50x256xf32>
    %178 = arith.subf %170, %177 : vector<50x256xf32>
    %cst_53 = arith.constant 9.67653584E-4 : f32
    %179 = vector.broadcast %cst_53 : f32 to vector<50x256xf32>
    %180 = arith.mulf %175, %179 : vector<50x256xf32>
    %181 = arith.subf %178, %180 : vector<50x256xf32>
    %182 = arith.mulf %181, %181 : vector<50x256xf32>
    %cst_54 = arith.constant -2.50521079E-8 : f32
    %183 = vector.broadcast %cst_54 : f32 to vector<50x256xf32>
    %184 = arith.mulf %183, %182 : vector<50x256xf32>
    %cst_55 = arith.constant 2.75573188E-6 : f32
    %185 = vector.broadcast %cst_55 : f32 to vector<50x256xf32>
    %186 = arith.addf %184, %185 : vector<50x256xf32>
    %187 = arith.mulf %186, %182 : vector<50x256xf32>
    %cst_56 = arith.constant -1.98412701E-4 : f32
    %188 = vector.broadcast %cst_56 : f32 to vector<50x256xf32>
    %189 = arith.addf %187, %188 : vector<50x256xf32>
    %190 = arith.mulf %189, %182 : vector<50x256xf32>
    %cst_57 = arith.constant 0.00833333377 : f32
    %191 = vector.broadcast %cst_57 : f32 to vector<50x256xf32>
    %192 = arith.addf %190, %191 : vector<50x256xf32>
    %193 = arith.mulf %192, %182 : vector<50x256xf32>
    %cst_58 = arith.constant -0.166666672 : f32
    %194 = vector.broadcast %cst_58 : f32 to vector<50x256xf32>
    %195 = arith.addf %193, %194 : vector<50x256xf32>
    %196 = arith.mulf %181, %182 : vector<50x256xf32>
    %197 = arith.mulf %196, %195 : vector<50x256xf32>
    %198 = arith.addf %181, %197 : vector<50x256xf32>
    %cst_59 = arith.constant 5.000000e-01 : f32
    %199 = vector.broadcast %cst_59 : f32 to vector<50x256xf32>
    %200 = arith.mulf %175, %199 : vector<50x256xf32>
    %201 = math.floor %200 : vector<50x256xf32>
    %cst_60 = arith.constant 2.000000e+00 : f32
    %202 = vector.broadcast %cst_60 : f32 to vector<50x256xf32>
    %203 = arith.mulf %202, %201 : vector<50x256xf32>
    %204 = arith.subf %175, %203 : vector<50x256xf32>
    %cst_61 = arith.constant 2.000000e+00 : f32
    %205 = vector.broadcast %cst_61 : f32 to vector<50x256xf32>
    %206 = arith.mulf %205, %204 : vector<50x256xf32>
    %cst_62 = arith.constant 1.000000e+00 : f32
    %207 = vector.broadcast %cst_62 : f32 to vector<50x256xf32>
    %208 = arith.subf %207, %206 : vector<50x256xf32>
    %209 = arith.mulf %198, %208 : vector<50x256xf32>
    %210 = vector.broadcast %119 : vector<50x1xf32> to vector<50x256xf32>
    %211 = arith.mulf %210, %209 : vector<50x256xf32>
    %212 = arith.addf %166, %211 : vector<50x256xf32>
    %213 = vector.broadcast %7 : vector<50x1xf32> to vector<50x256xf32>
    %214 = arith.mulf %212, %213 : vector<50x256xf32>
    %cst_63 = arith.constant dense<0.000000e+00> : vector<256xf32>
    %215 = vector.multi_reduction <add>, %214, %cst_63 [0] : vector<50x256xf32> to vector<256xf32>
    %216 = vector.shape_cast %215 : vector<256xf32> to vector<1x256xf32>
    %217 = vector.broadcast %8 : vector<1x1xf32> to vector<1x256xf32>
    %218 = arith.addf %216, %217 : vector<1x256xf32>
    %c0_64 = arith.constant 0 : index
    %c0_65 = arith.constant 0 : index
    %219 = vector.load %arg3[%c0_64, %c0_65] : memref<1x256xf32, #tpu.memory_space<vmem>>, vector<1x256xf32>
    tpu.vector_store %arg3[%c0_64, %c0_65], %218 {strides = array<i32>} : memref<1x256xf32, #tpu.memory_space<vmem>>, vector<1x256xf32>,
    return
  }
  func.func @transform_0(%arg0: i32) -> (i32, i32) {
    %c0_i32 = arith.constant 0 : i32
    %c0_i32_0 = arith.constant 0 : i32
    return %c0_i32, %arg0 : i32, i32
  }
  func.func @transform_1(%arg0: i32) -> (i32, i32) {
    %c0_i32 = arith.constant 0 : i32
    %c0_i32_0 = arith.constant 0 : i32
    %c0_i32_1 = arith.constant 0 : i32
    return %c0_i32, %c0_i32_0 : i32, i32
  }
  func.func @transform_2(%arg0: i32) -> (i32, i32) {
    %c0_i32 = arith.constant 0 : i32
    %c0_i32_0 = arith.constant 0 : i32
    return %c0_i32, %arg0 : i32, i32
  }
}

</mosaic_0001>

<bundles_post_ra>
// kernel: _forward_impl.1
= control target key start
LH: loop header
LB: loop body
LE: loop exit
PB: predicated region body
PF: predicated region fallthrough
CT: control target
= control target key end

     0   :  { %s2717_s13 = smov 78   ;;  %v2718_v4 = vmov 53   ;;  %v4834_v6 = vmov 0.0   ;;  %vm87_vm0 = vcmask 1042432   ;;  %s4831_s0 = inlined_call_operand.vmem [shape: f32[3,256], index: 0, kind: input, shape index: {}]   ;;  %s4832_s1 = inlined_call_operand.vmem [shape: f32[50,128], index: 1, kind: input, shape index: {}]   ;;  %s4833_s2 = inlined_call_operand.hbm [shape: f32[1,256], index: 2, kind: output, shape index: {}]  }
   0x1   :  { %v2755_v0 = vld [vmem:[%s4832_s1] sm:$0xff]  ;;  %v2760_v1 = vld [vmem:[%s4832_s1 + $0x10] sm:$0xff]  ;;  %v2767_v2 = vld [vmem:[%s4832_s1 + $0x8] sm:$0xff]  ;;  %2570 = vset.pattern.permute.xlu1 %v2718_v4  ;;  %156 = vmatprep.mubr.f32.mxu0 %v4834_v6 }
   0x2   :  { %56 = vrot.lane.b32.xlu0 %v2755_v0, %s2717_s13  ;;  %60 = vrot.lane.b32.xlu1 %v2760_v1, %s2717_s13  ;;  %v2772_v3 = vld [vmem:[%s4832_s1 + $0x18] sm:$0xff]  ;;  %v12_v5 = vld [vmem:[%s4831_s0] sm:$0x77] }
   0x3   :  { %v71_v7 = vcombine.high %v12_v5, %v12_v5  ;;  %2571 = vset.pattern.permute.xlu0 %v2718_v4  ;;  %1341 = vmatprep.mubr.f32.mxu1 %v4834_v6 }
   0x4   :  { %7 = vsyncpa [#allocation3], 0  ;;  %v2786_v8 = vld [vmem:[%s4832_s1 + $0x20] sm:$0xff]  ;;  %v2791_v9 = vld [vmem:[%s4832_s1 + $0x28] sm:$0xff]  ;;  %v2720_v11 = vmov 54   ;;  %v2721_v12 = vmov 55  }
   0x5   :  { %2512 = vmatprep.subr.msk.mxu0 %vm87_vm0, %v71_v7  ;;  %v2798_v10 = vld [vmem:[%s4832_s1 + $0x30] sm:$0x3]  ;;  %v2722_v13 = vmov 56   ;;  %v2723_v14 = vmov 57   ;;  %v2724_v15 = vmov 59   ;;  %v2725_v16 = vmov 58  }
   0x6   :  { %58 = vrot.lane.b32.xlu0 %v2767_v2, %s2717_s13  ;;  %62 = vrot.lane.b32.xlu1 %v2772_v3, %s2717_s13  ;;  %vm72_vm1 = vcmask 23552   ;;  %vm1264_vm2 = vcmask 1041408   ;;  %vm1249_vm3 = vcmask 408576  }
   0x7   :  { %2513 = vmatpush1.msk.msra.mxu0 %vm87_vm0, %v12_v5 }
   0xa   :  { %64 = vrot.lane.b32.xlu0 %v2786_v8, %s2717_s13  ;;  %66 = vrot.lane.b32.xlu1 %v2791_v9, %s2717_s13 }
   0xe   :  { %68 = vrot.lane.b32.xlu0 %v2798_v10, %s2717_s13  ;;  %23 = vperm.xlu1 %2570, %v2755_v0  }
  0x12   :  { %2572 = vset.pattern.permute.xlu1 %v2720_v11  ;;  %28 = vperm.xlu0 %2571, %v2767_v2  }
  0x13   :  { %214 = vperm.xlu1 %2572, %v2755_v0  }
  0x16   :  { %33 = vperm.xlu0 %2571, %v2760_v1  }
  0x17   :  { %218 = vperm.xlu1 %2572, %v2767_v2  }
  0x1a   :  { %48 = vperm.xlu0 %2571, %v2791_v9  }
  0x1b   :  { %2573 = vset.pattern.permute.xlu1 %v2718_v4 }
  0x1c   :  { %38 = vperm.xlu1 %2573, %v2772_v3  }
  0x1e   :  { %2582 = vset.pattern.permute.xlu0 %v2720_v11 }
  0x1f   :  { %234 = vperm.xlu0 %2582, %v2791_v9  }
  0x20   :  { %2574 = vset.pattern.permute.xlu1 %v2721_v12 }
  0x21   :  { %260 = vperm.xlu1 %2574, %v2767_v2  }
  0x23   :  { %2583 = vset.pattern.permute.xlu0 %v2721_v12 }
  0x24   :  { %256 = vperm.xlu0 %2583, %v2755_v0  }
  0x25   :  { %2575 = vset.pattern.permute.xlu1 %v2722_v13 }
  0x26   :  { %718 = vperm.xlu1 %2575, %v2755_v0  }
  0x28   :  { %272 = vperm.xlu0 %2583, %v2786_v8  }
  0x2a   :  { %2576 = vset.pattern.permute.xlu1 %v2720_v11 }
  0x2b   :  { %222 = vperm.xlu1 %2576, %v2760_v1  }
  0x2c   :  { %2585 = vset.pattern.permute.xlu0 %v2722_v13 }
  0x2d   :  { %722 = vperm.xlu0 %2585, %v2767_v2  }
  0x2f   :  { %226 = vperm.xlu1 %2576, %v2772_v3  }
  0x31   :  { %726 = vperm.xlu0 %2585, %v2760_v1  }
  0x33   :  { %2577 = vset.pattern.permute.xlu1 %v2723_v14 }
  0x34   :  { %764 = vperm.xlu1 %2577, %v2767_v2  }
  0x35   :  { %738 = vperm.xlu0 %2585, %v2791_v9  }
  0x38   :  { %2578 = vset.pattern.permute.xlu1 %v2718_v4 }
  0x39   :  { %43 = vperm.xlu1 %2578, %v2786_v8   ;;  %2588 = vset.pattern.permute.xlu0 %v2723_v14 }
  0x3a   :  { %760 = vperm.xlu0 %2588, %v2755_v0  }
  0x3d   :  { %2579 = vset.pattern.permute.xlu1 %v2721_v12 }
  0x3e   :  { %264 = vperm.xlu1 %2579, %v2760_v1   ;;  %780 = vperm.xlu0 %2588, %v2791_v9  }
  0x42   :  { %268 = vperm.xlu1 %2579, %v2772_v3   ;;  %2593 = vset.pattern.permute.xlu0 %v2722_v13 }
  0x43   :  { %742 = vperm.xlu0 %2593, %v2798_v10  }
  0x46   :  { %2580 = vset.pattern.permute.xlu1 %v2722_v13 }
  0x47   :  { %730 = vperm.xlu1 %2580, %v2772_v3   ;;  %2598 = vset.pattern.permute.xlu0 %v2724_v15 }
  0x48   :  { %1174 = vperm.xlu0 %2598, %v2760_v1  }
  0x4b   :  { %2581 = vset.pattern.permute.xlu1 %v2720_v11 }
  0x4c   :  { %230 = vperm.xlu1 %2581, %v2786_v8   ;;  %2599 = vset.pattern.permute.xlu0 %v2725_v16 }
  0x4d   :  { %666 = vperm.xlu0 %2599, %v2767_v2  }
  0x50   :  { %2584 = vset.pattern.permute.xlu1 %v2723_v14 }
  0x51   :  { %768 = vperm.xlu1 %2584, %v2760_v1   ;;  %670 = vperm.xlu0 %2599, %v2760_v1  }
  0x55   :  { %772 = vperm.xlu1 %2584, %v2772_v3   ;;  %682 = vperm.xlu0 %2599, %v2791_v9  }
  0x59   :  { %2586 = vset.pattern.permute.xlu1 %v2721_v12  ;;  %686 = vperm.xlu0 %2599, %v2798_v10  }
  0x5a   :  { %276 = vperm.xlu1 %2586, %v2791_v9  }
  0x5e   :  { %2587 = vset.pattern.permute.xlu1 %v2722_v13 }
  0x5f   :  { %734 = vperm.xlu1 %2587, %v2786_v8  }
  0x63   :  { %2589 = vset.pattern.permute.xlu1 %v2718_v4 }
  0x64   :  { %53 = vperm.xlu1 %2589, %v2798_v10  }
  0x68   :  { %2590 = vset.pattern.permute.xlu1 %v2723_v14 }
  0x69   :  { %776 = vperm.xlu1 %2590, %v2786_v8  }
  0x6d   :  { %2591 = vset.pattern.permute.xlu1 %v2720_v11 }
  0x6e   :  { %238 = vperm.xlu1 %2591, %v2798_v10  }
  0x72   :  { %2592 = vset.pattern.permute.xlu1 %v2721_v12 }
  0x73   :  { %280 = vperm.xlu1 %2592, %v2798_v10  }
  0x74   :  { %v57_v17 = vpop.permute.xlu0 %56  ;;  %v61_v19 = vpop.permute.xlu1 %60 }
  0x75   :  { %2514 = vmatmul.mubr.msk.f32.vlgmr.msra.gmra.mrb[0].mxu0 %vm72_vm1, %v57_v17 }
  0x76   :  { %162 = vmatprep.mubr.f32.mxu0 %v4834_v6 }
  0x77   :  { %2594 = vset.pattern.permute.xlu1 %v2723_v14 }
  0x78   :  { %v59_v18 = vpop.permute.xlu0 %58  ;;  %784 = vperm.xlu1 %2594, %v2798_v10   ;;  %v63_v20 = vpop.permute.xlu1 %62 }
  0x79   :  { %2515 = vmatmul.mubr.msk.f32.gmra.mrb[2].mxu0 %vm72_vm1, %v59_v18 }
  0x7a   :  { %168 = vmatprep.mubr.f32.mxu0 %v4834_v6 }
  0x7c   :  { %2595 = vset.pattern.permute.xlu1 %v2725_v16  ;;  %v65_v21 = vpop.permute.xlu0 %64  ;;  %v67_v22 = vpop.permute.xlu1 %66 }
  0x7d   :  { %2516 = vmatmul.mubr.msk.f32.gmra.mrb[4].mxu0 %vm72_vm1, %v61_v19  ;;  %662 = vperm.xlu1 %2595, %v2755_v0  }
  0x7e   :  { %174 = vmatprep.mubr.f32.mxu0 %v4834_v6 }
  0x80   :  { %v69_v23 = vpop.permute.xlu0 %68 }
  0x81   :  { %2517 = vmatmul.mubr.msk.f32.gmra.mrb[6].mxu0 %vm72_vm1, %v63_v20  ;;  %2596 = vset.pattern.permute.xlu1 %v2724_v15 }
  0x82   :  { %180 = vmatprep.mubr.f32.mxu0 %v4834_v6  ;;  %1166 = vperm.xlu1 %2596, %v2755_v0  }
  0x85   :  { %2518 = vmatmul.mubr.msk.f32.gmra.mrb[8].mxu0 %vm72_vm1, %v65_v21 }
  0x86   :  { %186 = vmatprep.mubr.f32.mxu0 %v4834_v6  ;;  %1170 = vperm.xlu1 %2596, %v2767_v2  }
  0x89   :  { %2519 = vmatmul.mubr.msk.f32.gmra.mrb[10].mxu0 %vm72_vm1, %v67_v22 }
  0x8a   :  { %192 = vmatprep.mubr.f32.mxu0 %v4834_v6  ;;  %2597 = vset.pattern.permute.xlu1 %v2725_v16 }
  0x8b   :  { %674 = vperm.xlu1 %2597, %v2772_v3  }
  0x8d   :  { %2520 = vmatmul.mubr.msk.f32.gmra.mrb[12].mxu0 %vm72_vm1, %v69_v23  ;;  %v24_v24 = vpop.permute.xlu1 %23 }
  0x8e   :  { %1335 = vmatprep.mubr.f32.mxu0 %v4834_v6 }
  0x8f   :  { %2600 = vset.pattern.permute.xlu1 %v2724_v15 }
  0x90   :  { %1178 = vperm.xlu1 %2600, %v2772_v3  }
  0x91   :  { %v29_v28 = vpop.permute.xlu0 %28 }
  0x92   :  { %v215_v25 = vpop.permute.xlu1 %214 }
  0x94   :  { %2601 = vset.pattern.permute.xlu1 %v2725_v16 }
  0x95   :  { %678 = vperm.xlu1 %2601, %v2786_v8   ;;  %v2874_v30 = vpop.permute.xlu0 %33 }
  0x96   :  { %v219_v26 = vpop.permute.xlu1 %218 }
  0x99   :  { %2602 = vset.pattern.permute.xlu1 %v2724_v15  ;;  %v2876_v32 = vpop.permute.xlu0 %48 }
  0x9a   :  { %1182 = vperm.xlu1 %2602, %v2786_v8  }
  0x9b   :  { %v2872_v27 = vpop.permute.xlu1 %38 }
  0x9e   :  { %1186 = vperm.xlu1 %2602, %v2791_v9   ;;  %v2880_v34 = vpop.permute.xlu0 %234 }
  0xa0   :  { %v261_v29 = vpop.permute.xlu1 %260 }
  0xa2   :  { %1190 = vperm.xlu1 %2602, %v2798_v10  }
  0xa3   :  { %v257_v36 = vpop.permute.xlu0 %256 }
  0xa5   :  { %v719_v31 = vpop.permute.xlu1 %718 }
  0xa7   :  { %v2884_v38 = vpop.permute.xlu0 %272 }
  0xaa   :  { %v2878_v33 = vpop.permute.xlu1 %222 }
  0xac   :  { %v723_v40 = vpop.permute.xlu0 %722 }
  0xae   :  { %v2882_v35 = vpop.permute.xlu1 %226 }
  0xb0   :  { %v2890_v42 = vpop.permute.xlu0 %726 }
  0xb3   :  { %v765_v37 = vpop.permute.xlu1 %764 }
  0xb4   :  { %v2896_v45 = vpop.permute.xlu0 %738 }
  0xb8   :  { %v2886_v39 = vpop.permute.xlu1 %43 }
  0xb9   :  { %v761_v51 = vpop.permute.xlu0 %760 }
  0xbd   :  { %v2888_v41 = vpop.permute.xlu1 %264 }
  0xc1   :  { %v2892_v43 = vpop.permute.xlu1 %268 }
  0xc6   :  { %v2894_v44 = vpop.permute.xlu1 %730 }
  0xcb   :  { %v2898_v49 = vpop.permute.xlu1 %230 }
  0xd0   :  { %v2905_v3 = vpop.permute.xlu1 %768 }
 0x148   :  { %v158_v46 = vpop.f32.mrb[0].mxu0 }
 0x149   :  { %v159_v47 = vadd.f32 %v158_v46, %v24_v24  ;;  %v160_v48 = vpop.f32.mrb[1].mxu0 }
 0x14a   :  { %v161_v50 = vadd.f32 %v160_v48, %v24_v24 }
 0x14b   :  { %v241_v52 = vmul.f32 %v215_v25, %v159_v47  ;;  %v745_v53 = vmul.f32 %v719_v31, %v159_v47  ;;  %2630 = vtanh.f32 %v159_v47 }
 0x14c   :  { %v242_v54 = vmul.f32 %v215_v25, %v161_v50  ;;  %v746_v55 = vmul.f32 %v719_v31, %v161_v50  ;;  %v164_v56 = vpop.f32.mrb[2].mxu0  ;;  %2632 = vtanh.f32 %v161_v50 }
 0x14d   :  { %v2900_v57 = vadd.f32 %v257_v36, %v241_v52  ;;  %v787_v58 = vadd.f32 %v761_v51, %v745_v53  ;;  %v165_v59 = vadd.f32 %v164_v56, %v29_v28  ;;  %v166_v60 = vpop.f32.mrb[3].mxu0 }
 0x14e   :  { %v2902_v61 = vadd.f32 %v257_v36, %v242_v54  ;;  %v788_v62 = vadd.f32 %v761_v51, %v746_v55  ;;  %v167_v63 = vadd.f32 %v166_v60, %v29_v28 }
 0x14f   :  { %v297_v0 = vmul.f32 0.31830987, %v2900_v57  ;;  %v801_v1 = vmul.f32 0.31830987, %v787_v58  ;;  %v243_v2 = vmul.f32 %v219_v26, %v165_v59  ;;  %v747_v7 = vmul.f32 %v723_v40, %v165_v59 }
 0x150   :  { %v298_v4 = vmul.f32 0.31830987, %v2902_v61  ;;  %v802_v5 = vmul.f32 0.31830987, %v788_v62  ;;  %v170_v8 = vpop.f32.mrb[4].mxu0  ;;  %v244_v12 = vmul.f32 %v219_v26, %v167_v63  ;;  %v748_v17 = vmul.f32 %v723_v40, %v167_v63  ;;  %v2927_v40 = vpop.permute.xlu1 %772 }
 0x151   :  { %v311_v9 = vadd.f32 0.5, %v297_v0  ;;  %v815_v10 = vadd.f32 0.5, %v801_v1  ;;  %v2908_v11 = vadd.f32 %v261_v29, %v243_v2  ;;  %v172_v13 = vpop.f32.mrb[5].mxu0  ;;  %v2910_v16 = vadd.f32 %v765_v37, %v747_v7 }
 0x152   :  { %v312_v14 = vadd.f32 0.5, %v298_v4  ;;  %v816_v15 = vadd.f32 0.5, %v802_v5  ;;  %v2917_v21 = vadd.f32 %v261_v29, %v244_v12  ;;  %v2924_v25 = vadd.f32 %v765_v37, %v748_v17 }
 0x153   :  { %4946 = vst [vmem:[#allocation5_spill] sm:$0xff] %v2908_v11  ;;  %v2912_v18 = vfloor.f32 %v311_v9  ;;  %v2914_v19 = vfloor.f32 %v815_v10  ;;  %v299_v20 = vmul.f32 0.31830987, %v2908_v11  ;;  %v803_v24 = vmul.f32 0.31830987, %v2910_v16 }
 0x154   :  { %4947 = vst [vmem:[#allocation6_spill] sm:$0xff] %v2917_v21  ;;  %v2919_v22 = vfloor.f32 %v312_v14  ;;  %v2921_v23 = vfloor.f32 %v816_v15  ;;  %4948 = vst [vmem:[#allocation7_spill] sm:$0xff] %v2924_v25  ;;  %v176_v26 = vpop.f32.mrb[6].mxu0  ;;  %v300_v51 = vmul.f32 0.31830987, %v2917_v21  ;;  %v2943_v60 = vadd.f32 %v170_v8, %v2874_v30  ;;  %v2947_v1 = vpop.permute.xlu1 %276 }
 0x155   :  { %v843_v28 = vmul.f32 3.140625, %v2914_v19  ;;  %v313_v31 = vadd.f32 0.5, %v299_v20  ;;  %v178_v36 = vpop.f32.mrb[7].mxu0  ;;  %v2931_v29 = vmul.f32 3.140625, %v2912_v18  ;;  %v817_v48 = vadd.f32 0.5, %v803_v24 }
 0x156   :  { %v844_v46 = vmul.f32 3.140625, %v2921_v23  ;;  %v2935_v52 = vmul.f32 3.140625, %v2919_v22  ;;  %v804_v53 = vmul.f32 0.31830987, %v2924_v25  ;;  %v871_v47 = vmul.f32 0.0009676536, %v2914_v19 }
 0x157   :  { %v857_v37 = vsub.f32 %v787_v58, %v843_v28  ;;  %v2940_v56 = vfloor.f32 %v313_v31  ;;  %2634 = vtanh.f32 %v165_v59  ;;  %v314_v2 = vadd.f32 0.5, %v300_v51 }
 0x158   :  { %v2938_v54 = vpop.f32.mrb[8].mxu0  ;;  %v858_v55 = vsub.f32 %v788_v62, %v844_v46  ;;  %v2951_v58 = vadd.f32 %v172_v13, %v2874_v30  ;;  %v872_v62 = vmul.f32 0.0009676536, %v2921_v23  ;;  %v2956_v4 = vfloor.f32 %v817_v48  ;;  %v2995_v46 = vpop.permute.xlu1 %734 }
 0x159   :  { %4949 = vst [vmem:[#allocation8_spill] sm:$0xff] %v2940_v56  ;;  %v2945_v0 = vpop.f32.mrb[9].mxu0  ;;  %2636 = vtanh.f32 %v167_v63  ;;  %v2960_v7 = vsub.f32 %v857_v37, %v871_v47  ;;  %v818_v8 = vadd.f32 0.5, %v804_v53  ;;  %v245_v59 = vmul.f32 %v2878_v33, %v2943_v60  ;;  %v3015_v47 = vpop.eup %2630 }
 0x15a   :  { %v2966_v30 = vsub.f32 %v858_v55, %v872_v62  ;;  %v2969_v10 = vmul.f32 3.140625, %v2940_v56  ;;  %v749_v12 = vmul.f32 %v2890_v42, %v2943_v60  ;;  %v246_v63 = vmul.f32 %v2878_v33, %v2951_v58  ;;  %4954 = vst [vmem:[#allocation13_spill] sm:$0xff] %v3015_v47 }
 0x15b   :  { %v2977_v14 = vfloor.f32 %v314_v2  ;;  %v2980_v15 = vadd.f32 %v2888_v41, %v245_v59  ;;  %v750_v17 = vmul.f32 %v2890_v42, %v2951_v58  ;;  %v177_v20 = vadd.f32 %v176_v26, %v2872_v27  ;;  %v3022_v59 = vpop.eup %2632 }
 0x15c   :  { %v2964_v9 = vpop.f32.mrb[10].mxu0  ;;  %4950 = vst [vmem:[#allocation9_spill] sm:$0xff] %v2969_v10  ;;  %v2986_v24 = vmul.f32 3.140625, %v2956_v4  ;;  %v2989_v28 = vadd.f32 %v2905_v3, %v749_v12  ;;  %v2992_v33 = vadd.f32 %v2888_v41, %v246_v63  ;;  %v179_v31 = vadd.f32 %v178_v36, %v2872_v27  ;;  %4956 = vst [vmem:[#allocation15_spill] sm:$0xff] %v3022_v59 }
 0x15d   :  { %v2975_v13 = vpop.f32.mrb[11].mxu0  ;;  %4951 = vst [vmem:[#allocation10_spill] sm:$0xff] %v2977_v14  ;;  %4952 = vst [vmem:[#allocation11_spill] sm:$0xff] %v2980_v15  ;;  %v2999_v48 = vmul.f32 %v2960_v7, %v2960_v7  ;;  %v3001_v42 = vfloor.f32 %v818_v8  ;;  %v301_v26 = vmul.f32 0.31830987, %v2980_v15  ;;  %v3005_v51 = vadd.f32 %v2905_v3, %v750_v17 }
 0x15e   :  { %4953 = vst [vmem:[#allocation12_spill] sm:$0xff] %v2992_v33  ;;  %v805_v41 = vmul.f32 0.31830987, %v2989_v28  ;;  %v302_v53 = vmul.f32 0.31830987, %v2992_v33  ;;  %v247_v27 = vmul.f32 %v2882_v35, %v177_v20  ;;  %v751_v36 = vmul.f32 %v2894_v44, %v177_v20  ;;  %v781_v33 = vpop.permute.xlu0 %780 }
 0x15f   :  { %v3018_v2 = vmul.f32 3.140625, %v2977_v14  ;;  %v315_v62 = vadd.f32 0.5, %v301_v26  ;;  %v806_v3 = vmul.f32 0.31830987, %v3005_v51  ;;  %v248_v8 = vmul.f32 %v2882_v35, %v179_v31 }
 0x160   :  { %v3007_v37 = vpop.f32.mrb[12].mxu0  ;;  %v819_v12 = vadd.f32 0.5, %v805_v41  ;;  %v316_v63 = vadd.f32 0.5, %v302_v53  ;;  %v3025_v17 = vadd.f32 %v2892_v43, %v247_v27  ;;  %v3028_v6 = vadd.f32 %v2927_v40, %v751_v36 }
 0x161   :  { %v3013_v55 = vpop.f32.mrb[13].mxu0  ;;  %4955 = vst [vmem:[#allocation14_spill] sm:$0xff] %v3018_v2  ;;  %v3030_v5 = vpop.eup %2634  ;;  %v3032_v50 = vfloor.f32 %v315_v62  ;;  %v820_v14 = vadd.f32 0.5, %v806_v3  ;;  %v3035_v26 = vadd.f32 %v2892_v43, %v248_v8  ;;  %v752_v35 = vmul.f32 %v2894_v44, %v179_v31 }
 0x162   :  { %4957 = vst [vmem:[#allocation16_spill] sm:$0xff] %v3030_v5  ;;  %v3040_v41 = vfloor.f32 %v819_v12  ;;  %v3042_v53 = vfloor.f32 %v316_v63  ;;  %v303_v27 = vmul.f32 0.31830987, %v3025_v17  ;;  %v807_v36 = vmul.f32 0.31830987, %v3028_v6  ;;  %v3049_v62 = vpop.permute.xlu1 %53 }
 0x163   :  { %4958 = vst [vmem:[#allocation17_spill] sm:$0xff] %v3032_v50  ;;  %v3038_v56 = vpop.eup %2636  ;;  %v3047_v5 = vmul.f32 3.140625, %v3001_v42  ;;  %v3051_v3 = vfloor.f32 %v820_v14  ;;  %v304_v43 = vmul.f32 0.31830987, %v3035_v26  ;;  %v3055_v44 = vadd.f32 %v2927_v40, %v752_v35 }
 0x164   :  { %4959 = vst [vmem:[#allocation18_spill] sm:$0xff] %v3038_v56  ;;  %4960 = vst [vmem:[#allocation19_spill] sm:$0xff] %v3042_v53  ;;  %v3059_v8 = vmul.f32 %v2966_v30, %v2966_v30  ;;  %2638 = vtanh.f32 %v2943_v60  ;;  %v317_v63 = vadd.f32 0.5, %v303_v27  ;;  %v3067_v14 = vmul.f32 3.140625, %v3032_v50 }
 0x165   :  { %4961 = vst [vmem:[#allocation20_spill] sm:$0xff] %v3047_v5  ;;  %2640 = vtanh.f32 %v2951_v58  ;;  %v821_v40 = vadd.f32 0.5, %v807_v36  ;;  %v3073_v59 = vmul.f32 3.140625, %v3040_v41  ;;  %v3076_v12 = vmul.f32 3.140625, %v3042_v53 }
 0x166   :  { %4962 = vst [vmem:[#allocation21_spill] sm:$0xff] %v3067_v14  ;;  %v3079_v60 = vmul.f32 3.140625, %v3051_v3  ;;  %v318_v56 = vadd.f32 0.5, %v304_v43  ;;  %v808_v50 = vmul.f32 0.31830987, %v3055_v44  ;;  %v183_v58 = vadd.f32 %v2938_v54, %v2886_v39  ;;  %v777_v21 = vpop.permute.xlu1 %776 }
 0x167   :  { %4963 = vst [vmem:[#allocation22_spill] sm:$0xff] %v3076_v12  ;;  %2642 = vtanh.f32 %v177_v20  ;;  %v3086_v36 = vfloor.f32 %v317_v63  ;;  %v185_v35 = vadd.f32 %v2945_v0, %v2886_v39  ;;  %v189_v53 = vadd.f32 %v2964_v9, %v2876_v32 }
 0x168   :  { %v3094_v27 = vfloor.f32 %v821_v40  ;;  %2644 = vtanh.f32 %v179_v31  ;;  %v249_v43 = vmul.f32 %v2898_v49, %v183_v58  ;;  %v753_v0 = vmul.f32 %v2995_v46, %v183_v58 }
 0x169   :  { %4964 = vst [vmem:[#allocation23_spill] sm:$0xff] %v3086_v36  ;;  %v3104_v9 = vfloor.f32 %v318_v56  ;;  %v822_v63 = vadd.f32 0.5, %v808_v50  ;;  %v250_v31 = vmul.f32 %v2898_v49, %v185_v35  ;;  %v3111_v2 = vmul.f32 3.140625, %v3086_v36 }
 0x16a   :  { %4965 = vst [vmem:[#allocation24_spill] sm:$0xff] %v3094_v27  ;;  %v3107_v40 = vadd.f32 %v2884_v38, %v249_v43  ;;  %v3113_v54 = vadd.f32 %v777_v21, %v753_v0  ;;  %v754_v20 = vmul.f32 %v2995_v46, %v185_v35  ;;  %v251_v12 = vmul.f32 %v2880_v34, %v189_v53 }
 0x16b   :  { %4966 = vst [vmem:[#allocation25_spill] sm:$0xff] %v3104_v9  ;;  %v3118_v39 = vmul.f32 3.140625, %v3094_v27  ;;  %v3122_v50 = vadd.f32 %v2884_v38, %v250_v31  ;;  %v755_v43 = vmul.f32 %v2896_v45, %v189_v53  ;;  %v191_v27 = vadd.f32 %v2975_v13, %v2876_v32  ;;  %v239_v31 = vpop.permute.xlu1 %238 }
 0x16c   :  { %4967 = vst [vmem:[#allocation26_spill] sm:$0xff] %v3107_v40  ;;  %4968 = vst [vmem:[#allocation27_spill] sm:$0xff] %v3113_v54  ;;  %v305_v56 = vmul.f32 0.31830987, %v3107_v40  ;;  %v809_v0 = vmul.f32 0.31830987, %v3113_v54  ;;  %v3128_v14 = vadd.f32 %v777_v21, %v754_v20  ;;  %v3131_v46 = vadd.f32 %v2947_v1, %v251_v12 }
 0x16d   :  { %4969 = vst [vmem:[#allocation28_spill] sm:$0xff] %v3122_v50  ;;  %v3137_v36 = vfloor.f32 %v822_v63  ;;  %v306_v10 = vmul.f32 0.31830987, %v3122_v50  ;;  %v3143_v11 = vmul.f32 3.140625, %v3104_v9  ;;  %v252_v63 = vmul.f32 %v2880_v34, %v191_v27 }
 0x16e   :  { %v3125_v49 = vpop.eup %2638  ;;  %4971 = vst [vmem:[#allocation30_spill] sm:$0xff] %v3128_v14  ;;  %v319_v38 = vadd.f32 0.5, %v305_v56  ;;  %v823_v21 = vadd.f32 0.5, %v809_v0  ;;  %v810_v12 = vmul.f32 0.31830987, %v3128_v14  ;;  %2646 = vtanh.f32 %v183_v58 }
 0x16f   :  { %4970 = vst [vmem:[#allocation29_spill] sm:$0xff] %v3125_v49  ;;  %v3135_v15 = vpop.eup %2640  ;;  %v3140_v49 = vadd.f32 %v781_v33, %v755_v43  ;;  %v307_v20 = vmul.f32 0.31830987, %v3131_v46  ;;  %v320_v32 = vadd.f32 0.5, %v306_v10  ;;  %v756_v9 = vmul.f32 %v2896_v45, %v191_v27 }
 0x170   :  { %4972 = vst [vmem:[#allocation31_spill] sm:$0xff] %v3135_v15  ;;  %v3147_v47 = vfloor.f32 %v319_v38  ;;  %v3153_v43 = vfloor.f32 %v823_v21  ;;  %v824_v15 = vadd.f32 0.5, %v810_v12  ;;  %v3161_v38 = vmul.f32 3.140625, %v3137_v36 }
 0x171   :  { %4973 = vst [vmem:[#allocation32_spill] sm:$0xff] %v3140_v49  ;;  %v811_v13 = vmul.f32 0.31830987, %v3140_v49  ;;  %v3151_v56 = vpop.eup %2642  ;;  %v321_v10 = vadd.f32 0.5, %v307_v20  ;;  %v3164_v25 = vadd.f32 %v2947_v1, %v252_v63  ;;  %v3169_v58 = vfloor.f32 %v320_v32 }
 0x172   :  { %4974 = vst [vmem:[#allocation33_spill] sm:$0xff] %v3147_v47  ;;  %4975 = vst [vmem:[#allocation34_spill] sm:$0xff] %v3151_v56  ;;  %v3156_v0 = vpop.eup %2644  ;;  %v3167_v34 = vmul.f32 3.140625, %v3147_v47  ;;  %v3171_v21 = vadd.f32 %v781_v33, %v756_v9  ;;  %v195_v45 = vadd.f32 %v3007_v37, %v3049_v62  ;;  %2648 = vtanh.f32 %v185_v35  ;;  %v743_v9 = vpop.permute.xlu0 %742 }
 0x173   :  { %4976 = vst [vmem:[#allocation35_spill] sm:$0xff] %v3153_v43  ;;  %4977 = vst [vmem:[#allocation36_spill] sm:$0xff] %v3156_v0  ;;  %v825_v5 = vadd.f32 0.5, %v811_v13  ;;  %v281_v0 = vpop.permute.xlu1 %280  ;;  %v308_v20 = vmul.f32 0.31830987, %v3164_v25  ;;  %v3179_v1 = vmul.f32 3.140625, %v3153_v43  ;;  %v3181_v63 = vfloor.f32 %v824_v15 }
 0x174   :  { %4978 = vst [vmem:[#allocation37_spill] sm:$0xff] %v3161_v38  ;;  %4979 = vst [vmem:[#allocation38_spill] sm:$0xff] %v3167_v34  ;;  %2650 = vtanh.f32 %v189_v53  ;;  %v812_v33 = vmul.f32 0.31830987, %v3171_v21  ;;  %v3188_v35 = vfloor.f32 %v321_v10  ;;  %v3193_v12 = vmul.f32 3.140625, %v3169_v58 }
 0x175   :  { %4980 = vst [vmem:[#allocation39_spill] sm:$0xff] %v3169_v58  ;;  %4981 = vst [vmem:[#allocation40_spill] sm:$0xff] %v3171_v21  ;;  %2652 = vtanh.f32 %v191_v27  ;;  %v322_v15 = vadd.f32 0.5, %v308_v20  ;;  %v253_v53 = vmul.f32 %v239_v31, %v195_v45  ;;  %v3195_v43 = vfloor.f32 %v825_v5 }
 0x176   :  { %4982 = vst [vmem:[#allocation41_spill] sm:$0xff] %v3179_v1  ;;  %4983 = vst [vmem:[#allocation42_spill] sm:$0xff] %v3181_v63  ;;  %v826_v47 = vadd.f32 0.5, %v812_v33  ;;  %v197_v37 = vadd.f32 %v3013_v55, %v3049_v62  ;;  %v757_v56 = vmul.f32 %v743_v9, %v195_v45  ;;  %v3202_v27 = vmul.f32 3.140625, %v3181_v63 }
 0x177   :  { %4984 = vst [vmem:[#allocation43_spill] sm:$0xff] %v3188_v35  ;;  %4985 = vst [vmem:[#allocation44_spill] sm:$0xff] %v3193_v12  ;;  %v3204_v32 = vadd.f32 %v281_v0, %v253_v53  ;;  %v367_v13 = vmul.f32 0.0009676536, %v2912_v18  ;;  %v3208_v20 = vmul.f32 3.140625, %v3188_v35  ;;  %v785_v5 = vpop.permute.xlu1 %784  ;;  %v3213_v62 = vfloor.f32 %v322_v15 }
 0x178   :  { %4986 = vst [vmem:[#allocation45_spill] sm:$0xff] %v3195_v43  ;;  %4987 = vst [vmem:[#allocation46_spill] sm:$0xff] %v3202_v27  ;;  %v254_v34 = vmul.f32 %v239_v31, %v197_v37  ;;  %v758_v33 = vmul.f32 %v743_v9, %v197_v37  ;;  %v368_v40 = vmul.f32 0.0009676536, %v2919_v22  ;;  %v3211_v55 = vpop.eup %2646  ;;  %v3216_v1 = vadd.f32 %v785_v5, %v757_v56 }
 0x179   :  { %4988 = vst [vmem:[#allocation47_spill] sm:$0xff] %v3204_v32  ;;  %4989 = vst [vmem:[#allocation48_spill] sm:$0xff] %v3211_v55  ;;  %v309_v10 = vmul.f32 0.31830987, %v3204_v32  ;;  %v4991_v53 = vsub.f32 %v2900_v57, %v2931_v29  ;;  %v3223_v63 = vfloor.f32 %v826_v47  ;;  %v4993_v9 = vsub.f32 %v2902_v61, %v2935_v52 }
 0x17a   :  { %4990 = vst [vmem:[#allocation49_spill] sm:$0xff] %v3213_v62  ;;  %v3225_v58 = vadd.f32 %v281_v0, %v254_v34  ;;  %v3227_v31 = vadd.f32 %v785_v5, %v758_v33  ;;  %v813_v35 = vmul.f32 0.31830987, %v3216_v1  ;;  %v563_v52 = vmul.f32 0.5, %v2912_v18 }
 0x17b   :  { %v3221_v54 = vsub.f32 %v4991_v53, %v367_v13  ;;  %4992 = vst [vmem:[#allocation50_spill] sm:$0xff] %v3223_v63  ;;  %v3232_v15 = vsub.f32 %v4993_v9, %v368_v40  ;;  %v323_v55 = vadd.f32 0.5, %v309_v10  ;;  %v3249_v34 = vmul.f32 3.140625, %v3195_v43 }
 0x17c   :  { %v3239_v29 = vpop.eup %2648  ;;  %v310_v47 = vmul.f32 0.31830987, %v3225_v58  ;;  %v814_v0 = vmul.f32 0.31830987, %v3227_v31  ;;  %2654 = vtanh.f32 %v195_v45  ;;  %v827_v13 = vadd.f32 0.5, %v813_v35 }
 0x17d   :  { %v395_v57 = vmul.f32 %v3221_v54, %v3221_v54  ;;  %4994 = vst [vmem:[#allocation51_spill] sm:$0xff] %v3239_v29  ;;  %v396_v61 = vmul.f32 %v3232_v15, %v3232_v15  ;;  %4996 = vst [vmem:[#allocation53_spill] sm:$0xff] %v3249_v34  ;;  %v3254_v33 = vmul.f32 3.140625, %v3213_v62  ;;  %v3257_v53 = vmul.f32 3.140625, %v3223_v63 }
 0x17e   :  { %v3246_v40 = vpop.eup %2650  ;;  %v828_v9 = vadd.f32 0.5, %v814_v0  ;;  %v564_v45 = vmul.f32 0.5, %v2919_v22  ;;  %v577_v50 = vfloor.f32 %v563_v52  ;;  %v3268_v62 = vfloor.f32 %v827_v13 }
 0x17f   :  { %4995 = vst [vmem:[#allocation52_spill] sm:$0xff] %v3246_v40  ;;  %v409_v10 = vmul.f32 -2.5052108e-08, %v395_v57  ;;  %v3251_v5 = vpop.eup %2652  ;;  %4998 = vst [vmem:[#allocation55_spill] sm:$0xff] %v3257_v53  ;;  %v410_v56 = vmul.f32 -2.5052108e-08, %v396_v61  ;;  %v3261_v40 = vfloor.f32 %v323_v55  ;;  %2656 = vtanh.f32 %v197_v37 }
 0x180   :  { %4997 = vst [vmem:[#allocation54_spill] sm:$0xff] %v3251_v5  ;;  %v324_v5 = vadd.f32 0.5, %v310_v47  ;;  %4999 = vst [vmem:[#allocation56_spill] sm:$0xff] %v3268_v62  ;;  %v3270_v0 = vfloor.f32 %v828_v9  ;;  %v578_v52 = vfloor.f32 %v564_v45  ;;  %v591_v35 = vmul.f32 2.0, %v577_v50 }
 0x181   :  { %v423_v43 = vadd.f32 2.7557319e-06, %v409_v10  ;;  %v424_v12 = vadd.f32 2.7557319e-06, %v410_v56  ;;  %v3277_v47 = vmul.f32 3.140625, %v3261_v40  ;;  %v521_v9 = vmul.f32 %v395_v57, %v3221_v54 }
 0x182   :  { %v3279_v63 = vfloor.f32 %v324_v5  ;;  %v855_v55 = vmul.f32 3.140625, %v3268_v62  ;;  %v3285_v34 = vmul.f32 3.140625, %v3270_v0  ;;  %v592_v53 = vmul.f32 2.0, %v578_v52 }
 0x183   :  { %v437_v38 = vmul.f32 %v423_v43, %v395_v57  ;;  %v438_v29 = vmul.f32 %v424_v12, %v396_v61  ;;  %5000 = vst [vmem:[#allocation57_spill] sm:$0xff] %v3277_v47  ;;  %v913_v43 = vmul.f32 -2.5052108e-08, %v2999_v48  ;;  %v522_v12 = vmul.f32 %v396_v61, %v3232_v15 }
 0x184   :  { %v883_v45 = vmul.f32 0.0009676536, %v3268_v62  ;;  %v605_v49 = vsub.f32 %v2912_v18, %v591_v35  ;;  %v3296_v27 = vmul.f32 3.140625, %v3279_v63 }
 0x185   :  { %v451_v56 = vadd.f32 -0.0001984127, %v437_v38  ;;  %v452_v13 = vadd.f32 -0.0001984127, %v438_v29  ;;  %v914_v38 = vmul.f32 -2.5052108e-08, %v3059_v8 }
 0x186   :  { %v927_v50 = vadd.f32 2.7557319e-06, %v913_v43  ;;  %v3289_v5 = vpop.eup %2654  ;;  %v870_v43 = vsub.f32 %v3227_v31, %v3285_v34  ;;  %v619_v32 = vmul.f32 2.0, %v605_v49 }
 0x187   :  { %v465_v37 = vmul.f32 %v451_v56, %v395_v57  ;;  %v466_v10 = vmul.f32 %v452_v13, %v396_v61  ;;  %5001 = vst [vmem:[#allocation58_spill] sm:$0xff] %v3289_v5  ;;  %v928_v14 = vadd.f32 2.7557319e-06, %v914_v38  ;;  %v869_v13 = vsub.f32 %v3216_v1, %v855_v55 }
 0x188   :  { %v941_v52 = vmul.f32 %v927_v50, %v2999_v48  ;;  %v884_v5 = vmul.f32 0.0009676536, %v3270_v0  ;;  %v1068_v38 = vmul.f32 0.5, %v2921_v23 }
 0x189   :  { %v479_v21 = vadd.f32 0.008333334, %v465_v37  ;;  %v480_v56 = vadd.f32 0.008333334, %v466_v10  ;;  %v606_v37 = vsub.f32 %v2919_v22, %v592_v53  ;;  %v942_v18 = vmul.f32 %v928_v14, %v3059_v8  ;;  %v3307_v50 = vpop.eup %2656 }
 0x18a   :  { %v955_v35 = vadd.f32 -0.0001984127, %v941_v52  ;;  %v1067_v10 = vmul.f32 0.5, %v2914_v19  ;;  %v1082_v22 = vfloor.f32 %v1068_v38  ;;  %v876_v14 = vmul.f32 0.0009676536, %v3051_v3 }
 0x18b   :  { %v493_v29 = vmul.f32 %v479_v21, %v395_v57  ;;  %v494_v47 = vmul.f32 %v480_v56, %v396_v61  ;;  %v956_v55 = vadd.f32 -0.0001984127, %v942_v18  ;;  %v875_v21 = vmul.f32 0.0009676536, %v3040_v41 }
 0x18c   :  { %v969_v31 = vmul.f32 %v955_v35, %v2999_v48  ;;  %v1081_v61 = vfloor.f32 %v1067_v10  ;;  %v3312_v34 = vsub.f32 %v869_v13, %v883_v45  ;;  %v1096_v13 = vmul.f32 2.0, %v1082_v22 }
 0x18d   :  { %v507_v62 = vadd.f32 -0.16666667, %v493_v29  ;;  %v508_v1 = vadd.f32 -0.16666667, %v494_v47  ;;  %v970_v49 = vmul.f32 %v956_v55, %v3059_v8  ;;  %v5002_v29 = vsub.f32 %v2989_v28, %v3073_v59 }
 0x18e   :  { %v983_v53 = vadd.f32 0.008333334, %v969_v31  ;;  %v1095_v18 = vmul.f32 2.0, %v1081_v61  ;;  %v620_v28 = vmul.f32 2.0, %v606_v37  ;;  %v633_v59 = vsub.f32 1.0, %v619_v32 }
 0x18f   :  { %v535_v57 = vmul.f32 %v521_v9, %v507_v62  ;;  %v3318_v56 = vsub.f32 %v5002_v29, %v875_v21  ;;  %v536_v47 = vmul.f32 %v522_v12, %v508_v1  ;;  %v5003_v62 = vsub.f32 %v3005_v51, %v3079_v60 }
 0x190   :  { %v984_v35 = vadd.f32 0.008333334, %v970_v49  ;;  %v997_v45 = vmul.f32 %v983_v53, %v2999_v48  ;;  %v1025_v12 = vmul.f32 %v2999_v48, %v2960_v7  ;;  %v1109_v38 = vsub.f32 %v2914_v19, %v1095_v18  ;;  %v663_v53 = vpop.permute.xlu1 %662 }
 0x191   :  { %v549_v52 = vadd.f32 %v535_v57, %v3221_v54  ;;  %v3324_v9 = vsub.f32 %v5003_v62, %v876_v14  ;;  %v3329_v10 = vmul.f32 %v3318_v56, %v3318_v56  ;;  %v550_v55 = vadd.f32 %v536_v47, %v3232_v15 }
 0x192   :  { %v998_v51 = vmul.f32 %v984_v35, %v3059_v8  ;;  %v1011_v60 = vadd.f32 -0.16666667, %v997_v45  ;;  %v1026_v37 = vmul.f32 %v3059_v8, %v2966_v30  ;;  %v1110_v48 = vsub.f32 %v2921_v23, %v1096_v13 }
 0x193   :  { %v904_v54 = vmul.f32 %v3324_v9, %v3324_v9  ;;  %v917_v1 = vmul.f32 -2.5052108e-08, %v3329_v10  ;;  %v647_v31 = vmul.f32 %v633_v59, %v549_v52  ;;  %v3344_v14 = vsub.f32 %v870_v43, %v884_v5 }
 0x194   :  { %v1012_v21 = vadd.f32 -0.16666667, %v998_v51  ;;  %v1039_v57 = vmul.f32 %v1025_v12, %v1011_v60  ;;  %v634_v19 = vsub.f32 1.0, %v620_v28  ;;  %v3348_v15 = vmul.f32 %v3312_v34, %v3312_v34 }
 0x195   :  { %v918_v32 = vmul.f32 -2.5052108e-08, %v904_v54  ;;  %v931_v61 = vadd.f32 2.7557319e-06, %v917_v1  ;;  %v1123_v8 = vmul.f32 2.0, %v1109_v38  ;;  %v689_v18 = vmul.f32 %v663_v53, %v647_v31 }
 0x196   :  { %v1040_v29 = vmul.f32 %v1026_v37, %v1012_v21  ;;  %v648_v52 = vmul.f32 %v634_v19, %v550_v55  ;;  %v1071_v62 = vmul.f32 0.5, %v3040_v41  ;;  %v1053_v35 = vadd.f32 %v1039_v57, %v2960_v7  ;;  %v5006_v21 = vld [vmem:[#allocation20_spill] sm:$0xff] }
 0x197   :  { %v932_v49 = vadd.f32 2.7557319e-06, %v918_v32  ;;  %v945_v47 = vmul.f32 %v931_v61, %v3329_v10  ;;  %v1124_v5 = vmul.f32 2.0, %v1110_v48  ;;  %v1072_v45 = vmul.f32 0.5, %v3051_v3  ;;  %v5005_v32 = vld [vmem:[#allocation7_spill] sm:$0xff] }
 0x198   :  { %v1085_v28 = vfloor.f32 %v1071_v62  ;;  %v873_v59 = vmul.f32 0.0009676536, %v2956_v4  ;;  %v874_v12 = vmul.f32 0.0009676536, %v3001_v42  ;;  %v1054_v51 = vadd.f32 %v1040_v29, %v2966_v30 }
 0x199   :  { %v946_v23 = vmul.f32 %v932_v49, %v904_v54  ;;  %v959_v43 = vadd.f32 -0.0001984127, %v945_v47  ;;  %v1137_v60 = vsub.f32 1.0, %v1123_v8  ;;  %v1086_v1 = vfloor.f32 %v1072_v45 }
 0x19a   :  { %v690_v55 = vmul.f32 %v663_v53, %v648_v52  ;;  %v5004_v7 = vsub.f32 %v2910_v16, %v2986_v24  ;;  %v5007_v57 = vsub.f32 %v5005_v32, %v5006_v21  ;;  %v1138_v61 = vsub.f32 1.0, %v1124_v5  ;;  %v5008_v24 = vld [vmem:[#allocation13_spill] sm:$0xff] }
 0x19b   :  { %v960_v13 = vadd.f32 -0.0001984127, %v946_v23  ;;  %v973_v38 = vmul.f32 %v959_v43, %v3329_v10  ;;  %v1151_v19 = vmul.f32 %v1137_v60, %v1053_v35  ;;  %v1099_v30 = vmul.f32 2.0, %v1085_v28  ;;  %v1167_v35 = vpop.permute.xlu1 %1166  ;;  %v5009_v28 = vld [vmem:[#allocation15_spill] sm:$0xff] }
 0x19c   :  { %v3361_v37 = vsub.f32 %v5004_v7, %v873_v59  ;;  %v3366_v48 = vsub.f32 %v5007_v57, %v874_v12  ;;  %v1100_v8 = vmul.f32 2.0, %v1086_v1  ;;  %v3374_v16 = vmul.f32 %v3344_v14, %v3344_v14 }
 0x19d   :  { %v974_v31 = vmul.f32 %v960_v13, %v904_v54  ;;  %v987_v49 = vadd.f32 0.008333334, %v973_v38  ;;  %v703_v52 = vadd.f32 %v5008_v24, %v689_v18  ;;  %v1152_v23 = vmul.f32 %v1138_v61, %v1054_v51 }
 0x19e   :  { %v901_v53 = vmul.f32 %v3361_v37, %v3361_v37  ;;  %v902_v47 = vmul.f32 %v3366_v48, %v3366_v48  ;;  %v1069_v13 = vmul.f32 0.5, %v2956_v4  ;;  %v704_v59 = vadd.f32 %v5009_v28, %v690_v55 }
 0x19f   :  { %v988_v29 = vadd.f32 0.008333334, %v974_v31  ;;  %v1001_v62 = vmul.f32 %v987_v49, %v3329_v10  ;;  %v1193_v12 = vmul.f32 %v1167_v35, %v1151_v19  ;;  %v1029_v60 = vmul.f32 %v3329_v10, %v3318_v56  ;;  %v5010_v19 = vld [vmem:[#allocation8_spill] sm:$0xff] }
 0x1a0   :  { %v915_v43 = vmul.f32 -2.5052108e-08, %v901_v53  ;;  %v916_v45 = vmul.f32 -2.5052108e-08, %v902_v47  ;;  %v1030_v38 = vmul.f32 %v904_v54, %v3324_v9  ;;  %v1113_v1 = vsub.f32 %v3040_v41, %v1099_v30  ;;  %v5011_v41 = vld [vmem:[#allocation10_spill] sm:$0xff] }
 0x1a1   :  { %v1002_v5 = vmul.f32 %v988_v29, %v904_v54  ;;  %v1114_v18 = vsub.f32 %v3051_v3, %v1100_v8  ;;  %v1070_v31 = vmul.f32 0.5, %v3001_v42  ;;  %v1194_v7 = vmul.f32 %v1167_v35, %v1152_v23  ;;  %v5012_v23 = vld [vmem:[#allocation5_spill] sm:$0xff] }
 0x1a2   :  { %v929_v51 = vadd.f32 2.7557319e-06, %v915_v43  ;;  %v1015_v32 = vadd.f32 -0.16666667, %v1001_v62  ;;  %v930_v57 = vadd.f32 2.7557319e-06, %v916_v45  ;;  %v1083_v49 = vfloor.f32 %v1069_v13 }
 0x1a3   :  { %v1016_v21 = vadd.f32 -0.16666667, %v1002_v5  ;;  %v1084_v55 = vfloor.f32 %v1070_v31  ;;  %v369_v29 = vmul.f32 0.0009676536, %v5010_v19  ;;  %v3387_v24 = vadd.f32 %v1193_v12, %v703_v52  ;;  %v5013_v62 = vld [vmem:[#allocation9_spill] sm:$0xff]  ;;  %v5016_v52 = vld [vmem:[#allocation14_spill] sm:$0xff] }
 0x1a4   :  { %v943_v61 = vmul.f32 %v929_v51, %v901_v53  ;;  %v3389_v10 = vadd.f32 %v1194_v7, %v704_v59  ;;  %v944_v54 = vmul.f32 %v930_v57, %v902_v47  ;;  %v370_v30 = vmul.f32 0.0009676536, %v5011_v41  ;;  %v5015_v51 = vld [vmem:[#allocation6_spill] sm:$0xff] }
 0x1a5   :  { %v1127_v3 = vmul.f32 2.0, %v1113_v1  ;;  %v3392_v8 = vmul.f32 2.0, %v1114_v18  ;;  %v5014_v35 = vsub.f32 %v5012_v23, %v5013_v62  ;;  %v1043_v45 = vmul.f32 %v1029_v60, %v1015_v32 }
 0x1a6   :  { %v957_v43 = vadd.f32 -0.0001984127, %v943_v61  ;;  %v1044_v13 = vmul.f32 %v1030_v38, %v1016_v21  ;;  %v958_v28 = vadd.f32 -0.0001984127, %v944_v54  ;;  %v5017_v12 = vsub.f32 %v5015_v51, %v5016_v52 }
 0x1a7   :  { %v3397_v5 = vsub.f32 %v5014_v35, %v369_v29  ;;  %v1097_v7 = vmul.f32 2.0, %v1083_v49  ;;  %v1098_v57 = vmul.f32 2.0, %v1084_v55  ;;  %v1027_v61 = vmul.f32 %v901_v53, %v3361_v37 }
 0x1a8   :  { %v3402_v59 = vsub.f32 %v5017_v12, %v370_v30  ;;  %v971_v31 = vmul.f32 %v957_v43, %v901_v53  ;;  %v972_v18 = vmul.f32 %v958_v28, %v902_v47  ;;  %v1028_v29 = vmul.f32 %v902_v47, %v3366_v48 }
 0x1a9   :  { %v397_v1 = vmul.f32 %v3397_v5, %v3397_v5  ;;  %v1141_v38 = vsub.f32 1.0, %v1127_v3  ;;  %v1057_v30 = vadd.f32 %v1043_v45, %v3318_v56  ;;  %v3413_v49 = vadd.f32 %v1044_v13, %v3324_v9  ;;  %v5018_v56 = vld [vmem:[#allocation23_spill] sm:$0xff]  ;;  %v5019_v9 = vld [vmem:[#allocation25_spill] sm:$0xff] }
 0x1aa   :  { %v398_v60 = vmul.f32 %v3402_v59, %v3402_v59  ;;  %v985_v21 = vadd.f32 0.008333334, %v971_v31  ;;  %v986_v55 = vadd.f32 0.008333334, %v972_v18  ;;  %v1111_v62 = vsub.f32 %v2956_v4, %v1097_v7 }
 0x1ab   :  { %v411_v54 = vmul.f32 -2.5052108e-08, %v397_v1  ;;  %v1112_v35 = vsub.f32 %v3001_v42, %v1098_v57  ;;  %v565_v3 = vmul.f32 0.5, %v5010_v19  ;;  %v566_v12 = vmul.f32 0.5, %v5011_v41 }
 0x1ac   :  { %v412_v43 = vmul.f32 -2.5052108e-08, %v398_v60  ;;  %v999_v23 = vmul.f32 %v985_v21, %v901_v53  ;;  %v1000_v51 = vmul.f32 %v986_v55, %v902_v47  ;;  %v373_v45 = vmul.f32 0.0009676536, %v5018_v56 }
 0x1ad   :  { %v425_v28 = vadd.f32 2.7557319e-06, %v411_v54  ;;  %v374_v13 = vmul.f32 0.0009676536, %v5019_v9  ;;  %v579_v53 = vfloor.f32 %v565_v3  ;;  %v580_v21 = vfloor.f32 %v566_v12 }
 0x1ae   :  { %v426_v52 = vadd.f32 2.7557319e-06, %v412_v43  ;;  %v1013_v31 = vadd.f32 -0.16666667, %v999_v23  ;;  %v1014_v18 = vadd.f32 -0.16666667, %v1000_v51  ;;  %v5020_v47 = vsub.f32 %v3025_v17, %v3111_v2 }
 0x1af   :  { %v439_v22 = vmul.f32 %v425_v28, %v397_v1  ;;  %v3421_v4 = vmul.f32 2.0, %v1111_v62  ;;  %v5021_v57 = vsub.f32 %v3035_v26, %v3143_v11  ;;  %v3433_v55 = vmul.f32 2.0, %v1112_v35 }
 0x1b0   :  { %v440_v32 = vmul.f32 %v426_v52, %v398_v60  ;;  %v3426_v7 = vsub.f32 %v5020_v47, %v373_v45  ;;  %v593_v23 = vmul.f32 2.0, %v579_v53  ;;  %v594_v28 = vmul.f32 2.0, %v580_v21 }
 0x1b1   :  { %v453_v42 = vadd.f32 -0.0001984127, %v439_v22  ;;  %v3431_v54 = vsub.f32 %v5021_v57, %v374_v13  ;;  %v1041_v51 = vmul.f32 %v1027_v61, %v1013_v31  ;;  %v1042_v17 = vmul.f32 %v1028_v29, %v1014_v18 }
 0x1b2   :  { %v454_v43 = vadd.f32 -0.0001984127, %v440_v32  ;;  %v401_v22 = vmul.f32 %v3426_v7, %v3426_v7  ;;  %v607_v11 = vsub.f32 %v5010_v19, %v593_v23  ;;  %v608_v26 = vsub.f32 %v5011_v41, %v594_v28 }
 0x1b3   :  { %v467_v52 = vmul.f32 %v453_v42, %v397_v1  ;;  %v3439_v2 = vmul.f32 %v3431_v54, %v3431_v54  ;;  %v1155_v35 = vmul.f32 %v1141_v38, %v1057_v30  ;;  %v1139_v61 = vsub.f32 1.0, %v3421_v4 }
 0x1b4   :  { %v468_v62 = vmul.f32 %v454_v43, %v398_v60  ;;  %v415_v32 = vmul.f32 -2.5052108e-08, %v401_v22  ;;  %v621_v45 = vmul.f32 2.0, %v607_v11  ;;  %v622_v13 = vmul.f32 2.0, %v608_v26 }
 0x1b5   :  { %v481_v3 = vadd.f32 0.008333334, %v467_v52  ;;  %v416_v12 = vmul.f32 -2.5052108e-08, %v3439_v2  ;;  %v523_v21 = vmul.f32 %v397_v1, %v3397_v5  ;;  %v1055_v18 = vadd.f32 %v1041_v51, %v3361_v37  ;;  %v5022_v37 = vld [vmem:[#allocation17_spill] sm:$0xff] }
 0x1b6   :  { %v482_v31 = vadd.f32 0.008333334, %v468_v62  ;;  %v429_v42 = vadd.f32 2.7557319e-06, %v415_v32  ;;  %v1056_v19 = vadd.f32 %v1042_v17, %v3366_v48  ;;  %v524_v38 = vmul.f32 %v398_v60, %v3402_v59  ;;  %v1175_v48 = vpop.permute.xlu0 %1174 }
 0x1b7   :  { %v495_v53 = vmul.f32 %v481_v3, %v397_v1  ;;  %v430_v29 = vadd.f32 2.7557319e-06, %v416_v12  ;;  %v635_v47 = vsub.f32 1.0, %v621_v45  ;;  %v636_v23 = vsub.f32 1.0, %v622_v13  ;;  %v5023_v3 = vld [vmem:[#allocation19_spill] sm:$0xff] }
 0x1b8   :  { %v496_v41 = vmul.f32 %v482_v31, %v398_v60  ;;  %v443_v57 = vmul.f32 %v429_v42, %v401_v22  ;;  %v569_v28 = vmul.f32 0.5, %v5018_v56  ;;  %v570_v1 = vmul.f32 0.5, %v5019_v9  ;;  %v5024_v13 = vld [vmem:[#allocation11_spill] sm:$0xff] }
 0x1b9   :  { %v509_v30 = vadd.f32 -0.16666667, %v495_v53  ;;  %v444_v4 = vmul.f32 %v430_v29, %v3439_v2  ;;  %v371_v51 = vmul.f32 0.0009676536, %v5022_v37  ;;  %v372_v32 = vmul.f32 0.0009676536, %v5023_v3 }
 0x1ba   :  { %v510_v43 = vadd.f32 -0.16666667, %v496_v41  ;;  %v457_v62 = vadd.f32 -0.0001984127, %v443_v57  ;;  %v583_v26 = vfloor.f32 %v569_v28  ;;  %v584_v60 = vfloor.f32 %v570_v1  ;;  %v5025_v53 = vld [vmem:[#allocation21_spill] sm:$0xff]  ;;  %v5027_v57 = vld [vmem:[#allocation12_spill] sm:$0xff] }
 0x1bb   :  { %v537_v52 = vmul.f32 %v523_v21, %v509_v30  ;;  %v458_v11 = vadd.f32 -0.0001984127, %v444_v4  ;;  %v5026_v42 = vsub.f32 %v5024_v13, %v5025_v53  ;;  %v3485_v53 = vmul.f32 %v1175_v48, %v1155_v35 }
 0x1bc   :  { %v538_v17 = vmul.f32 %v524_v38, %v510_v43  ;;  %v471_v31 = vmul.f32 %v457_v62, %v401_v22  ;;  %v597_v41 = vmul.f32 2.0, %v583_v26  ;;  %v598_v30 = vmul.f32 2.0, %v584_v60  ;;  %v5028_v38 = vld [vmem:[#allocation22_spill] sm:$0xff] }
 0x1bd   :  { %v551_v12 = vadd.f32 %v537_v52, %v3397_v5  ;;  %v472_v45 = vmul.f32 %v458_v11, %v3439_v2  ;;  %v3459_v29 = vsub.f32 %v5026_v42, %v371_v51  ;;  %v5029_v4 = vsub.f32 %v5027_v57, %v5028_v38  ;;  %v1171_v42 = vpop.permute.xlu1 %1170 }
 0x1be   :  { %v552_v21 = vadd.f32 %v538_v17, %v3402_v59  ;;  %v485_v1 = vadd.f32 0.008333334, %v471_v31  ;;  %v5030_v62 = vsub.f32 1.0, %v3392_v8  ;;  %v1140_v59 = vsub.f32 1.0, %v3433_v55  ;;  %v667_v31 = vpop.permute.xlu0 %666 }
 0x1bf   :  { %v3465_v43 = vsub.f32 %v5029_v4, %v372_v32  ;;  %v649_v28 = vmul.f32 %v635_v47, %v551_v12  ;;  %v486_v5 = vadd.f32 0.008333334, %v472_v45  ;;  %v3469_v52 = vmul.f32 %v3459_v29, %v3459_v29 }
 0x1c0   :  { %v1156_v11 = vmul.f32 %v5030_v62, %v3413_v49  ;;  %v1153_v51 = vmul.f32 %v1139_v61, %v1055_v18  ;;  %v650_v26 = vmul.f32 %v636_v23, %v552_v21  ;;  %v499_v60 = vmul.f32 %v485_v1, %v401_v22 }
 0x1c1   :  { %v3477_v17 = vmul.f32 %v3465_v43, %v3465_v43  ;;  %v500_v47 = vmul.f32 %v486_v5, %v3439_v2  ;;  %v413_v32 = vmul.f32 -2.5052108e-08, %v3469_v52  ;;  %v1154_v12 = vmul.f32 %v1140_v59, %v1056_v19 }
 0x1c2   :  { %v527_v45 = vmul.f32 %v401_v22, %v3426_v7  ;;  %v611_v8 = vsub.f32 %v5018_v56, %v597_v41  ;;  %v691_v55 = vmul.f32 %v667_v31, %v649_v28  ;;  %v513_v61 = vadd.f32 -0.16666667, %v499_v60  ;;  %v5033_v60 = vld [vmem:[#allocation18_spill] sm:$0xff] }
 0x1c3   :  { %v414_v49 = vmul.f32 -2.5052108e-08, %v3477_v17  ;;  %v612_v18 = vsub.f32 %v5019_v9, %v598_v30  ;;  %v427_v13 = vadd.f32 2.7557319e-06, %v413_v32  ;;  %v3487_v23 = vmul.f32 %v1175_v48, %v1156_v11  ;;  %v5031_v30 = vld [vmem:[#allocation16_spill] sm:$0xff] }
 0x1c4   :  { %v514_v21 = vadd.f32 -0.16666667, %v500_v47  ;;  %v1195_v19 = vmul.f32 %v1171_v42, %v1153_v51  ;;  %v692_v38 = vmul.f32 %v667_v31, %v650_v26  ;;  %v541_v4 = vmul.f32 %v527_v45, %v513_v61  ;;  %v5032_v51 = vld [vmem:[#allocation24_spill] sm:$0xff] }
 0x1c5   :  { %v428_v57 = vadd.f32 2.7557319e-06, %v414_v49  ;;  %v441_v22 = vmul.f32 %v427_v13, %v3469_v52  ;;  %v1196_v56 = vmul.f32 %v1171_v42, %v1154_v12  ;;  %v528_v41 = vmul.f32 %v3439_v2, %v3431_v54 }
 0x1c6   :  { %v625_v28 = vmul.f32 2.0, %v611_v8  ;;  %v705_v35 = vadd.f32 %v5031_v30, %v691_v55  ;;  %v626_v1 = vmul.f32 2.0, %v612_v18  ;;  %v567_v5 = vmul.f32 0.5, %v5022_v37 }
 0x1c7   :  { %v442_v9 = vmul.f32 %v428_v57, %v3477_v17  ;;  %v455_v48 = vadd.f32 -0.0001984127, %v441_v22  ;;  %v542_v62 = vmul.f32 %v528_v41, %v514_v21  ;;  %v568_v59 = vmul.f32 0.5, %v5023_v3  ;;  %v5035_v57 = vld [vmem:[#allocation37_spill] sm:$0xff] }
 0x1c8   :  { %v877_v26 = vmul.f32 0.0009676536, %v5032_v51  ;;  %v706_v47 = vadd.f32 %v5033_v60, %v692_v38  ;;  %v555_v32 = vadd.f32 %v541_v4, %v3426_v7  ;;  %v581_v12 = vfloor.f32 %v567_v5 }
 0x1c9   :  { %v456_v11 = vadd.f32 -0.0001984127, %v442_v9  ;;  %v469_v2 = vmul.f32 %v455_v48, %v3469_v52  ;;  %v582_v45 = vfloor.f32 %v568_v59  ;;  %v878_v8 = vmul.f32 0.0009676536, %v3137_v36 }
 0x1ca   :  { %v5034_v49 = vsub.f32 %v3028_v6, %v3118_v39  ;;  %v639_v61 = vsub.f32 1.0, %v625_v28  ;;  %v640_v18 = vsub.f32 1.0, %v626_v1  ;;  %v595_v42 = vmul.f32 2.0, %v581_v12 }
 0x1cb   :  { %v470_v31 = vmul.f32 %v456_v11, %v3477_v17  ;;  %v483_v13 = vadd.f32 0.008333334, %v469_v2  ;;  %v556_v21 = vadd.f32 %v542_v62, %v3431_v54  ;;  %v5036_v38 = vsub.f32 %v3055_v44, %v5035_v57 }
 0x1cc   :  { %v3505_v55 = vsub.f32 %v5034_v49, %v877_v26  ;;  %v653_v41 = vmul.f32 %v639_v61, %v555_v32  ;;  %v596_v39 = vmul.f32 2.0, %v582_v45  ;;  %v1073_v28 = vmul.f32 0.5, %v5032_v51  ;;  %v675_v32 = vpop.permute.xlu1 %674 }
 0x1cd   :  { %v484_v7 = vadd.f32 0.008333334, %v470_v31  ;;  %v3511_v4 = vsub.f32 %v5036_v38, %v878_v8  ;;  %v497_v6 = vmul.f32 %v483_v13, %v3469_v52  ;;  %v609_v30 = vsub.f32 %v5022_v37, %v595_v42 }
 0x1ce   :  { %v905_v22 = vmul.f32 %v3505_v55, %v3505_v55  ;;  %v3521_v44 = vadd.f32 %v1195_v19, %v705_v35  ;;  %v525_v5 = vmul.f32 %v3469_v52, %v3459_v29  ;;  %v1074_v62 = vmul.f32 0.5, %v3137_v36 }
 0x1cf   :  { %v498_v9 = vmul.f32 %v484_v7, %v3477_v17  ;;  %v906_v54 = vmul.f32 %v3511_v4, %v3511_v4  ;;  %v511_v48 = vadd.f32 -0.16666667, %v497_v6  ;;  %v654_v11 = vmul.f32 %v640_v18, %v556_v21  ;;  %v5037_v18 = vld [vmem:[#allocation43_spill] sm:$0xff]  ;;  %v5038_v7 = vld [vmem:[#allocation49_spill] sm:$0xff] }
 0x1d0   :  { %v919_v1 = vmul.f32 -2.5052108e-08, %v905_v22  ;;  %v526_v26 = vmul.f32 %v3477_v17, %v3465_v43  ;;  %v610_v2 = vsub.f32 %v5023_v3, %v596_v39  ;;  %v1087_v31 = vfloor.f32 %v1073_v28 }
 0x1d1   :  { %v512_v59 = vadd.f32 -0.16666667, %v498_v9  ;;  %v920_v60 = vmul.f32 -2.5052108e-08, %v906_v54  ;;  %v539_v37 = vmul.f32 %v525_v5, %v511_v48  ;;  %v3529_v19 = vadd.f32 %v1196_v56, %v706_v47 }
 0x1d2   :  { %v933_v12 = vadd.f32 2.7557319e-06, %v919_v1  ;;  %v695_v35 = vmul.f32 %v675_v32, %v653_v41  ;;  %v623_v45 = vmul.f32 2.0, %v609_v30  ;;  %v1088_v61 = vfloor.f32 %v1074_v62  ;;  %v5040_v41 = vld [vmem:[#allocation34_spill] sm:$0xff] }
 0x1d3   :  { %v934_v8 = vadd.f32 2.7557319e-06, %v920_v60  ;;  %v540_v52 = vmul.f32 %v526_v26, %v512_v59  ;;  %v377_v13 = vmul.f32 0.0009676536, %v5037_v18  ;;  %v553_v42 = vadd.f32 %v539_v37, %v3459_v29  ;;  %v5042_v26 = vld [vmem:[#allocation36_spill] sm:$0xff] }
 0x1d4   :  { %v947_v49 = vmul.f32 %v933_v12, %v905_v22  ;;  %v1101_v21 = vmul.f32 2.0, %v1087_v31  ;;  %v378_v57 = vmul.f32 0.0009676536, %v5038_v7  ;;  %v696_v38 = vmul.f32 %v675_v32, %v654_v11  ;;  %v671_v31 = vpop.permute.xlu0 %670 }
 0x1d5   :  { %v948_v17 = vmul.f32 %v934_v8, %v906_v54  ;;  %v624_v3 = vmul.f32 2.0, %v610_v2  ;;  %v5039_v56 = vsub.f32 %v3131_v46, %v3208_v20  ;;  %v3540_v39 = vadd.f32 %v5040_v41, %v695_v35 }
 0x1d6   :  { %v961_v6 = vadd.f32 -0.0001984127, %v947_v49  ;;  %v637_v28 = vsub.f32 1.0, %v623_v45  ;;  %v5041_v29 = vsub.f32 %v3164_v25, %v3254_v33  ;;  %v554_v1 = vadd.f32 %v540_v52, %v3465_v43 }
 0x1d7   :  { %v3537_v47 = vsub.f32 %v5039_v56, %v377_v13  ;;  %v962_v9 = vadd.f32 -0.0001984127, %v948_v17  ;;  %v1102_v5 = vmul.f32 2.0, %v1088_v61  ;;  %v1115_v11 = vsub.f32 %v5032_v51, %v1101_v21 }
 0x1d8   :  { %v3545_v30 = vsub.f32 %v5041_v29, %v378_v57  ;;  %v975_v48 = vmul.f32 %v961_v6, %v905_v22  ;;  %v651_v46 = vmul.f32 %v637_v28, %v553_v42  ;;  %v3558_v25 = vadd.f32 %v5042_v26, %v696_v38  ;;  %v5043_v6 = vld [vmem:[#allocation33_spill] sm:$0xff]  ;;  %v5049_v26 = vld [vmem:[#allocation44_spill] sm:$0xff] }
 0x1d9   :  { %v3550_v62 = vmul.f32 %v3537_v47, %v3537_v47  ;;  %v976_v20 = vmul.f32 %v962_v9, %v906_v54  ;;  %v638_v33 = vsub.f32 1.0, %v624_v3  ;;  %v1031_v37 = vmul.f32 %v905_v22, %v3505_v55 }
 0x1da   :  { %v3555_v59 = vmul.f32 %v3545_v30, %v3545_v30  ;;  %v989_v60 = vadd.f32 0.008333334, %v975_v48  ;;  %v1032_v2 = vmul.f32 %v906_v54, %v3511_v4  ;;  %v1116_v45 = vsub.f32 %v3137_v36, %v1102_v5  ;;  %v5045_v48 = vld [vmem:[#allocation26_spill] sm:$0xff] }
 0x1db   :  { %v419_v43 = vmul.f32 -2.5052108e-08, %v3550_v62  ;;  %v990_v32 = vadd.f32 0.008333334, %v976_v20  ;;  %v652_v51 = vmul.f32 %v638_v33, %v554_v1  ;;  %v693_v52 = vmul.f32 %v671_v31, %v651_v46  ;;  %v5046_v5 = vld [vmem:[#allocation38_spill] sm:$0xff] }
 0x1dc   :  { %v420_v12 = vmul.f32 -2.5052108e-08, %v3555_v59  ;;  %v1003_v35 = vmul.f32 %v989_v60, %v905_v22  ;;  %v1129_v61 = vmul.f32 2.0, %v1115_v11  ;;  %v573_v21 = vmul.f32 0.5, %v5037_v18  ;;  %v5044_v22 = vld [vmem:[#allocation39_spill] sm:$0xff]  ;;  %v5048_v11 = vld [vmem:[#allocation28_spill] sm:$0xff] }
 0x1dd   :  { %v433_v8 = vadd.f32 2.7557319e-06, %v419_v43  ;;  %v1004_v49 = vmul.f32 %v990_v32, %v906_v54  ;;  %v574_v57 = vmul.f32 0.5, %v5038_v7  ;;  %v375_v56 = vmul.f32 0.0009676536, %v5043_v6 }
 0x1de   :  { %v434_v13 = vadd.f32 2.7557319e-06, %v420_v12  ;;  %v1017_v42 = vadd.f32 -0.16666667, %v1003_v35  ;;  %v376_v41 = vmul.f32 0.0009676536, %v5044_v22  ;;  %v694_v36 = vmul.f32 %v671_v31, %v652_v51 }
 0x1df   :  { %v447_v17 = vmul.f32 %v433_v8, %v3550_v62  ;;  %v1018_v38 = vadd.f32 -0.16666667, %v1004_v49  ;;  %v587_v54 = vfloor.f32 %v573_v21  ;;  %v1143_v29 = vsub.f32 1.0, %v1129_v61  ;;  %v5051_v49 = vld [vmem:[#allocation29_spill] sm:$0xff]  ;;  %v1179_v21 = vpop.permute.xlu1 %1178 }
 0x1e0   :  { %v448_v3 = vmul.f32 %v434_v13, %v3555_v59  ;;  %v1045_v28 = vmul.f32 %v1031_v37, %v1017_v42  ;;  %v5047_v46 = vsub.f32 %v5045_v48, %v5046_v5  ;;  %v5050_v33 = vsub.f32 %v5048_v11, %v5049_v26 }
 0x1e1   :  { %v461_v9 = vadd.f32 -0.0001984127, %v447_v17  ;;  %v1046_v43 = vmul.f32 %v1032_v2, %v1018_v38  ;;  %v588_v37 = vfloor.f32 %v574_v57  ;;  %v601_v51 = vmul.f32 2.0, %v587_v54  ;;  %v5052_v17 = vld [vmem:[#allocation31_spill] sm:$0xff] }
 0x1e2   :  { %v462_v1 = vadd.f32 -0.0001984127, %v448_v3  ;;  %v3574_v20 = vsub.f32 %v5047_v46, %v375_v56  ;;  %v3579_v60 = vsub.f32 %v5050_v33, %v376_v41  ;;  %v1059_v32 = vadd.f32 %v1045_v28, %v3505_v55 }
 0x1e3   :  { %v475_v12 = vmul.f32 %v461_v9, %v3550_v62  ;;  %v707_v61 = vadd.f32 %v5051_v49, %v693_v52  ;;  %v1130_v13 = vmul.f32 2.0, %v1116_v45  ;;  %v708_v55 = vadd.f32 %v5052_v17, %v694_v36 }
 0x1e4   :  { %v476_v31 = vmul.f32 %v462_v1, %v3555_v59  ;;  %v403_v35 = vmul.f32 %v3574_v20, %v3574_v20  ;;  %v3588_v8 = vmul.f32 %v3579_v60, %v3579_v60  ;;  %v1157_v42 = vmul.f32 %v1143_v29, %v1059_v32 }
 0x1e5   :  { %v489_v2 = vadd.f32 0.008333334, %v475_v12  ;;  %v1060_v56 = vadd.f32 %v1046_v43, %v3511_v4  ;;  %v602_v9 = vmul.f32 2.0, %v588_v37  ;;  %v615_v52 = vsub.f32 %v5037_v18, %v601_v51 }
 0x1e6   :  { %v490_v38 = vadd.f32 0.008333334, %v476_v31  ;;  %v417_v57 = vmul.f32 -2.5052108e-08, %v403_v35  ;;  %v418_v3 = vmul.f32 -2.5052108e-08, %v3588_v8  ;;  %v1199_v41 = vmul.f32 %v1179_v21, %v1157_v42 }
 0x1e7   :  { %v503_v28 = vmul.f32 %v489_v2, %v3550_v62  ;;  %v1211_v1 = vadd.f32 %v3485_v53, %v707_v61  ;;  %v1144_v36 = vsub.f32 1.0, %v1130_v13  ;;  %v531_v4 = vmul.f32 %v3550_v62, %v3537_v47 }
 0x1e8   :  { %v504_v54 = vmul.f32 %v490_v38, %v3555_v59  ;;  %v431_v45 = vadd.f32 2.7557319e-06, %v417_v57  ;;  %v432_v29 = vadd.f32 2.7557319e-06, %v418_v3  ;;  %v1213_v48 = vadd.f32 %v1199_v41, %v3540_v39  ;;  %v5054_v38 = vld [vmem:[#allocation57_spill] sm:$0xff] }
 0x1e9   :  { %v517_v5 = vadd.f32 -0.16666667, %v503_v28  ;;  %v1158_v33 = vmul.f32 %v1144_v36, %v1060_v56  ;;  %v532_v18 = vmul.f32 %v3555_v59, %v3545_v30  ;;  %v616_v32 = vsub.f32 %v5038_v7, %v602_v9  ;;  %v5053_v7 = vld [vmem:[#allocation47_spill] sm:$0xff] }
 0x1ea   :  { %v518_v46 = vadd.f32 -0.16666667, %v504_v54  ;;  %v445_v11 = vmul.f32 %v431_v45, %v403_v35  ;;  %v446_v26 = vmul.f32 %v432_v29, %v3588_v8  ;;  %v3602_v43 = vpack.c.bf16 %v1213_v48, %v1211_v1 }
 0x1eb   :  { %v629_v53 = vmul.f32 2.0, %v615_v52  ;;  %v571_v39 = vmul.f32 0.5, %v5043_v6  ;;  %v545_v31 = vmul.f32 %v531_v4, %v517_v5  ;;  %v572_v51 = vmul.f32 0.5, %v5044_v22 }
 0x1ec   :  { %v459_v12 = vadd.f32 -0.0001984127, %v445_v11  ;;  %v460_v37 = vadd.f32 -0.0001984127, %v446_v26  ;;  %v379_v62 = vmul.f32 0.0009676536, %v3261_v40  ;;  %v546_v61 = vmul.f32 %v532_v18, %v518_v46 }
 0x1ed   :  { %v380_v49 = vmul.f32 0.0009676536, %v3279_v63  ;;  %v585_v2 = vfloor.f32 %v571_v39  ;;  %v630_v59 = vmul.f32 2.0, %v616_v32  ;;  %v586_v17 = vfloor.f32 %v572_v51 }
 0x1ee   :  { %v473_v13 = vmul.f32 %v459_v12, %v403_v35  ;;  %v474_v42 = vmul.f32 %v460_v37, %v3588_v8  ;;  %v5055_v57 = vsub.f32 %v5053_v7, %v5054_v38  ;;  %v5056_v56 = vsub.f32 %v3225_v58, %v3296_v27 }
 0x1ef   :  { %v1200_v28 = vmul.f32 %v1179_v21, %v1158_v33  ;;  %v599_v52 = vmul.f32 2.0, %v585_v2  ;;  %v643_v45 = vsub.f32 1.0, %v629_v53  ;;  %v600_v29 = vmul.f32 2.0, %v586_v17 }
 0x1f0   :  { %v3615_v3 = vsub.f32 %v5055_v57, %v379_v62  ;;  %v3620_v41 = vsub.f32 %v5056_v56, %v380_v49  ;;  %v487_v9 = vadd.f32 0.008333334, %v473_v13  ;;  %v488_v54 = vadd.f32 0.008333334, %v474_v42  ;;  %v5059_v56 = vld [vmem:[#allocation27_spill] sm:$0xff] }
 0x1f1   :  { %v559_v48 = vadd.f32 %v545_v31, %v3537_v47  ;;  %v560_v5 = vadd.f32 %v546_v61, %v3545_v30  ;;  %v644_v27 = vsub.f32 1.0, %v630_v59  ;;  %v529_v21 = vmul.f32 %v403_v35, %v3574_v20 }
 0x1f2   :  { %v407_v1 = vmul.f32 %v3615_v3, %v3615_v3  ;;  %v408_v36 = vmul.f32 %v3620_v41, %v3620_v41  ;;  %v501_v46 = vmul.f32 %v487_v9, %v403_v35  ;;  %v502_v58 = vmul.f32 %v488_v54, %v3588_v8 }
 0x1f3   :  { %v613_v18 = vsub.f32 %v5043_v6, %v599_v52  ;;  %v614_v32 = vsub.f32 %v5044_v22, %v600_v29  ;;  %v3633_v53 = vadd.f32 %v3487_v23, %v708_v55  ;;  %v530_v47 = vmul.f32 %v3588_v8, %v3579_v60  ;;  %v5057_v55 = vld [vmem:[#allocation35_spill] sm:$0xff]  ;;  %v683_v8 = vpop.permute.xlu0 %682 }
 0x1f4   :  { %v421_v4 = vmul.f32 -2.5052108e-08, %v407_v1  ;;  %v422_v11 = vmul.f32 -2.5052108e-08, %v408_v36  ;;  %v515_v26 = vadd.f32 -0.16666667, %v501_v46  ;;  %v3638_v37 = vadd.f32 %v1200_v28, %v3558_v25 }
 0x1f5   :  { %v516_v33 = vadd.f32 -0.16666667, %v502_v58  ;;  %v657_v35 = vmul.f32 %v643_v45, %v559_v48  ;;  %v658_v39 = vmul.f32 %v644_v27, %v560_v5  ;;  %v575_v6 = vmul.f32 0.5, %v3261_v40  ;;  %v5058_v25 = vld [vmem:[#allocation42_spill] sm:$0xff]  ;;  %v5060_v28 = vld [vmem:[#allocation41_spill] sm:$0xff] }
 0x1f6   :  { %v435_v30 = vadd.f32 2.7557319e-06, %v421_v4  ;;  %v436_v12 = vadd.f32 2.7557319e-06, %v422_v11  ;;  %v543_v31 = vmul.f32 %v529_v21, %v515_v26  ;;  %v627_v22 = vmul.f32 2.0, %v613_v18  ;;  %v5062_v48 = vld [vmem:[#allocation30_spill] sm:$0xff] }
 0x1f7   :  { %v544_v51 = vmul.f32 %v530_v47, %v516_v33  ;;  %v628_v61 = vmul.f32 2.0, %v614_v32  ;;  %v576_v23 = vmul.f32 0.5, %v3279_v63  ;;  %v879_v13 = vmul.f32 0.0009676536, %v5057_v55  ;;  %v5063_v5 = vld [vmem:[#allocation46_spill] sm:$0xff] }
 0x1f8   :  { %v449_v62 = vmul.f32 %v435_v30, %v407_v1  ;;  %v450_v49 = vmul.f32 %v436_v12, %v408_v36  ;;  %v589_v59 = vfloor.f32 %v575_v6  ;;  %v880_v17 = vmul.f32 0.0009676536, %v5058_v25 }
 0x1f9   :  { %v699_v7 = vmul.f32 %v683_v8, %v657_v35  ;;  %v557_v38 = vadd.f32 %v543_v31, %v3574_v20  ;;  %v590_v57 = vfloor.f32 %v576_v23  ;;  %v5061_v9 = vsub.f32 %v5059_v56, %v5060_v28 }
 0x1fa   :  { %v463_v42 = vadd.f32 -0.0001984127, %v449_v62  ;;  %v464_v2 = vadd.f32 -0.0001984127, %v450_v49  ;;  %v558_v52 = vadd.f32 %v544_v51, %v3579_v60  ;;  %v5064_v46 = vsub.f32 %v5062_v48, %v5063_v5  ;;  %v5065_v60 = vld [vmem:[#allocation52_spill] sm:$0xff]  ;;  %v5066_v62 = vld [vmem:[#allocation54_spill] sm:$0xff] }
 0x1fb   :  { %v3648_v54 = vsub.f32 %v5061_v9, %v879_v13  ;;  %v700_v27 = vmul.f32 %v683_v8, %v658_v39  ;;  %v641_v21 = vsub.f32 1.0, %v627_v22  ;;  %v642_v4 = vsub.f32 1.0, %v628_v61 }
 0x1fc   :  { %v477_v45 = vmul.f32 %v463_v42, %v407_v1  ;;  %v478_v29 = vmul.f32 %v464_v2, %v408_v36  ;;  %v3654_v58 = vsub.f32 %v5064_v46, %v880_v17  ;;  %v603_v33 = vmul.f32 2.0, %v589_v59  ;;  %v679_v2 = vpop.permute.xlu1 %678 }
 0x1fd   :  { %v907_v20 = vmul.f32 %v3648_v54, %v3648_v54  ;;  %v3661_v32 = vadd.f32 %v5065_v60, %v699_v7  ;;  %v655_v47 = vmul.f32 %v641_v21, %v557_v38  ;;  %v604_v30 = vmul.f32 2.0, %v590_v57 }
 0x1fe   :  { %v491_v11 = vadd.f32 0.008333334, %v477_v45  ;;  %v492_v26 = vadd.f32 0.008333334, %v478_v29  ;;  %v908_v18 = vmul.f32 %v3654_v58, %v3654_v58  ;;  %v656_v35 = vmul.f32 %v642_v4, %v558_v52  ;;  %v5067_v45 = vld [vmem:[#allocation45_spill] sm:$0xff] }
 0x1ff   :  { %v921_v12 = vmul.f32 -2.5052108e-08, %v907_v20  ;;  %v3664_v49 = vadd.f32 %v5066_v62, %v700_v27  ;;  %v533_v6 = vmul.f32 %v407_v1, %v3615_v3  ;;  %v534_v22 = vmul.f32 %v408_v36, %v3620_v41 }
 0x200   :  { %v505_v31 = vmul.f32 %v491_v11, %v407_v1  ;;  %v506_v39 = vmul.f32 %v492_v26, %v408_v36  ;;  %v922_v51 = vmul.f32 -2.5052108e-08, %v908_v18  ;;  %v617_v8 = vsub.f32 %v3261_v40, %v603_v33  ;;  %v5069_v11 = vld [vmem:[#allocation32_spill] sm:$0xff]  ;;  %v5070_v26 = vld [vmem:[#allocation53_spill] sm:$0xff] }
 0x201   :  { %v935_v61 = vadd.f32 2.7557319e-06, %v921_v12  ;;  %v1075_v42 = vmul.f32 0.5, %v5057_v55  ;;  %v618_v59 = vsub.f32 %v3279_v63, %v604_v30  ;;  %v1076_v38 = vmul.f32 0.5, %v5058_v25  ;;  %v5068_v63 = vld [vmem:[#allocation50_spill] sm:$0xff] }
 0x202   :  { %v519_v23 = vadd.f32 -0.16666667, %v505_v31  ;;  %v520_v13 = vadd.f32 -0.16666667, %v506_v39  ;;  %v936_v17 = vadd.f32 2.7557319e-06, %v922_v51  ;;  %v697_v57 = vmul.f32 %v679_v2, %v655_v47 }
 0x203   :  { %v949_v7 = vmul.f32 %v935_v61, %v907_v20  ;;  %v698_v56 = vmul.f32 %v679_v2, %v656_v35  ;;  %v2530_v1 = vpack.c.bf16 %v3529_v19, %v3389_v10  ;;  %v881_v40 = vmul.f32 0.0009676536, %v5067_v45  ;;  %v5072_v10 = vld [vmem:[#allocation48_spill] sm:$0xff]  ;;  %v5073_v47 = vld [vmem:[#allocation51_spill] sm:$0xff] }
 0x204   :  { %v547_v28 = vmul.f32 %v533_v6, %v519_v23  ;;  %v548_v36 = vmul.f32 %v534_v22, %v520_v13  ;;  %v950_v9 = vmul.f32 %v936_v17, %v908_v18  ;;  %v631_v29 = vmul.f32 2.0, %v617_v8  ;;  %v5074_v35 = vld [vmem:[#allocation40_spill] sm:$0xff]  ;;  %v5075_v31 = vld [vmem:[#allocation55_spill] sm:$0xff] }
 0x205   :  { %v963_v52 = vadd.f32 -0.0001984127, %v949_v7  ;;  %v1089_v48 = vfloor.f32 %v1075_v42  ;;  %v1090_v5 = vfloor.f32 %v1076_v38  ;;  %2531 = vmatprep.subr.bf16.mxu0 %v2530_v1  ;;  %2542 = vmatprep.subr.bf16.mxu1 %v2530_v1  ;;  %v882_v46 = vmul.f32 0.0009676536, %v5068_v63 }
 0x206   :  { %v632_v27 = vmul.f32 2.0, %v618_v59  ;;  %v964_v21 = vadd.f32 -0.0001984127, %v950_v9  ;;  %v5071_v33 = vsub.f32 %v5069_v11, %v5070_v26  ;;  %v3682_v19 = vadd.f32 %v5072_v10, %v697_v57 }
 0x207   :  { %v977_v4 = vmul.f32 %v963_v52, %v907_v20  ;;  %v3685_v30 = vadd.f32 %v5073_v47, %v698_v56  ;;  %v561_v12 = vadd.f32 %v547_v28, %v3615_v3  ;;  %v5076_v39 = vsub.f32 %v5074_v35, %v5075_v31 }
 0x208   :  { %v3679_v60 = vsub.f32 %v5071_v33, %v881_v40  ;;  %v562_v62 = vadd.f32 %v548_v36, %v3620_v41  ;;  %v978_v6 = vmul.f32 %v964_v21, %v908_v18  ;;  %v645_v23 = vsub.f32 1.0, %v631_v29 }
 0x209   :  { %v3691_v51 = vsub.f32 %v5076_v39, %v882_v46  ;;  %v991_v22 = vadd.f32 0.008333334, %v977_v4  ;;  %v1103_v13 = vmul.f32 2.0, %v1089_v48  ;;  %v1104_v8 = vmul.f32 2.0, %v1090_v5 }
 0x20a   :  { %v909_v61 = vmul.f32 %v3679_v60, %v3679_v60  ;;  %v646_v2 = vsub.f32 1.0, %v632_v27  ;;  %v992_v3 = vadd.f32 0.008333334, %v978_v6  ;;  %v659_v7 = vmul.f32 %v645_v23, %v561_v12 }
 0x20b   :  { %v910_v42 = vmul.f32 %v3691_v51, %v3691_v51  ;;  %v1005_v59 = vmul.f32 %v991_v22, %v907_v20  ;;  %v1033_v38 = vmul.f32 %v907_v20, %v3648_v54  ;;  %v1034_v41 = vmul.f32 %v908_v18, %v3654_v58  ;;  %v687_v20 = vpop.permute.xlu0 %686 }
 0x20c   :  { %v923_v17 = vmul.f32 -2.5052108e-08, %v909_v61  ;;  %v660_v56 = vmul.f32 %v646_v2, %v562_v62  ;;  %v1006_v28 = vmul.f32 %v992_v3, %v908_v18  ;;  %v1117_v9 = vsub.f32 %v5057_v55, %v1103_v13 }
 0x20d   :  { %v924_v57 = vmul.f32 -2.5052108e-08, %v910_v42  ;;  %v1019_v1 = vadd.f32 -0.16666667, %v1005_v59  ;;  %v1118_v52 = vsub.f32 %v5058_v25, %v1104_v8  ;;  %v1077_v29 = vmul.f32 0.5, %v5067_v45 }
 0x20e   :  { %v937_v36 = vadd.f32 2.7557319e-06, %v923_v17  ;;  %v1020_v48 = vadd.f32 -0.16666667, %v1006_v28  ;;  %v1078_v27 = vmul.f32 0.5, %v5068_v63  ;;  %v2532_v18 = vpack.c.bf16 %v3521_v44, %v3387_v24 }
 0x20f   :  { %v938_v40 = vadd.f32 2.7557319e-06, %v924_v57  ;;  %v1047_v5 = vmul.f32 %v1033_v38, %v1019_v1  ;;  %v1091_v4 = vfloor.f32 %v1077_v29  ;;  %v925_v11 = vmul.f32 -2.5052108e-08, %v3348_v15 }
 0x210   :  { %v951_v46 = vmul.f32 %v937_v36, %v909_v61  ;;  %v3707_v26 = vmul.f32 %v687_v20, %v659_v7  ;;  %v1048_v55 = vmul.f32 %v1034_v41, %v1020_v48  ;;  %v1092_v33 = vfloor.f32 %v1078_v27  ;;  %2533 = vmatpush1.bf16.msra.mxu0 %v2532_v18  ;;  %2546 = vmatpush1.bf16.msra.mxu1 %v2532_v18 }
 0x211   :  { %v952_v21 = vmul.f32 %v938_v40, %v910_v42  ;;  %v1131_v10 = vmul.f32 2.0, %v1117_v9  ;;  %v1105_v12 = vmul.f32 2.0, %v1091_v4  ;;  %v926_v35 = vmul.f32 -2.5052108e-08, %v3374_v16  ;;  %v1183_v40 = vpop.permute.xlu1 %1182 }
 0x212   :  { %v965_v25 = vadd.f32 -0.0001984127, %v951_v46  ;;  %v3710_v31 = vmul.f32 %v687_v20, %v660_v56  ;;  %v1132_v39 = vmul.f32 2.0, %v1118_v52  ;;  %v1106_v6 = vmul.f32 2.0, %v1092_v33  ;;  %v5077_v46 = vld [vmem:[#allocation56_spill] sm:$0xff] }
 0x213   :  { %v966_v47 = vadd.f32 -0.0001984127, %v952_v21  ;;  %v1061_v24 = vadd.f32 %v1047_v5, %v3648_v54  ;;  %v939_v22 = vadd.f32 2.7557319e-06, %v925_v11  ;;  %v940_v23 = vadd.f32 2.7557319e-06, %v926_v35 }
 0x214   :  { %v979_v62 = vmul.f32 %v965_v25, %v909_v61  ;;  %v1062_v13 = vadd.f32 %v1048_v55, %v3654_v58  ;;  %v1119_v2 = vsub.f32 %v5067_v45, %v1105_v12  ;;  %v1120_v3 = vsub.f32 %v5068_v63, %v1106_v6 }
 0x215   :  { %v980_v44 = vmul.f32 %v966_v47, %v910_v42  ;;  %v1145_v59 = vsub.f32 1.0, %v1131_v10  ;;  %v953_v7 = vmul.f32 %v939_v22, %v3348_v15  ;;  %v954_v38 = vmul.f32 %v940_v23, %v3374_v16 }
 0x216   :  { %v993_v8 = vadd.f32 0.008333334, %v979_v62  ;;  %v1146_v41 = vsub.f32 1.0, %v1132_v39  ;;  %v1035_v54 = vmul.f32 %v909_v61, %v3679_v60  ;;  %v1036_v56 = vmul.f32 %v910_v42, %v3691_v51 }
 0x217   :  { %v994_v17 = vadd.f32 0.008333334, %v980_v44  ;;  %v1159_v28 = vmul.f32 %v1145_v59, %v1061_v24  ;;  %v967_v58 = vadd.f32 -0.0001984127, %v953_v7  ;;  %v968_v36 = vadd.f32 -0.0001984127, %v954_v38 }
 0x218   :  { %v1007_v57 = vmul.f32 %v993_v8, %v909_v61  ;;  %v1160_v9 = vmul.f32 %v1146_v41, %v1062_v13  ;;  %v1133_v52 = vmul.f32 2.0, %v1119_v2  ;;  %v1134_v63 = vmul.f32 2.0, %v1120_v3  ;;  %v3745_v24 = vld [vmem:[%s4832_s1] sm:$0xff] }
 0x219   :  { %v1008_v1 = vmul.f32 %v994_v17, %v910_v42  ;;  %v981_v48 = vmul.f32 %v967_v58, %v3348_v15  ;;  %v982_v5 = vmul.f32 %v968_v36, %v3374_v16  ;;  %v1079_v27 = vmul.f32 0.5, %v5077_v46 }
 0x21a   :  { %v1021_v45 = vadd.f32 -0.16666667, %v1007_v57  ;;  %v1080_v61 = vmul.f32 0.5, %v3270_v0  ;;  %v2534_v42 = vpack.c.bf16 %v3638_v37, %v3633_v53  ;;  %v2726_v55 = vmov 60  }
 0x21b   :  { %v1022_v29 = vadd.f32 -0.16666667, %v1008_v1  ;;  %v995_v4 = vadd.f32 0.008333334, %v981_v48  ;;  %v996_v18 = vadd.f32 0.008333334, %v982_v5  ;;  %v1093_v11 = vfloor.f32 %v1079_v27  ;;  %2604 = vset.pattern.permute.xlu1 %v2726_v55  ;;  %2603 = vset.pattern.permute.xlu0 %v2726_v55 }
 0x21c   :  { %v1049_v20 = vmul.f32 %v1035_v54, %v1021_v45  ;;  %v1147_v33 = vsub.f32 1.0, %v1133_v52  ;;  %v1148_v10 = vsub.f32 1.0, %v1134_v63  ;;  %v1094_v47 = vfloor.f32 %v1080_v61  ;;  %2535 = vmatprep.subr.bf16.mxu0 %v2534_v42  ;;  %2543 = vmatprep.subr.bf16.mxu1 %v2534_v42  ;;  %v3773_v63 = vld [vmem:[%s4832_s1 + $0x20] sm:$0xff]  ;;  %v3787_v48 = vld [vmem:[%s4832_s1 + $0x30] sm:$0x3] }
 0x21d   :  { %v1050_v21 = vmul.f32 %v1036_v56, %v1022_v29  ;;  %v1009_v35 = vmul.f32 %v995_v4, %v3348_v15  ;;  %v1010_v53 = vmul.f32 %v996_v18, %v3374_v16  ;;  %v1107_v37 = vmul.f32 2.0, %v1093_v11  ;;  %2537 = vmatpush1.bf16.msra.mxu0 %v3602_v43  ;;  %2547 = vmatpush1.bf16.msra.mxu1 %v3602_v43  ;;  %v1187_v43 = vpop.permute.xlu1 %1186  ;;  %v3756_v56 = vld [vmem:[%s4832_s1 + $0x10] sm:$0xff]  ;;  %v20_v18 = vld [vmem:[%s4832_s1] sm:$0x1] }
 0x21e   :  { %v1063_v25 = vadd.f32 %v1049_v20, %v3679_v60  ;;  %v1037_v60 = vmul.f32 %v3348_v15, %v3312_v34  ;;  %v1038_v62 = vmul.f32 %v3374_v16, %v3344_v14  ;;  %v1108_v6 = vmul.f32 2.0, %v1094_v47  ;;  %1222 = vperm.xlu0 %2603, %v3745_v24  }
 0x21f   :  { %v1064_v12 = vadd.f32 %v1050_v21, %v3691_v51  ;;  %v3739_v51 = vld [vmem:[%s4832_s1 + $0x8] sm:$0xff]  ;;  %v1023_v44 = vadd.f32 -0.16666667, %v1009_v35  ;;  %v1024_v22 = vadd.f32 -0.16666667, %v1010_v53  ;;  %v1121_v16 = vsub.f32 %v5077_v46, %v1107_v37 }
 0x220   :  { %v1161_v39 = vmul.f32 %v1147_v33, %v1063_v25  ;;  %1226 = vperm.xlu1 %2604, %v3739_v51   ;;  %v1201_v23 = vmul.f32 %v1183_v40, %v1159_v28  ;;  %v1202_v13 = vmul.f32 %v1183_v40, %v1160_v9  ;;  %v1122_v2 = vsub.f32 %v3270_v0, %v1108_v6  ;;  %v3762_v0 = vld [vmem:[%s4832_s1 + $0x18] sm:$0xff] }
 0x221   :  { %v1162_v15 = vmul.f32 %v1148_v10, %v1064_v12  ;;  %v1051_v59 = vmul.f32 %v1037_v60, %v1023_v44  ;;  %v1052_v17 = vmul.f32 %v1038_v62, %v1024_v22  ;;  %v1135_v7 = vmul.f32 2.0, %v1121_v16  ;;  %v1191_v40 = vpop.permute.xlu1 %1190 }
 0x222   :  { %v1203_v8 = vmul.f32 %v1187_v43, %v1161_v39  ;;  %v1215_v38 = vadd.f32 %v1201_v23, %v3682_v19  ;;  %v1216_v41 = vadd.f32 %v1202_v13, %v3685_v30  ;;  %v1136_v54 = vmul.f32 2.0, %v1122_v2  ;;  %1234 = vperm.xlu0 %2603, %v3762_v0  }
 0x223   :  { %v1204_v3 = vmul.f32 %v1187_v43, %v1162_v15  ;;  %v1065_v30 = vadd.f32 %v1051_v59, %v3312_v34  ;;  %v1149_v28 = vsub.f32 1.0, %v1135_v7  ;;  %v716_v45 = vadd.f32 %v3307_v50, %v3710_v31  ;;  %v3779_v34 = vld [vmem:[%s4832_s1 + $0x28] sm:$0xff]  ;;  %s2736_s1 = smov [#allocation2]  }
 0x224   :  { %v1217_v57 = vadd.f32 %v1203_v8, %v3661_v32  ;;  %1230 = vperm.xlu1 %2604, %v3756_v56   ;;  %v1066_v32 = vadd.f32 %v1052_v17, %v3344_v14  ;;  %v1150_v58 = vsub.f32 1.0, %v1136_v54  ;;  %v5078_v14 = vld [vmem:[#allocation58_spill] sm:$0xff]  ;;  %v2727_v5 = vmov 61   ;;  %s2504_s13 = sshll.u32 %s2736_s1, 4  ;;  %s2505_s13 = int_to_ptr.vmem [resolvable:$true] %s2504_s13 }
 0x225   :  { %v1218_v19 = vadd.f32 %v1204_v3, %v3664_v49  ;;  %v1163_v36 = vmul.f32 %v1149_v28, %v1065_v30  ;;  %v715_v49 = vadd.f32 %v5078_v14, %v3707_v26  ;;  %v5079_v26 = vmov 0.0   ;;  %s2693_s14 = scalar_lea.vmem %s2505_s13, 32  ;;  %p2698_p1 = scmp.lt.s32.totalorder %s2505_s13, %s2505_s13 }
 0x226   :  { %v2540_v1 = vpack.c.bf16 %v1217_v57, %v1215_v38  ;;  %v1164_v52 = vmul.f32 %v1150_v58, %v1066_v32  ;;  %1242 = vperm.xlu0 %2603, %v3779_v34   ;;  %v2728_v27 = vmov 62   ;;  %v2729_v20 = vmov 63   ;;  %p2694_p0 = scmp.ne.s32.totalorder %s2505_s13, %s2693_s14  ;;  %p2699_p2 = scmp.lt.s32.totalorder %s2693_s14, %s2693_s14 }
 0x227   :  { %v2538_v9 = vpack.c.bf16 %v1218_v19, %v1216_v41  ;;  %v1205_v31 = vmul.f32 %v1191_v40, %v1163_v36  ;;  %v2730_v61 = vmov 64   ;;  %v2731_v42 = vmov 65  }
 0x228   :  { %1238 = vperm.xlu1 %2604, %v3773_v63   ;;  %v1206_v50 = vmul.f32 %v1191_v40, %v1164_v52  ;;  %v2732_v21 = vmov 66   ;;  %v2733_v4 = vmov 67   ;;  %v2734_v11 = vmov 68   ;;  %p2700_p3 = por %p2699_p2, %p2698_p1 }
 0x229   :  { %2539 = vmatprep.subr.bf16.mxu0 %v2538_v9  ;;  %2544 = vmatprep.subr.bf16.mxu1 %v2538_v9  ;;  %v1219_v46 = vadd.f32 %v1205_v31, %v715_v49 }
 0x22a   :  { %2541 = vmatpush1.bf16.msra.mxu0 %v2540_v1  ;;  %2548 = vmatpush1.bf16.msra.mxu1 %v2540_v1  ;;  %v1220_v29 = vadd.f32 %v1206_v50, %v716_v45  ;;  %p2701_p4 = pnand %p2700_p3, %p2694_p0 }
 0x22b   :  { %2605 = vset.pattern.permute.xlu0 %v2727_v5 }
 0x22c   :  { %1246 = vperm.xlu1 %2604, %v3787_v48   ;;  %1393 = vperm.xlu0 %2605, %v3745_v24  }
 0x22d   :  { %2521 = vmatprep.subr.msk.mxu0 %vm1264_vm2, %v1220_v29  ;;  %2545 = vmatprep.subr.msk.mxu1 %vm1264_vm2, %v1220_v29 }
 0x22e   :  { %2522 = vmatpush1.msk.msra.mxu0 %vm1264_vm2, %v1219_v46  ;;  %2549 = vmatpush1.msk.msra.mxu1 %vm1264_vm2, %v1219_v46 }
 0x22f   :  { %2523 = vmatmul.mubr.msk.f32.vlgmr.msra.gmra.mrb[14].mxu0 %vm1249_vm3, %v3745_v24  ;;  %2524 = vmatmul.mubr.msk.f32.vlgmr.msra.gmra.mrb[0].mxu1 %vm1249_vm3, %v3739_v51 }
 0x230   :  { %1347 = vmatprep.mubr.f32.mxu1 %v5079_v26  ;;  %2606 = vset.pattern.permute.xlu1 %v2727_v5 }
 0x231   :  { %1397 = vperm.xlu1 %2606, %v3739_v51   ;;  %1405 = vperm.xlu0 %2605, %v3762_v0  }
 0x233   :  { %2525 = vmatmul.mubr.msk.f32.gmra.mrb[2].mxu1 %vm1249_vm3, %v3756_v56 }
 0x234   :  { %1353 = vmatprep.mubr.f32.mxu1 %v5079_v26 }
 0x235   :  { %1401 = vperm.xlu1 %2606, %v3756_v56   ;;  %1413 = vperm.xlu0 %2605, %v3779_v34  }
 0x237   :  { %2526 = vmatmul.mubr.msk.f32.gmra.mrb[4].mxu1 %vm1249_vm3, %v3762_v0 }
 0x238   :  { %1359 = vmatprep.mubr.f32.mxu1 %v5079_v26 }
 0x239   :  { %1409 = vperm.xlu1 %2606, %v3773_v63   ;;  %2607 = vset.pattern.permute.xlu0 %v2728_v27 }
 0x23a   :  { %1435 = vperm.xlu0 %2607, %v3745_v24  }
 0x23b   :  { %2527 = vmatmul.mubr.msk.f32.gmra.mrb[6].mxu1 %vm1249_vm3, %v3773_v63 }
 0x23c   :  { %1365 = vmatprep.mubr.f32.mxu1 %v5079_v26 }
 0x23d   :  { %1417 = vperm.xlu1 %2606, %v3787_v48  }
 0x23e   :  { %1447 = vperm.xlu0 %2607, %v3762_v0  }
 0x23f   :  { %2528 = vmatmul.mubr.msk.f32.gmra.mrb[8].mxu1 %vm1249_vm3, %v3779_v34 }
 0x240   :  { %1371 = vmatprep.mubr.f32.mxu1 %v5079_v26 }
 0x241   :  { %2608 = vset.pattern.permute.xlu1 %v2728_v27 }
 0x242   :  { %1439 = vperm.xlu1 %2608, %v3739_v51   ;;  %1455 = vperm.xlu0 %2607, %v3779_v34  }
 0x243   :  { %2529 = vmatmul.mubr.msk.f32.gmra.mrb[10].mxu1 %vm1249_vm3, %v3787_v48 }
 0x246   :  { %1443 = vperm.xlu1 %2608, %v3756_v56   ;;  %2609 = vset.pattern.permute.xlu0 %v2729_v20 }
 0x247   :  { %1897 = vperm.xlu0 %2609, %v3745_v24  }
 0x24a   :  { %1451 = vperm.xlu1 %2608, %v3773_v63  }
 0x24b   :  { %2611 = vset.pattern.permute.xlu0 %v2730_v61 }
 0x24c   :  { %1939 = vperm.xlu0 %2611, %v3745_v24  }
 0x24e   :  { %1459 = vperm.xlu1 %2608, %v3787_v48  }
 0x250   :  { %1947 = vperm.xlu0 %2611, %v3756_v56  }
 0x252   :  { %2610 = vset.pattern.permute.xlu1 %v2729_v20 }
 0x253   :  { %1901 = vperm.xlu1 %2610, %v3739_v51  }
 0x254   :  { %1951 = vperm.xlu0 %2611, %v3762_v0  }
 0x257   :  { %1905 = vperm.xlu1 %2610, %v3756_v56  }
 0x258   :  { %1955 = vperm.xlu0 %2611, %v3773_v63  }
 0x25b   :  { %2612 = vset.pattern.permute.xlu1 %v2730_v61 }
 0x25c   :  { %1943 = vperm.xlu1 %2612, %v3739_v51   ;;  %1959 = vperm.xlu0 %2611, %v3779_v34  }
 0x260   :  { %2613 = vset.pattern.permute.xlu1 %v2729_v20  ;;  %2615 = vset.pattern.permute.xlu0 %v2731_v42 }
 0x261   :  { %1909 = vperm.xlu1 %2613, %v3762_v0   ;;  %1841 = vperm.xlu0 %2615, %v3745_v24  }
 0x265   :  { %1913 = vperm.xlu1 %2613, %v3773_v63   ;;  %2617 = vset.pattern.permute.xlu0 %v2732_v21 }
 0x266   :  { %2345 = vperm.xlu0 %2617, %v3745_v24  }
 0x269   :  { %1917 = vperm.xlu1 %2613, %v3779_v34  }
 0x26a   :  { %2353 = vperm.xlu0 %2617, %v3756_v56  }
 0x26d   :  { %1921 = vperm.xlu1 %2613, %v3787_v48  }
 0x26e   :  { %2357 = vperm.xlu0 %2617, %v3762_v0  }
 0x271   :  { %2614 = vset.pattern.permute.xlu1 %v2730_v61 }
 0x272   :  { %1963 = vperm.xlu1 %2614, %v3787_v48   ;;  %2365 = vperm.xlu0 %2617, %v3779_v34  }
 0x276   :  { %2616 = vset.pattern.permute.xlu1 %v2731_v42  ;;  %2624 = vset.pattern.permute.xlu0 %v2733_v4 }
 0x277   :  { %1845 = vperm.xlu1 %2616, %v3739_v51   ;;  %2405 = vperm.xlu0 %2624, %v3739_v51  }
 0x27b   :  { %1849 = vperm.xlu1 %2616, %v3756_v56   ;;  %2409 = vperm.xlu0 %2624, %v3756_v56  }
 0x27f   :  { %2618 = vset.pattern.permute.xlu1 %v2732_v21  ;;  %2417 = vperm.xlu0 %2624, %v3773_v63  }
 0x280   :  { %2349 = vperm.xlu1 %2618, %v3739_v51  }
 0x283   :  { %2628 = vset.pattern.permute.xlu0 %v2734_v11 }
 0x284   :  { %2619 = vset.pattern.permute.xlu1 %v2731_v42  ;;  %2470 = vperm.xlu0 %2628, %v20_v18  }
 0x285   :  { %1853 = vperm.xlu1 %2619, %v3762_v0  }
 0x289   :  { %1857 = vperm.xlu1 %2619, %v3773_v63  }
 0x28d   :  { %2620 = vset.pattern.permute.xlu1 %v2733_v4 }
 0x28e   :  { %2401 = vperm.xlu1 %2620, %v3745_v24  }
 0x292   :  { %2621 = vset.pattern.permute.xlu1 %v2731_v42 }
 0x293   :  { %1861 = vperm.xlu1 %2621, %v3779_v34  }
 0x297   :  { %2622 = vset.pattern.permute.xlu1 %v2732_v21 }
 0x298   :  { %2361 = vperm.xlu1 %2622, %v3773_v63  }
 0x29c   :  { %2623 = vset.pattern.permute.xlu1 %v2731_v42 }
 0x29d   :  { %1865 = vperm.xlu1 %2623, %v3787_v48   ;;  %v1223_v47 = vpop.permute.xlu0 %1222 }
 0x29f   :  { %v1227_v55 = vpop.permute.xlu1 %1226 }
 0x2a1   :  { %2625 = vset.pattern.permute.xlu1 %v2733_v4  ;;  %v3871_v35 = vpop.permute.xlu0 %1234 }
 0x2a2   :  { %2413 = vperm.xlu1 %2625, %v3762_v0  }
 0x2a3   :  { %v3865_v25 = vpop.permute.xlu1 %1230 }
 0x2a5   :  { %v3875_v37 = vpop.permute.xlu0 %1242 }
 0x2a6   :  { %2626 = vset.pattern.permute.xlu1 %v2732_v21 }
 0x2a7   :  { %2369 = vperm.xlu1 %2626, %v3787_v48   ;;  %v3867_v33 = vpop.permute.xlu1 %1238 }
 0x2ab   :  { %2627 = vset.pattern.permute.xlu1 %v2733_v4  ;;  %v3869_v10 = vpop.permute.xlu1 %1246  ;;  %v1394_v60 = vpop.permute.xlu0 %1393 }
 0x2ac   :  { %2421 = vperm.xlu1 %2627, %v3779_v34   ;;  %5080 = vst [vmem:[#allocation7_spill] sm:$0xff] %v3869_v10 }
 0x2b0   :  { %2425 = vperm.xlu1 %2627, %v3787_v48   ;;  %v1398_v12 = vpop.permute.xlu1 %1397  ;;  %v3881_v6 = vpop.permute.xlu0 %1405 }
 0x2b4   :  { %v3873_v53 = vpop.permute.xlu1 %1401  ;;  %v3883_v24 = vpop.permute.xlu0 %1413 }
 0x2b8   :  { %v3877_v39 = vpop.permute.xlu1 %1409 }
 0x2b9   :  { %v1436_v15 = vpop.permute.xlu0 %1435 }
 0x2bc   :  { %v3879_v62 = vpop.permute.xlu1 %1417 }
 0x2bd   :  { %5081 = vst [vmem:[#allocation20_spill] sm:$0xff] %v3879_v62  ;;  %v3889_v22 = vpop.permute.xlu0 %1447 }
 0x2c1   :  { %v1440_v51 = vpop.permute.xlu1 %1439  ;;  %v3893_v23 = vpop.permute.xlu0 %1455 }
 0x2c5   :  { %v3885_v43 = vpop.permute.xlu1 %1443 }
 0x2c6   :  { %v1898_v8 = vpop.permute.xlu0 %1897 }
 0x2c9   :  { %v3887_v44 = vpop.permute.xlu1 %1451 }
 0x2cb   :  { %v1940_v30 = vpop.permute.xlu0 %1939 }
 0x2cd   :  { %v3891_v16 = vpop.permute.xlu1 %1459 }
 0x2ce   :  { %5082 = vst [vmem:[#allocation13_spill] sm:$0xff] %v3891_v16 }
 0x2d2   :  { %v1902_v13 = vpop.permute.xlu1 %1901 }
 0x2d6   :  { %v3895_v2 = vpop.permute.xlu1 %1905 }
 0x2db   :  { %v1944_v36 = vpop.permute.xlu1 %1943 }
 0x302   :  { %v1337_v3 = vpop.f32.mrb[14].mxu0  ;;  %v1343_v59 = vpop.f32.mrb[0].mxu1 }
 0x303   :  { %v1338_v17 = vadd.f32 %v1337_v3, %v1223_v47  ;;  %v1344_v7 = vadd.f32 %v1343_v59, %v1227_v55  ;;  %v1339_v38 = vpop.f32.mrb[15].mxu0  ;;  %v1345_v41 = vpop.f32.mrb[1].mxu1 }
 0x304   :  { %v1340_v57 = vadd.f32 %v1339_v38, %v1223_v47  ;;  %v1346_v19 = vadd.f32 %v1345_v41, %v1227_v55 }
 0x305   :  { %v1420_v54 = vmul.f32 %v1394_v60, %v1338_v17  ;;  %v1924_v56 = vmul.f32 %v1898_v8, %v1338_v17  ;;  %v1422_v0 = vmul.f32 %v1398_v12, %v1344_v7  ;;  %v1926_v32 = vmul.f32 %v1902_v13, %v1344_v7 }
 0x306   :  { %v1421_v28 = vmul.f32 %v1394_v60, %v1340_v57  ;;  %v1925_v1 = vmul.f32 %v1898_v8, %v1340_v57  ;;  %v1349_v58 = vpop.f32.mrb[2].mxu1  ;;  %v1423_v50 = vmul.f32 %v1398_v12, %v1346_v19  ;;  %v1927_v61 = vmul.f32 %v1902_v13, %v1346_v19 }
 0x307   :  { %v3897_v9 = vadd.f32 %v1436_v15, %v1420_v54  ;;  %v3899_v45 = vadd.f32 %v1940_v30, %v1924_v56  ;;  %v1464_v52 = vadd.f32 %v1440_v51, %v1422_v0  ;;  %v1351_v63 = vpop.f32.mrb[3].mxu1  ;;  %v3901_v34 = vadd.f32 %v1944_v36, %v1926_v32 }
 0x308   :  { %v3903_v14 = vadd.f32 %v1436_v15, %v1421_v28  ;;  %v3905_v49 = vadd.f32 %v1940_v30, %v1925_v1  ;;  %v1465_v46 = vadd.f32 %v1440_v51, %v1423_v50  ;;  %2658 = vtanh.f32 %v1338_v17 }
 0x309   :  { %5083 = vst [vmem:[#allocation15_spill] sm:$0xff] %v3897_v9  ;;  %5084 = vst [vmem:[#allocation8_spill] sm:$0xff] %v3899_v45  ;;  %v1478_v40 = vmul.f32 0.31830987, %v1464_v52  ;;  %v1476_v31 = vmul.f32 0.31830987, %v3897_v9  ;;  %2660 = vtanh.f32 %v1344_v7  ;;  %v3923_v13 = vadd.f32 %v1944_v36, %v1927_v61 }
 0x30a   :  { %5085 = vst [vmem:[#allocation10_spill] sm:$0xff] %v3903_v14  ;;  %5086 = vst [vmem:[#allocation5_spill] sm:$0xff] %v3905_v49  ;;  %v1980_v29 = vmul.f32 0.31830987, %v3899_v45  ;;  %v1982_v48 = vmul.f32 0.31830987, %v3901_v34  ;;  %2662 = vtanh.f32 %v1340_v57  ;;  %v3937_v7 = vadd.f32 %v1349_v58, %v3865_v25 }
 0x30b   :  { %v1492_v5 = vadd.f32 0.5, %v1478_v40  ;;  %v3910_v26 = vpop.f32.mrb[4].mxu1  ;;  %v1477_v27 = vmul.f32 0.31830987, %v3903_v14  ;;  %v1981_v20 = vmul.f32 0.31830987, %v3905_v49  ;;  %2664 = vtanh.f32 %v1346_v19 }
 0x30c   :  { %v3914_v42 = vpop.f32.mrb[5].mxu1  ;;  %v1479_v4 = vmul.f32 0.31830987, %v1465_v46  ;;  %v1490_v18 = vadd.f32 0.5, %v1476_v31  ;;  %v1994_v11 = vadd.f32 0.5, %v1980_v29  ;;  %v1996_v55 = vadd.f32 0.5, %v1982_v48  ;;  %v1948_v29 = vpop.permute.xlu0 %1947 }
 0x30d   :  { %v3916_v21 = vfloor.f32 %v1492_v5  ;;  %v1491_v15 = vadd.f32 0.5, %v1477_v27  ;;  %v1995_v8 = vadd.f32 0.5, %v1981_v20  ;;  %v3940_v0 = vadd.f32 %v1351_v63, %v3865_v25 }
 0x30e   :  { %v3918_v47 = vpop.f32.mrb[6].mxu1  ;;  %v1493_v60 = vadd.f32 0.5, %v1479_v4  ;;  %v3927_v59 = vfloor.f32 %v1490_v18  ;;  %v3929_v38 = vfloor.f32 %v1994_v11  ;;  %v3931_v41 = vfloor.f32 %v1996_v55 }
 0x30f   :  { %v1520_v12 = vmul.f32 3.140625, %v3916_v21  ;;  %v3921_v51 = vpop.f32.mrb[7].mxu1  ;;  %v3944_v30 = vfloor.f32 %v1491_v15  ;;  %v3946_v32 = vfloor.f32 %v1995_v8  ;;  %v1983_v28 = vmul.f32 0.31830987, %v3923_v13 }
 0x310   :  { %v3925_v3 = vfloor.f32 %v1493_v60  ;;  %5087 = vst [vmem:[#allocation9_spill] sm:$0xff] %v3927_v59  ;;  %5088 = vst [vmem:[#allocation6_spill] sm:$0xff] %v3929_v38  ;;  %v1548_v19 = vmul.f32 0.0009676536, %v3916_v21  ;;  %v1424_v36 = vmul.f32 %v3873_v53, %v3937_v7  ;;  %v1928_v58 = vmul.f32 %v3895_v2, %v3937_v7 }
 0x311   :  { %v1534_v54 = vsub.f32 %v1464_v52, %v1520_v12  ;;  %5089 = vst [vmem:[#allocation14_spill] sm:$0xff] %v3944_v30  ;;  %5090 = vst [vmem:[#allocation23_spill] sm:$0xff] %v3946_v32  ;;  %v3956_v52 = vmul.f32 3.140625, %v3927_v59  ;;  %v3959_v63 = vmul.f32 3.140625, %v3929_v38  ;;  %v1425_v40 = vmul.f32 %v3873_v53, %v3940_v0  ;;  %v1910_v59 = vpop.permute.xlu1 %1909 }
 0x312   :  { %v3933_v17 = vpop.f32.mrb[8].mxu1  ;;  %v1521_v56 = vmul.f32 3.140625, %v3925_v3  ;;  %v1549_v25 = vmul.f32 0.0009676536, %v3925_v3  ;;  %v1929_v50 = vmul.f32 %v3895_v2, %v3940_v0  ;;  %v3968_v48 = vmul.f32 3.140625, %v3931_v41  ;;  %v3987_v18 = vpop.eup %2658 }
 0x313   :  { %v3942_v57 = vpop.f32.mrb[9].mxu1  ;;  %5091 = vst [vmem:[#allocation25_spill] sm:$0xff] %v3956_v52  ;;  %5092 = vst [vmem:[#allocation17_spill] sm:$0xff] %v3959_v63  ;;  %v3971_v5 = vadd.f32 %v3885_v43, %v1424_v36  ;;  %v3979_v61 = vadd.f32 %v1948_v29, %v1928_v58  ;;  %v3982_v53 = vadd.f32 %v3885_v43, %v1425_v40  ;;  %v1744_v4 = vmul.f32 0.5, %v3916_v21  ;;  %v3996_v15 = vpop.eup %2660 }
 0x314   :  { %v1535_v1 = vsub.f32 %v1465_v46, %v1521_v56  ;;  %v3973_v46 = vsub.f32 %v1534_v54, %v1548_v19  ;;  %v3984_v2 = vadd.f32 %v1948_v29, %v1929_v50  ;;  %5095 = vst [vmem:[#allocation21_spill] sm:$0xff] %v3987_v18  ;;  %v1997_v11 = vadd.f32 0.5, %v1983_v28  ;;  %v4006_v28 = vpop.eup %2662 }
 0x315   :  { %v1480_v55 = vmul.f32 0.31830987, %v3971_v5  ;;  %v3999_v43 = vmul.f32 3.140625, %v3944_v30  ;;  %v4002_v8 = vmul.f32 3.140625, %v3946_v32  ;;  %v1481_v54 = vmul.f32 0.31830987, %v3982_v53 }
 0x316   :  { %v3965_v31 = vpop.f32.mrb[10].mxu1  ;;  %v3975_v27 = vsub.f32 %v1535_v1, %v1549_v25  ;;  %v1576_v12 = vmul.f32 %v3973_v46, %v3973_v46  ;;  %v1745_v56 = vmul.f32 0.5, %v3925_v3  ;;  %5098 = vst [vmem:[#allocation16_spill] sm:$0xff] %v4006_v28  ;;  %v4011_v25 = vpop.eup %2664  ;;  %v1984_v40 = vmul.f32 0.31830987, %v3979_v61 }
 0x317   :  { %5093 = vst [vmem:[#allocation19_spill] sm:$0xff] %v3965_v31  ;;  %v3977_v20 = vpop.f32.mrb[11].mxu1  ;;  %5096 = vst [vmem:[#allocation12_spill] sm:$0xff] %v3999_v43  ;;  %v1494_v1 = vadd.f32 0.5, %v1480_v55  ;;  %v1495_v50 = vadd.f32 0.5, %v1481_v54  ;;  %v1758_v18 = vfloor.f32 %v1744_v4  ;;  %v4015_v32 = vfloor.f32 %v1997_v11 }
 0x318   :  { %5094 = vst [vmem:[#allocation11_spill] sm:$0xff] %v3977_v20  ;;  %v3994_v60 = vmul.f32 %v3975_v27, %v3975_v27  ;;  %5097 = vst [vmem:[#allocation22_spill] sm:$0xff] %v4002_v8  ;;  %v1590_v36 = vmul.f32 -2.5052108e-08, %v1576_v12  ;;  %v1985_v29 = vmul.f32 0.31830987, %v3984_v2  ;;  %v1759_v9 = vfloor.f32 %v1745_v56 }
 0x319   :  { %v4017_v38 = vfloor.f32 %v1494_v1  ;;  %v4023_v52 = vfloor.f32 %v1495_v50  ;;  %v1772_v55 = vmul.f32 2.0, %v1758_v18  ;;  %v4033_v50 = vmul.f32 3.140625, %v4015_v32 }
 0x31a   :  { %v1591_v58 = vmul.f32 -2.5052108e-08, %v3994_v60  ;;  %v1604_v28 = vadd.f32 2.7557319e-06, %v1590_v36  ;;  %v1998_v36 = vadd.f32 0.5, %v1984_v40  ;;  %v1999_v16 = vadd.f32 0.5, %v1985_v29 }
 0x31b   :  { %v1522_v4 = vmul.f32 3.140625, %v4017_v38  ;;  %2666 = vtanh.f32 %v3937_v7  ;;  %v1773_v54 = vmul.f32 2.0, %v1759_v9  ;;  %v4041_v18 = vadd.f32 %v3910_v26, %v3871_v35 }
 0x31c   :  { %v1605_v30 = vadd.f32 2.7557319e-06, %v1591_v58  ;;  %v1618_v11 = vmul.f32 %v1604_v28, %v1576_v12  ;;  %v1523_v58 = vmul.f32 3.140625, %v4023_v52  ;;  %v4045_v29 = vadd.f32 %v3914_v42, %v3871_v35 }
 0x31d   :  { %v1536_v28 = vsub.f32 %v3971_v5, %v1522_v4  ;;  %v1786_v5 = vsub.f32 %v3916_v21, %v1772_v55  ;;  %v1550_v26 = vmul.f32 0.0009676536, %v4017_v38  ;;  %v1930_v35 = vmul.f32 %v1910_v59, %v4041_v18 }
 0x31e   :  { %v1619_v1 = vmul.f32 %v1605_v30, %v3994_v60  ;;  %v1632_v56 = vadd.f32 -0.0001984127, %v1618_v11  ;;  %v1702_v30 = vmul.f32 %v1576_v12, %v3973_v46  ;;  %v4047_v11 = vfloor.f32 %v1998_v36  ;;  %v1952_v36 = vpop.permute.xlu0 %1951 }
 0x31f   :  { %v1537_v7 = vsub.f32 %v3982_v53, %v1523_v58  ;;  %v1427_v42 = vmul.f32 %v3881_v6, %v4045_v29  ;;  %v1931_v53 = vmul.f32 %v1910_v59, %v4045_v29  ;;  %v4067_v58 = vsub.f32 %v1536_v28, %v1550_v26 }
 0x320   :  { %v1633_v63 = vadd.f32 -0.0001984127, %v1619_v1  ;;  %v1646_v40 = vmul.f32 %v1632_v56, %v1576_v12  ;;  %5099 = vst [vmem:[#allocation24_spill] sm:$0xff] %v4047_v11  ;;  %v4050_v1 = vfloor.f32 %v1999_v16  ;;  %v4056_v56 = vpop.permute.xlu1 %1913  ;;  %v1551_v16 = vmul.f32 0.0009676536, %v4023_v52 }
 0x321   :  { %v4072_v19 = vadd.f32 %v3889_v22, %v1427_v42  ;;  %v4074_v8 = vadd.f32 %v1952_v36, %v1931_v53  ;;  %v4084_v28 = vmul.f32 3.140625, %v4047_v11  ;;  %2668 = vtanh.f32 %v3940_v0 }
 0x322   :  { %v1647_v45 = vmul.f32 %v1633_v63, %v3994_v60  ;;  %v1660_v9 = vadd.f32 0.008333334, %v1646_v40  ;;  %v1426_v63 = vmul.f32 %v3881_v6, %v4041_v18  ;;  %v4069_v40 = vadd.f32 %v1952_v36, %v1930_v35 }
 0x323   :  { %v4076_v6 = vsub.f32 %v1537_v7, %v1551_v16  ;;  %v1703_v7 = vmul.f32 %v3994_v60, %v3975_v27  ;;  %v1483_v26 = vmul.f32 0.31830987, %v4072_v19  ;;  %2670 = vtanh.f32 %v4041_v18 }
 0x324   :  { %v1661_v4 = vadd.f32 0.008333334, %v1647_v45  ;;  %v1674_v21 = vmul.f32 %v1660_v9, %v1576_v12  ;;  %v4065_v55 = vadd.f32 %v3889_v22, %v1426_v63  ;;  %v1787_v12 = vsub.f32 %v3925_v3, %v1773_v54  ;;  %v4097_v42 = vpop.permute.xlu1 %1917 }
 0x325   :  { %v4081_v9 = vmul.f32 %v4067_v58, %v4067_v58  ;;  %v1986_v22 = vmul.f32 0.31830987, %v4069_v40  ;;  %v1579_v63 = vmul.f32 %v4076_v6, %v4076_v6  ;;  %v1987_v3 = vmul.f32 0.31830987, %v4074_v8  ;;  %v4095_v35 = vpop.eup %2666 }
 0x326   :  { %v1675_v45 = vmul.f32 %v1661_v4, %v3994_v60  ;;  %v1688_v59 = vadd.f32 -0.16666667, %v1674_v21  ;;  %v1482_v4 = vmul.f32 0.31830987, %v4065_v55  ;;  %5100 = vst [vmem:[#allocation18_spill] sm:$0xff] %v4095_v35  ;;  %v4103_v21 = vmul.f32 3.140625, %v4050_v1 }
 0x327   :  { %v1592_v54 = vmul.f32 -2.5052108e-08, %v4081_v9  ;;  %v1593_v36 = vmul.f32 -2.5052108e-08, %v1579_v63  ;;  %v1801_v14 = vmul.f32 2.0, %v1787_v12  ;;  %v2000_v31 = vadd.f32 0.5, %v1986_v22 }
 0x328   :  { %v1689_v49 = vadd.f32 -0.16666667, %v1675_v45  ;;  %v1716_v16 = vmul.f32 %v1702_v30, %v1688_v59  ;;  %v1800_v45 = vmul.f32 2.0, %v1786_v5  ;;  %v1496_v62 = vadd.f32 0.5, %v1482_v4 }
 0x329   :  { %v1606_v11 = vadd.f32 2.7557319e-06, %v1592_v54  ;;  %v1607_v20 = vadd.f32 2.7557319e-06, %v1593_v36  ;;  %v1497_v10 = vadd.f32 0.5, %v1483_v26  ;;  %v2001_v35 = vadd.f32 0.5, %v1987_v3  ;;  %v4114_v54 = vpop.permute.xlu1 %1921 }
 0x32a   :  { %v1717_v60 = vmul.f32 %v1703_v7, %v1689_v49  ;;  %v1730_v0 = vadd.f32 %v1716_v16, %v3973_v46  ;;  %v1746_v59 = vmul.f32 0.5, %v4017_v38  ;;  %v1747_v49 = vmul.f32 0.5, %v4023_v52 }
 0x32b   :  { %v1620_v53 = vmul.f32 %v1606_v11, %v4081_v9  ;;  %v1621_v30 = vmul.f32 %v1607_v20, %v1579_v63  ;;  %v1814_v12 = vsub.f32 1.0, %v1800_v45  ;;  %v1815_v22 = vsub.f32 1.0, %v1801_v14 }
 0x32c   :  { %v1731_v7 = vadd.f32 %v1717_v60, %v3975_v27  ;;  %v4117_v11 = vfloor.f32 %v1496_v62  ;;  %v4119_v20 = vfloor.f32 %v2000_v31  ;;  %v4121_v26 = vfloor.f32 %v1497_v10  ;;  %v4132_v31 = vpop.eup %2668 }
 0x32d   :  { %v1634_v4 = vadd.f32 -0.0001984127, %v1620_v53  ;;  %v1635_v46 = vadd.f32 -0.0001984127, %v1621_v30  ;;  %v4123_v3 = vfloor.f32 %v2001_v35  ;;  %v1828_v36 = vmul.f32 %v1814_v12, %v1730_v0  ;;  %v4134_v10 = vpop.permute.xlu1 %1963 }
 0x32e   :  { %v1760_v60 = vfloor.f32 %v1746_v59  ;;  %v1761_v53 = vfloor.f32 %v1747_v49  ;;  %v1829_v45 = vmul.f32 %v1815_v22, %v1731_v7  ;;  %v1362_v14 = vadd.f32 %v3918_v47, %v3867_v33 }
 0x32f   :  { %v1648_v16 = vmul.f32 %v1634_v4, %v4081_v9  ;;  %v1649_v27 = vmul.f32 %v1635_v46, %v1579_v63  ;;  %v4130_v62 = vadd.f32 %v3921_v51, %v3867_v33  ;;  %v4137_v18 = vmul.f32 3.140625, %v4117_v11  ;;  %v1956_v51 = vpop.permute.xlu0 %1955 }
 0x330   :  { %v1774_v0 = vmul.f32 2.0, %v1760_v60  ;;  %v1775_v30 = vmul.f32 2.0, %v1761_v53  ;;  %v4140_v59 = vmul.f32 3.140625, %v4119_v20  ;;  %v1428_v47 = vmul.f32 %v3877_v39, %v1362_v14 }
 0x331   :  { %v1662_v5 = vadd.f32 0.008333334, %v1648_v16  ;;  %v1663_v35 = vadd.f32 0.008333334, %v1649_v27  ;;  %v1932_v33 = vmul.f32 %v4056_v56, %v1362_v14  ;;  %v1704_v12 = vmul.f32 %v4081_v9, %v4067_v58 }
 0x332   :  { %v1705_v4 = vmul.f32 %v1579_v63, %v4076_v6  ;;  %v1788_v22 = vsub.f32 %v4017_v38, %v1774_v0  ;;  %v4150_v16 = vadd.f32 %v3887_v44, %v1428_v47  ;;  %v1789_v53 = vsub.f32 %v4023_v52, %v1775_v30  ;;  %v4165_v47 = vpop.eup %2670 }
 0x333   :  { %v1676_v49 = vmul.f32 %v1662_v5, %v4081_v9  ;;  %v1677_v7 = vmul.f32 %v1663_v35, %v1579_v63  ;;  %v4152_v27 = vadd.f32 %v1956_v51, %v1932_v33  ;;  %v1429_v5 = vmul.f32 %v3877_v39, %v4130_v62  ;;  %5102 = vst [vmem:[#allocation43_spill] sm:$0xff] %v4165_v47  ;;  %v1846_v33 = vpop.permute.xlu1 %1845 }
 0x334   :  { %v1933_v35 = vmul.f32 %v4056_v56, %v4130_v62  ;;  %v1368_v9 = vadd.f32 %v3933_v17, %v3875_v37  ;;  %v1802_v38 = vmul.f32 2.0, %v1788_v22  ;;  %v1484_v0 = vmul.f32 0.31830987, %v4150_v16 }
 0x335   :  { %v1690_v46 = vadd.f32 -0.16666667, %v1676_v49  ;;  %5101 = vst [vmem:[#allocation37_spill] sm:$0xff] %v4152_v27  ;;  %v1691_v60 = vadd.f32 -0.16666667, %v1677_v7  ;;  %v4163_v49 = vadd.f32 %v3887_v44, %v1429_v5  ;;  %2672 = vtanh.f32 %v4045_v29 }
 0x336   :  { %v4169_v39 = vmul.f32 3.140625, %v4121_v26  ;;  %v1988_v52 = vmul.f32 0.31830987, %v4152_v27  ;;  %v4172_v56 = vadd.f32 %v1956_v51, %v1933_v35  ;;  %v1870_v17 = vmul.f32 %v1846_v33, %v1828_v36 }
 0x337   :  { %v1718_v63 = vmul.f32 %v1704_v12, %v1690_v46  ;;  %v1871_v30 = vmul.f32 %v1846_v33, %v1829_v45  ;;  %v4175_v7 = vmul.f32 3.140625, %v4123_v3  ;;  %v1719_v12 = vmul.f32 %v1705_v4, %v1691_v60 }
 0x338   :  { %5103 = vst [vmem:[#allocation49_spill] sm:$0xff] %v4172_v56  ;;  %v1498_v46 = vadd.f32 0.5, %v1484_v0  ;;  %v1430_v29 = vmul.f32 %v3883_v24, %v1368_v9  ;;  %v1803_v43 = vmul.f32 2.0, %v1789_v53  ;;  %v1816_v51 = vsub.f32 1.0, %v1802_v38  ;;  %v1960_v0 = vpop.permute.xlu0 %1959 }
 0x339   :  { %v1732_v22 = vadd.f32 %v1718_v63, %v4067_v58  ;;  %v1485_v36 = vmul.f32 0.31830987, %v4163_v49  ;;  %v2002_v45 = vadd.f32 0.5, %v1988_v52  ;;  %v1989_v35 = vmul.f32 0.31830987, %v4172_v56 }
 0x33a   :  { %v4186_v4 = vadd.f32 %v3893_v23, %v1430_v29  ;;  %v1934_v60 = vmul.f32 %v4097_v42, %v1368_v9  ;;  %v1733_v53 = vadd.f32 %v1719_v12, %v4076_v6  ;;  %v4196_v38 = vadd.f32 %v3942_v57, %v3875_v37 }
 0x33b   :  { %v4199_v33 = vadd.f32 %v3996_v15, %v1870_v17  ;;  %v1830_v52 = vmul.f32 %v1816_v51, %v1732_v22  ;;  %v4201_v29 = vfloor.f32 %v1498_v46  ;;  %v4206_v58 = vadd.f32 %v4011_v25, %v1871_v30  ;;  %v1850_v15 = vpop.permute.xlu1 %1849 }
 0x33c   :  { %v4203_v5 = vadd.f32 %v1960_v0, %v1934_v60  ;;  %v1817_v44 = vsub.f32 1.0, %v1803_v43  ;;  %2674 = vtanh.f32 %v1362_v14  ;;  %v1499_v63 = vadd.f32 0.5, %v1485_v36 }
 0x33d   :  { %5104 = vst [vmem:[#allocation34_spill] sm:$0xff] %v4199_v33  ;;  %5106 = vst [vmem:[#allocation33_spill] sm:$0xff] %v4206_v58  ;;  %v4208_v47 = vfloor.f32 %v2002_v45  ;;  %2676 = vtanh.f32 %v4130_v62  ;;  %v2003_v37 = vadd.f32 0.5, %v1989_v35  ;;  %v1486_v57 = vmul.f32 0.31830987, %v4186_v4  ;;  %v5121_v58 = vld [vmem:[#allocation7_spill] sm:$0xff] }
 0x33e   :  { %5105 = vst [vmem:[#allocation36_spill] sm:$0xff] %v4203_v5  ;;  %v1831_v6 = vmul.f32 %v1817_v44, %v1733_v53  ;;  %v1990_v17 = vmul.f32 0.31830987, %v4203_v5  ;;  %v1431_v12 = vmul.f32 %v3883_v24, %v4196_v38  ;;  %v1935_v25 = vmul.f32 %v4097_v42, %v4196_v38  ;;  %v5114_v53 = vld [vmem:[#allocation18_spill] sm:$0xff] }
 0x33f   :  { %5107 = vst [vmem:[#allocation39_spill] sm:$0xff] %v4208_v47  ;;  %v4217_v43 = vpop.eup %2672  ;;  %v1872_v14 = vmul.f32 %v1850_v15, %v1830_v52  ;;  %v4220_v30 = vmul.f32 3.140625, %v4201_v29  ;;  %2678 = vtanh.f32 %v1368_v9  ;;  %v2052_v62 = vmul.f32 0.0009676536, %v3931_v41 }
 0x340   :  { %v4223_v22 = vfloor.f32 %v1499_v63  ;;  %v4226_v44 = vadd.f32 %v3893_v23, %v1431_v12  ;;  %v4228_v46 = vadd.f32 %v1960_v0, %v1935_v25  ;;  %v2053_v24 = vmul.f32 0.0009676536, %v4015_v32 }
 0x341   :  { %v4232_v42 = vmul.f32 3.140625, %v4208_v47  ;;  %v4234_v51 = vfloor.f32 %v2003_v37  ;;  %v1500_v36 = vadd.f32 0.5, %v1486_v57  ;;  %v5112_v9 = vsub.f32 %v3901_v34, %v3968_v48 }
 0x342   :  { %5108 = vst [vmem:[#allocation26_spill] sm:$0xff] %v4226_v44  ;;  %5109 = vst [vmem:[#allocation38_spill] sm:$0xff] %v4228_v46  ;;  %v1873_v35 = vmul.f32 %v1850_v15, %v1831_v6  ;;  %v2004_v60 = vadd.f32 0.5, %v1990_v17  ;;  %v5113_v23 = vsub.f32 %v3923_v13, %v4033_v50  ;;  %v2248_v0 = vmul.f32 0.5, %v3931_v41 }
 0x343   :  { %5110 = vst [vmem:[#allocation28_spill] sm:$0xff] %v4232_v42  ;;  %5111 = vst [vmem:[#allocation44_spill] sm:$0xff] %v4234_v51  ;;  %v4239_v45 = vsub.f32 %v5112_v9, %v2052_v62  ;;  %v4248_v52 = vadd.f32 %v5114_v53, %v1872_v14  ;;  %v1487_v37 = vmul.f32 0.31830987, %v4226_v44  ;;  %v2249_v34 = vmul.f32 0.5, %v4015_v32 }
 0x344   :  { %v4244_v63 = vsub.f32 %v5113_v23, %v2053_v24  ;;  %v4259_v13 = vmul.f32 3.140625, %v4223_v22  ;;  %v1991_v50 = vmul.f32 0.31830987, %v4228_v46  ;;  %v4269_v17 = vmul.f32 3.140625, %v4234_v51 }
 0x345   :  { %5115 = vst [vmem:[#allocation29_spill] sm:$0xff] %v4248_v52  ;;  %v4253_v57 = vmul.f32 %v4239_v45, %v4239_v45  ;;  %v4271_v12 = vfloor.f32 %v1500_v36  ;;  %v4277_v62 = vadd.f32 %v4132_v31, %v1873_v35  ;;  %v4279_v24 = vfloor.f32 %v2004_v60  ;;  %v5122_v36 = vld [vmem:[#allocation19_spill] sm:$0xff] }
 0x346   :  { %v4264_v15 = vmul.f32 %v4244_v63, %v4244_v63  ;;  %5116 = vst [vmem:[#allocation31_spill] sm:$0xff] %v4269_v17  ;;  %v4274_v14 = vpop.eup %2674  ;;  %v2262_v23 = vfloor.f32 %v2248_v0  ;;  %v1501_v6 = vadd.f32 0.5, %v1487_v37  ;;  %v2263_v52 = vfloor.f32 %v2249_v34  ;;  %v5124_v35 = vld [vmem:[#allocation11_spill] sm:$0xff] }
 0x347   :  { %v2094_v25 = vmul.f32 -2.5052108e-08, %v4253_v57  ;;  %5117 = vst [vmem:[#allocation47_spill] sm:$0xff] %v4274_v14  ;;  %5118 = vst [vmem:[#allocation57_spill] sm:$0xff] %v4277_v62  ;;  %v4282_v53 = vpop.eup %2676  ;;  %v4286_v33 = vadd.f32 %v5122_v36, %v5121_v58  ;;  %v2005_v27 = vadd.f32 0.5, %v1991_v50  ;;  %v4292_v60 = vadd.f32 %v5124_v35, %v5121_v58  ;;  %v5128_v58 = vld [vmem:[#allocation20_spill] sm:$0xff] }
 0x348   :  { %5119 = vst [vmem:[#allocation35_spill] sm:$0xff] %v4279_v24  ;;  %v2095_v9 = vmul.f32 -2.5052108e-08, %v4264_v15  ;;  %5120 = vst [vmem:[#allocation42_spill] sm:$0xff] %v4282_v53  ;;  %v4299_v37 = vmul.f32 3.140625, %v4271_v12  ;;  %2680 = vtanh.f32 %v4196_v38  ;;  %v4309_v35 = vfloor.f32 %v1501_v6  ;;  %v5148_v14 = vld [vmem:[#allocation10_spill] sm:$0xff] }
 0x349   :  { %v2108_v48 = vadd.f32 2.7557319e-06, %v2094_v25  ;;  %5123 = vst [vmem:[#allocation27_spill] sm:$0xff] %v4286_v33  ;;  %5125 = vst [vmem:[#allocation41_spill] sm:$0xff] %v4292_v60  ;;  %v4294_v62 = vpop.eup %2678  ;;  %v4304_v25 = vmul.f32 3.140625, %v4279_v24  ;;  %v1432_v36 = vmul.f32 %v5128_v58, %v4286_v33  ;;  %v2277_v0 = vmul.f32 2.0, %v2263_v52 }
 0x34a   :  { %v2109_v31 = vadd.f32 2.7557319e-06, %v2095_v9  ;;  %5126 = vst [vmem:[#allocation30_spill] sm:$0xff] %v4294_v62  ;;  %v2276_v9 = vmul.f32 2.0, %v2262_v23  ;;  %v1936_v62 = vmul.f32 %v4114_v54, %v4286_v33  ;;  %v4313_v17 = vfloor.f32 %v2005_v27 }
 0x34b   :  { %v2122_v34 = vmul.f32 %v2108_v48, %v4253_v57  ;;  %5127 = vst [vmem:[#allocation46_spill] sm:$0xff] %v4304_v25  ;;  %v5130_v48 = vld [vmem:[#allocation13_spill] sm:$0xff]  ;;  %v1937_v52 = vmul.f32 %v4114_v54, %v4292_v60  ;;  %v1552_v6 = vmul.f32 0.0009676536, %v4117_v11  ;;  %v5133_v33 = vsub.f32 %v4065_v55, %v4137_v18 }
 0x34c   :  { %v2123_v50 = vmul.f32 %v2109_v31, %v4264_v15  ;;  %5129 = vst [vmem:[#allocation52_spill] sm:$0xff] %v4313_v17  ;;  %v4316_v56 = vadd.f32 %v5130_v48, %v1432_v36  ;;  %v1433_v31 = vmul.f32 %v5128_v58, %v4292_v60  ;;  %v4322_v51 = vadd.f32 %v4134_v10, %v1936_v62 }
 0x34d   :  { %v2136_v42 = vadd.f32 -0.0001984127, %v2122_v34  ;;  %v1553_v36 = vmul.f32 0.0009676536, %v4121_v26  ;;  %v4338_v54 = vsub.f32 %v5133_v33, %v1552_v6  ;;  %v4342_v47 = vadd.f32 %v4134_v10, %v1937_v52 }
 0x34e   :  { %v2137_v38 = vadd.f32 -0.0001984127, %v2123_v50  ;;  %5131 = vst [vmem:[#allocation54_spill] sm:$0xff] %v4322_v51  ;;  %v1488_v34 = vmul.f32 0.31830987, %v4316_v56  ;;  %v4330_v50 = vadd.f32 %v5130_v48, %v1433_v31  ;;  %v5135_v48 = vsub.f32 %v4072_v19, %v4169_v39 }
 0x34f   :  { %v2150_v23 = vmul.f32 %v2136_v42, %v4253_v57  ;;  %v2290_v42 = vsub.f32 %v3931_v41, %v2276_v9  ;;  %v1992_v62 = vmul.f32 0.31830987, %v4322_v51  ;;  %5134 = vst [vmem:[#allocation50_spill] sm:$0xff] %v4342_v47  ;;  %v4353_v55 = vmul.f32 %v4338_v54, %v4338_v54 }
 0x350   :  { %v2151_v27 = vmul.f32 %v2137_v38, %v4264_v15  ;;  %5132 = vst [vmem:[#allocation45_spill] sm:$0xff] %v4330_v50  ;;  %v2291_v38 = vsub.f32 %v4015_v32, %v2277_v0  ;;  %v4347_v31 = vsub.f32 %v5135_v48, %v1553_v36  ;;  %v1502_v9 = vadd.f32 0.5, %v1488_v34 }
 0x351   :  { %v2164_v58 = vadd.f32 0.008333334, %v2150_v23  ;;  %v1489_v23 = vmul.f32 0.31830987, %v4330_v50  ;;  %v4367_v33 = vmul.f32 3.140625, %v4309_v35  ;;  %v4370_v0 = vmul.f32 3.140625, %v4313_v17 }
 0x352   :  { %v2165_v60 = vadd.f32 0.008333334, %v2151_v27  ;;  %v4362_v19 = vmul.f32 %v4347_v31, %v4347_v31  ;;  %v4364_v39 = vpop.eup %2680  ;;  %v2006_v52 = vadd.f32 0.5, %v1992_v62  ;;  %v1594_v6 = vmul.f32 -2.5052108e-08, %v4353_v55 }
 0x353   :  { %v2178_v41 = vmul.f32 %v2164_v58, %v4253_v57  ;;  %5136 = vst [vmem:[#allocation32_spill] sm:$0xff] %v4364_v39  ;;  %5137 = vst [vmem:[#allocation53_spill] sm:$0xff] %v4367_v33  ;;  %v2304_v27 = vmul.f32 2.0, %v2290_v42  ;;  %v2305_v34 = vmul.f32 2.0, %v2291_v38  ;;  %v1993_v36 = vmul.f32 0.31830987, %v4342_v47 }
 0x354   :  { %v2179_v18 = vmul.f32 %v2165_v60, %v4264_v15  ;;  %5138 = vst [vmem:[#allocation48_spill] sm:$0xff] %v4370_v0  ;;  %v1595_v60 = vmul.f32 -2.5052108e-08, %v4362_v19  ;;  %v4375_v48 = vfloor.f32 %v1502_v9  ;;  %v1503_v10 = vadd.f32 0.5, %v1489_v23  ;;  %v5146_v0 = vld [vmem:[#allocation25_spill] sm:$0xff] }
 0x355   :  { %v2192_v58 = vadd.f32 -0.16666667, %v2178_v41  ;;  %v1608_v32 = vadd.f32 2.7557319e-06, %v1594_v6  ;;  %v2206_v25 = vmul.f32 %v4253_v57, %v4239_v45  ;;  %v2207_v62 = vmul.f32 %v4264_v15, %v4244_v63 }
 0x356   :  { %5139 = vst [vmem:[#allocation51_spill] sm:$0xff] %v4375_v48  ;;  %v2193_v39 = vadd.f32 -0.16666667, %v2179_v18  ;;  %v1609_v5 = vadd.f32 2.7557319e-06, %v1595_v60  ;;  %v4385_v17 = vfloor.f32 %v2006_v52  ;;  %v2318_v9 = vsub.f32 1.0, %v2304_v27 }
 0x357   :  { %v1622_v41 = vmul.f32 %v1608_v32, %v4353_v55  ;;  %v2319_v23 = vsub.f32 1.0, %v2305_v34  ;;  %v2007_v18 = vadd.f32 0.5, %v1993_v36  ;;  %v2220_v57 = vmul.f32 %v2206_v25, %v2192_v58  ;;  %v5142_v34 = vld [vmem:[#allocation9_spill] sm:$0xff]  ;;  %v5143_v25 = vld [vmem:[#allocation14_spill] sm:$0xff] }
 0x358   :  { %5140 = vst [vmem:[#allocation40_spill] sm:$0xff] %v4385_v17  ;;  %v1623_v6 = vmul.f32 %v1609_v5, %v4362_v19  ;;  %v4390_v24 = vmul.f32 3.140625, %v4375_v48  ;;  %v4392_v15 = vfloor.f32 %v1503_v10  ;;  %v2221_v42 = vmul.f32 %v2207_v62, %v2193_v39  ;;  %v5145_v48 = vld [vmem:[#allocation15_spill] sm:$0xff] }
 0x359   :  { %v1636_v60 = vadd.f32 -0.0001984127, %v1622_v41  ;;  %v1748_v38 = vmul.f32 0.5, %v4117_v11  ;;  %v1749_v52 = vmul.f32 0.5, %v4121_v26  ;;  %v4397_v32 = vmul.f32 3.140625, %v4385_v17 }
 0x35a   :  { %v1637_v53 = vadd.f32 -0.0001984127, %v1623_v6  ;;  %v1546_v5 = vmul.f32 0.0009676536, %v5142_v34  ;;  %v1547_v36 = vmul.f32 0.0009676536, %v5143_v25  ;;  %v4402_v58 = vfloor.f32 %v2007_v18 }
 0x35b   :  { %5141 = vst [vmem:[#allocation55_spill] sm:$0xff] %v4397_v32  ;;  %v1650_v27 = vmul.f32 %v1636_v60, %v4353_v55  ;;  %v1762_v41 = vfloor.f32 %v1748_v38  ;;  %v1763_v39 = vfloor.f32 %v1749_v52  ;;  %v2234_v62 = vadd.f32 %v2220_v57, %v4239_v45  ;;  %v5149_v60 = vld [vmem:[#allocation12_spill] sm:$0xff] }
 0x35c   :  { %5144 = vst [vmem:[#allocation56_spill] sm:$0xff] %v4402_v58  ;;  %v1651_v10 = vmul.f32 %v1637_v53, %v4362_v19  ;;  %v5147_v46 = vsub.f32 %v5145_v48, %v5146_v0  ;;  %v5150_v33 = vsub.f32 %v5148_v14, %v5149_v60  ;;  %v2235_v18 = vadd.f32 %v2221_v42, %v4244_v63 }
 0x35d   :  { %v1664_v6 = vadd.f32 0.008333334, %v1650_v27  ;;  %v4420_v38 = vmul.f32 3.140625, %v4392_v15  ;;  %v1742_v14 = vmul.f32 0.5, %v5142_v34  ;;  %v1776_v48 = vmul.f32 2.0, %v1762_v41 }
 0x35e   :  { %v4409_v17 = vsub.f32 %v5147_v46, %v1546_v5  ;;  %v4414_v44 = vsub.f32 %v5150_v33, %v1547_v36  ;;  %v1665_v45 = vadd.f32 0.008333334, %v1651_v10  ;;  %v4433_v33 = vmul.f32 3.140625, %v4402_v58 }
 0x35f   :  { %5151 = vst [vmem:[#allocation58_spill] sm:$0xff] %v4420_v38  ;;  %v1678_v57 = vmul.f32 %v1664_v6, %v4353_v55  ;;  %v1777_v42 = vmul.f32 2.0, %v1763_v39  ;;  %v2332_v52 = vmul.f32 %v2318_v9, %v2234_v62  ;;  %v1706_v60 = vmul.f32 %v4353_v55, %v4338_v54  ;;  %v2350_v39 = vpop.permute.xlu1 %2349  ;;  %v5161_v38 = vld [vmem:[#allocation22_spill] sm:$0xff] }
 0x360   :  { %v1574_v46 = vmul.f32 %v4409_v17, %v4409_v17  ;;  %v4427_v0 = vmul.f32 %v4414_v44, %v4414_v44  ;;  %5152 = vst [vmem:[#allocation18_spill] sm:$0xff] %v4433_v33  ;;  %v1679_v27 = vmul.f32 %v1665_v45, %v4362_v19  ;;  %v1743_v63 = vmul.f32 0.5, %v5143_v25 }
 0x361   :  { %v1692_v6 = vadd.f32 -0.16666667, %v1678_v57  ;;  %v2333_v53 = vmul.f32 %v2319_v23, %v2235_v18  ;;  %v1756_v41 = vfloor.f32 %v1742_v14  ;;  %v1707_v62 = vmul.f32 %v4362_v19, %v4347_v31 }
 0x362   :  { %v1588_v5 = vmul.f32 -2.5052108e-08, %v1574_v46  ;;  %v1589_v36 = vmul.f32 -2.5052108e-08, %v4427_v0  ;;  %v1790_v45 = vsub.f32 %v4117_v11, %v1776_v48  ;;  %v1791_v57 = vsub.f32 %v4121_v26, %v1777_v42 }
 0x363   :  { %v4448_v10 = vmul.f32 %v2350_v39, %v2332_v52  ;;  %v1693_v55 = vadd.f32 -0.16666667, %v1679_v27  ;;  %v1720_v18 = vmul.f32 %v1706_v60, %v1692_v6  ;;  %v1554_v14 = vmul.f32 0.0009676536, %v4201_v29 }
 0x364   :  { %v1602_v32 = vadd.f32 2.7557319e-06, %v1588_v5  ;;  %v1603_v51 = vadd.f32 2.7557319e-06, %v1589_v36  ;;  %v1757_v5 = vfloor.f32 %v1743_v63  ;;  %v1555_v36 = vmul.f32 0.0009676536, %v4223_v22 }
 0x365   :  { %v4453_v9 = vmul.f32 %v2350_v39, %v2333_v53  ;;  %v1770_v47 = vmul.f32 2.0, %v1756_v41  ;;  %v1804_v11 = vmul.f32 2.0, %v1790_v45  ;;  %v1805_v48 = vmul.f32 2.0, %v1791_v57 }
 0x366   :  { %v1616_v58 = vmul.f32 %v1602_v32, %v1574_v46  ;;  %v1617_v23 = vmul.f32 %v1603_v51, %v4427_v0  ;;  %v5153_v26 = vsub.f32 %v4150_v16, %v4220_v30  ;;  %v5154_v51 = vsub.f32 %v4163_v49, %v4259_v13 }
 0x367   :  { %v1721_v63 = vmul.f32 %v1707_v62, %v1693_v55  ;;  %v1734_v27 = vadd.f32 %v1720_v18, %v4338_v54  ;;  %v1771_v6 = vmul.f32 2.0, %v1757_v5  ;;  %v1784_v49 = vsub.f32 %v5142_v34, %v1770_v47 }
 0x368   :  { %v1630_v33 = vadd.f32 -0.0001984127, %v1616_v58  ;;  %v1631_v19 = vadd.f32 -0.0001984127, %v1617_v23  ;;  %v4458_v42 = vsub.f32 %v5153_v26, %v1554_v14  ;;  %v4463_v32 = vsub.f32 %v5154_v51, %v1555_v36  ;;  %v5155_v36 = vld [vmem:[#allocation6_spill] sm:$0xff] }
 0x369   :  { %v1700_v58 = vmul.f32 %v1574_v46, %v4409_v17  ;;  %v1750_v13 = vmul.f32 0.5, %v4201_v29  ;;  %v1819_v39 = vsub.f32 1.0, %v1805_v48  ;;  %v1735_v57 = vadd.f32 %v1721_v63, %v4347_v31  ;;  %v5157_v31 = vld [vmem:[#allocation8_spill] sm:$0xff] }
 0x36a   :  { %v1644_v52 = vmul.f32 %v1630_v33, %v1574_v46  ;;  %v1645_v53 = vmul.f32 %v1631_v19, %v4427_v0  ;;  %v1582_v60 = vmul.f32 %v4458_v42, %v4458_v42  ;;  %v1583_v16 = vmul.f32 %v4463_v32, %v4463_v32 }
 0x36b   :  { %v1818_v33 = vsub.f32 1.0, %v1804_v11  ;;  %v1751_v23 = vmul.f32 0.5, %v4223_v22  ;;  %v1764_v14 = vfloor.f32 %v1750_v13  ;;  %v2050_v19 = vmul.f32 0.0009676536, %v5155_v36  ;;  %v5156_v11 = vld [vmem:[#allocation23_spill] sm:$0xff]  ;;  %v5160_v13 = vld [vmem:[#allocation5_spill] sm:$0xff] }
 0x36c   :  { %v1658_v30 = vadd.f32 0.008333334, %v1644_v52  ;;  %v1659_v41 = vadd.f32 0.008333334, %v1645_v53  ;;  %v1596_v62 = vmul.f32 -2.5052108e-08, %v1582_v60  ;;  %v1785_v47 = vsub.f32 %v5143_v25, %v1771_v6  ;;  %v1854_v25 = vpop.permute.xlu1 %1853 }
 0x36d   :  { %v1597_v45 = vmul.f32 -2.5052108e-08, %v1583_v16  ;;  %v1832_v26 = vmul.f32 %v1818_v33, %v1734_v27  ;;  %v1798_v34 = vmul.f32 2.0, %v1784_v49  ;;  %v2051_v48 = vmul.f32 0.0009676536, %v5156_v11 }
 0x36e   :  { %v1672_v54 = vmul.f32 %v1658_v30, %v1574_v46  ;;  %v1673_v55 = vmul.f32 %v1659_v41, %v4427_v0  ;;  %v1610_v18 = vadd.f32 2.7557319e-06, %v1596_v62  ;;  %v5158_v46 = vld [vmem:[#allocation17_spill] sm:$0xff]  ;;  %v1833_v41 = vmul.f32 %v1819_v39, %v1735_v57 }
 0x36f   :  { %v1611_v5 = vadd.f32 2.7557319e-06, %v1597_v45  ;;  %v5159_v63 = vsub.f32 %v5157_v31, %v5158_v46  ;;  %v1765_v45 = vfloor.f32 %v1751_v23  ;;  %v5162_v50 = vsub.f32 %v5160_v13, %v5161_v38 }
 0x370   :  { %v1686_v51 = vadd.f32 -0.16666667, %v1672_v54  ;;  %v1624_v52 = vmul.f32 %v1610_v18, %v1582_v60  ;;  %v1687_v62 = vadd.f32 -0.16666667, %v1673_v55  ;;  %v1778_v33 = vmul.f32 2.0, %v1764_v14 }
 0x371   :  { %v1625_v53 = vmul.f32 %v1611_v5, %v1583_v16  ;;  %v4483_v30 = vsub.f32 %v5159_v63, %v2050_v19  ;;  %v4488_v27 = vsub.f32 %v5162_v50, %v2051_v48  ;;  %v4494_v18 = vmul.f32 %v1854_v25, %v1832_v26 }
 0x372   :  { %v1638_v6 = vadd.f32 -0.0001984127, %v1624_v52  ;;  %v1701_v39 = vmul.f32 %v4427_v0, %v4414_v44  ;;  %v1799_v57 = vmul.f32 2.0, %v1785_v47  ;;  %v1714_v50 = vmul.f32 %v1700_v58, %v1686_v51 }
 0x373   :  { %v1639_v49 = vadd.f32 -0.0001984127, %v1625_v53  ;;  %v4492_v54 = vmul.f32 %v4483_v30, %v4483_v30  ;;  %v4500_v55 = vmul.f32 %v4488_v27, %v4488_v27  ;;  %v1812_v19 = vsub.f32 1.0, %v1798_v34 }
 0x374   :  { %v1652_v38 = vmul.f32 %v1638_v6, %v1582_v60  ;;  %v1715_v14 = vmul.f32 %v1701_v39, %v1687_v62  ;;  %v1779_v48 = vmul.f32 2.0, %v1765_v45  ;;  %v4504_v26 = vmul.f32 %v1854_v25, %v1833_v41 }
 0x375   :  { %v1653_v23 = vmul.f32 %v1639_v49, %v1583_v16  ;;  %v2092_v5 = vmul.f32 -2.5052108e-08, %v4492_v54  ;;  %v2093_v52 = vmul.f32 -2.5052108e-08, %v4500_v55  ;;  %v1792_v0 = vsub.f32 %v4201_v29, %v1778_v33 }
 0x376   :  { %v1666_v53 = vadd.f32 0.008333334, %v1652_v38  ;;  %v1813_v47 = vsub.f32 1.0, %v1799_v57  ;;  %v1708_v46 = vmul.f32 %v1582_v60, %v4458_v42  ;;  %v1709_v58 = vmul.f32 %v1583_v16, %v4463_v32 }
 0x377   :  { %v1667_v31 = vadd.f32 0.008333334, %v1653_v23  ;;  %v2106_v51 = vadd.f32 2.7557319e-06, %v2092_v5  ;;  %v1728_v63 = vadd.f32 %v1714_v50, %v4409_v17  ;;  %v2107_v34 = vadd.f32 2.7557319e-06, %v2093_v52 }
 0x378   :  { %v1680_v13 = vmul.f32 %v1666_v53, %v1582_v60  ;;  %v1729_v45 = vadd.f32 %v1715_v14, %v4414_v44  ;;  %v1793_v41 = vsub.f32 %v4223_v22, %v1779_v48  ;;  %v2246_v6 = vmul.f32 0.5, %v5155_v36  ;;  %v5163_v17 = vld [vmem:[#allocation24_spill] sm:$0xff] }
 0x379   :  { %v1681_v62 = vmul.f32 %v1667_v31, %v1583_v16  ;;  %v2120_v25 = vmul.f32 %v2106_v51, %v4492_v54  ;;  %v1806_v49 = vmul.f32 2.0, %v1792_v0  ;;  %v2121_v33 = vmul.f32 %v2107_v34, %v4500_v55 }
 0x37a   :  { %v1694_v29 = vadd.f32 -0.16666667, %v1680_v13  ;;  %v2247_v39 = vmul.f32 0.5, %v5156_v11  ;;  %v2260_v38 = vfloor.f32 %v2246_v6  ;;  %v2054_v60 = vmul.f32 0.0009676536, %v5163_v17 }
 0x37b   :  { %v2134_v57 = vadd.f32 -0.0001984127, %v2120_v25  ;;  %v2055_v16 = vmul.f32 0.0009676536, %v4050_v1  ;;  %v1826_v50 = vmul.f32 %v1812_v19, %v1728_v63  ;;  %v1695_v44 = vadd.f32 -0.16666667, %v1681_v62 }
 0x37c   :  { %v2135_v23 = vadd.f32 -0.0001984127, %v2121_v33  ;;  %v2261_v22 = vfloor.f32 %v2247_v39  ;;  %v2274_v14 = vmul.f32 2.0, %v2260_v38  ;;  %v5164_v48 = vsub.f32 %v3979_v61, %v4084_v28 }
 0x37d   :  { %v2148_v5 = vmul.f32 %v2134_v57, %v4492_v54  ;;  %v5165_v53 = vsub.f32 %v3984_v2, %v4103_v21  ;;  %v1827_v0 = vmul.f32 %v1813_v47, %v1729_v45  ;;  %v1807_v51 = vmul.f32 2.0, %v1793_v41  ;;  %v1842_v47 = vpop.permute.xlu0 %1841 }
 0x37e   :  { %v4522_v52 = vsub.f32 %v5164_v48, %v2054_v60  ;;  %v2149_v19 = vmul.f32 %v2135_v23, %v4500_v55  ;;  %v2275_v63 = vmul.f32 2.0, %v2261_v22  ;;  %v1722_v13 = vmul.f32 %v1708_v46, %v1694_v29 }
 0x37f   :  { %v4527_v31 = vsub.f32 %v5165_v53, %v2055_v16  ;;  %v2162_v62 = vadd.f32 0.008333334, %v2148_v5  ;;  %v1723_v28 = vmul.f32 %v1709_v58, %v1695_v44  ;;  %v1820_v25 = vsub.f32 1.0, %v1806_v49 }
 0x380   :  { %v4532_v34 = vmul.f32 %v4522_v52, %v4522_v52  ;;  %v2163_v2 = vadd.f32 0.008333334, %v2149_v19  ;;  %v2288_v21 = vsub.f32 %v5155_v36, %v2274_v14  ;;  %v2289_v41 = vsub.f32 %v5156_v11, %v2275_v63 }
 0x381   :  { %v4536_v61 = vmul.f32 %v4527_v31, %v4527_v31  ;;  %v2176_v45 = vmul.f32 %v2162_v62, %v4492_v54  ;;  %v1868_v29 = vmul.f32 %v1842_v47, %v1826_v50  ;;  %v1869_v33 = vmul.f32 %v1842_v47, %v1827_v0 }
 0x382   :  { %v2096_v46 = vmul.f32 -2.5052108e-08, %v4532_v34  ;;  %v2177_v39 = vmul.f32 %v2163_v2, %v4500_v55  ;;  %v2204_v58 = vmul.f32 %v4492_v54, %v4483_v30  ;;  %v1736_v49 = vadd.f32 %v1722_v13, %v4458_v42 }
 0x383   :  { %v2097_v6 = vmul.f32 -2.5052108e-08, %v4536_v61  ;;  %v1821_v57 = vsub.f32 1.0, %v1807_v51  ;;  %v2190_v36 = vadd.f32 -0.16666667, %v2176_v45  ;;  %v1737_v60 = vadd.f32 %v1723_v28, %v4463_v32 }
 0x384   :  { %v2110_v38 = vadd.f32 2.7557319e-06, %v2096_v46  ;;  %v2191_v16 = vadd.f32 -0.16666667, %v2177_v39  ;;  %v2205_v11 = vmul.f32 %v4500_v55, %v4488_v27  ;;  %v2302_v44 = vmul.f32 2.0, %v2288_v21  ;;  %v5168_v39 = vld [vmem:[#allocation43_spill] sm:$0xff] }
 0x385   :  { %v2218_v23 = vmul.f32 %v2204_v58, %v2190_v36  ;;  %v2303_v50 = vmul.f32 2.0, %v2289_v41  ;;  %v2111_v22 = vadd.f32 2.7557319e-06, %v2097_v6  ;;  %v2250_v54 = vmul.f32 0.5, %v5163_v17 }
 0x386   :  { %v2124_v5 = vmul.f32 %v2110_v38, %v4532_v34  ;;  %v2219_v14 = vmul.f32 %v2205_v11, %v2191_v16  ;;  %v2251_v42 = vmul.f32 0.5, %v4050_v1  ;;  %v2056_v48 = vmul.f32 0.0009676536, %v4119_v20  ;;  %v5169_v16 = vld [vmem:[#allocation21_spill] sm:$0xff] }
 0x387   :  { %v1834_v53 = vmul.f32 %v1820_v25, %v1736_v49  ;;  %v2125_v32 = vmul.f32 %v2111_v22, %v4536_v61  ;;  %v2057_v51 = vmul.f32 0.0009676536, %v4123_v3  ;;  %v2232_v55 = vadd.f32 %v2218_v23, %v4483_v30 }
 0x388   :  { %v2138_v0 = vadd.f32 -0.0001984127, %v2124_v5  ;;  %v2233_v19 = vadd.f32 %v2219_v14, %v4488_v27  ;;  %v2264_v63 = vfloor.f32 %v2250_v54  ;;  %v5166_v13 = vsub.f32 %v4069_v40, %v4140_v59  ;;  %v2346_v54 = vpop.permute.xlu0 %2345 }
 0x389   :  { %v2139_v28 = vadd.f32 -0.0001984127, %v2125_v32  ;;  %v2265_v21 = vfloor.f32 %v2251_v42  ;;  %v5167_v25 = vsub.f32 %v4074_v8, %v4175_v7  ;;  %v1835_v45 = vmul.f32 %v1821_v57, %v1737_v60 }
 0x38a   :  { %v4561_v62 = vsub.f32 %v5166_v13, %v2056_v48  ;;  %v2152_v2 = vmul.f32 %v2138_v0, %v4532_v34  ;;  %v2316_v41 = vsub.f32 1.0, %v2302_v44  ;;  %v2317_v30 = vsub.f32 1.0, %v2303_v50  ;;  %v5170_v44 = vld [vmem:[#allocation16_spill] sm:$0xff]  ;;  %v1858_v50 = vpop.permute.xlu1 %1857 }
 0x38b   :  { %v4567_v47 = vsub.f32 %v5167_v25, %v2057_v51  ;;  %v2153_v40 = vmul.f32 %v2139_v28, %v4536_v61  ;;  %v2278_v46 = vmul.f32 2.0, %v2264_v63  ;;  %v4580_v8 = vadd.f32 %v5168_v39, %v4494_v18 }
 0x38c   :  { %v4571_v27 = vmul.f32 %v4561_v62, %v4561_v62  ;;  %v2166_v59 = vadd.f32 0.008333334, %v2152_v2  ;;  %v4584_v7 = vadd.f32 %v4217_v43, %v4504_v26  ;;  %v2330_v58 = vmul.f32 %v2316_v41, %v2232_v55 }
 0x38d   :  { %v4576_v6 = vmul.f32 %v4567_v47, %v4567_v47  ;;  %v2331_v57 = vmul.f32 %v2317_v30, %v2233_v19  ;;  %v2167_v36 = vadd.f32 0.008333334, %v2153_v40  ;;  %v2279_v38 = vmul.f32 2.0, %v2265_v21 }
 0x38e   :  { %v2098_v49 = vmul.f32 -2.5052108e-08, %v4571_v27  ;;  %v1882_v11 = vadd.f32 %v5169_v16, %v1868_v29  ;;  %v1883_v23 = vadd.f32 %v5170_v44, %v1869_v33  ;;  %v2180_v18 = vmul.f32 %v2166_v59, %v4532_v34 }
 0x38f   :  { %v2099_v60 = vmul.f32 -2.5052108e-08, %v4576_v6  ;;  %v1876_v5 = vmul.f32 %v1858_v50, %v1834_v53  ;;  %v1877_v14 = vmul.f32 %v1858_v50, %v1835_v45  ;;  %v2292_v43 = vsub.f32 %v5163_v17, %v2278_v46 }
 0x390   :  { %v2112_v22 = vadd.f32 2.7557319e-06, %v2098_v49  ;;  %v2181_v42 = vmul.f32 %v2167_v36, %v4536_v61  ;;  %v2208_v48 = vmul.f32 %v4532_v34, %v4522_v52  ;;  %v2209_v29 = vmul.f32 %v4536_v61, %v4527_v31  ;;  %v5172_v49 = vld [vmem:[#allocation26_spill] sm:$0xff] }
 0x391   :  { %v2113_v26 = vadd.f32 2.7557319e-06, %v2099_v60  ;;  %v2372_v32 = vmul.f32 %v2346_v54, %v2330_v58  ;;  %v2373_v0 = vmul.f32 %v2346_v54, %v2331_v57  ;;  %v2293_v51 = vsub.f32 %v4050_v1, %v2279_v38  ;;  %v5173_v57 = vld [vmem:[#allocation53_spill] sm:$0xff]  ;;  %v5175_v60 = vld [vmem:[#allocation47_spill] sm:$0xff] }
 0x392   :  { %v2126_v33 = vmul.f32 %v2112_v22, %v4571_v27  ;;  %v2194_v55 = vadd.f32 -0.16666667, %v2180_v18  ;;  %v2252_v19 = vmul.f32 0.5, %v4119_v20  ;;  %v2253_v63 = vmul.f32 0.5, %v4123_v3 }
 0x393   :  { %v2127_v53 = vmul.f32 %v2113_v26, %v4576_v6  ;;  %v2306_v13 = vmul.f32 2.0, %v2292_v43  ;;  %v2386_v28 = vadd.f32 %v2372_v32, %v1882_v11  ;;  %v1556_v2 = vmul.f32 0.0009676536, %v4271_v12  ;;  %v2402_v11 = vpop.permute.xlu1 %2401 }
 0x394   :  { %v2140_v17 = vadd.f32 -0.0001984127, %v2126_v33  ;;  %v2195_v61 = vadd.f32 -0.16666667, %v2181_v42  ;;  %v2266_v25 = vfloor.f32 %v2252_v19  ;;  %v1557_v45 = vmul.f32 0.0009676536, %v4309_v35 }
 0x395   :  { %v2141_v34 = vadd.f32 -0.0001984127, %v2127_v53  ;;  %v2307_v1 = vmul.f32 2.0, %v2293_v51  ;;  %v2267_v30 = vfloor.f32 %v2253_v63  ;;  %v5171_v40 = vsub.f32 %v4186_v4, %v4299_v37  ;;  %v5176_v4 = vld [vmem:[#allocation42_spill] sm:$0xff] }
 0x396   :  { %v2154_v21 = vmul.f32 %v2140_v17, %v4571_v27  ;;  %v2222_v46 = vmul.f32 %v2208_v48, %v2194_v55  ;;  %v2387_v39 = vadd.f32 %v2373_v0, %v1883_v23  ;;  %v5174_v36 = vsub.f32 %v5172_v49, %v5173_v57  ;;  %v5183_v49 = vld [vmem:[#allocation48_spill] sm:$0xff] }
 0x397   :  { %v2155_v41 = vmul.f32 %v2141_v34, %v4576_v6  ;;  %v4609_v59 = vsub.f32 %v5171_v40, %v1556_v2  ;;  %v4617_v16 = vadd.f32 %v5175_v60, %v1876_v5  ;;  %v2280_v50 = vmul.f32 2.0, %v2266_v25  ;;  %v5178_v25 = vld [vmem:[#allocation52_spill] sm:$0xff] }
 0x398   :  { %v2168_v58 = vadd.f32 0.008333334, %v2154_v21  ;;  %v4614_v38 = vsub.f32 %v5174_v36, %v1557_v45  ;;  %v4622_v37 = vadd.f32 %v5176_v4, %v1877_v14  ;;  %v2223_v22 = vmul.f32 %v2209_v29, %v2195_v61  ;;  %v5177_v61 = vld [vmem:[#allocation35_spill] sm:$0xff] }
 0x399   :  { %v2169_v44 = vadd.f32 0.008333334, %v2155_v41  ;;  %v1584_v18 = vmul.f32 %v4609_v59, %v4609_v59  ;;  %v4624_v23 = vmul.f32 %v2402_v11, %v2386_v28  ;;  %v2320_v26 = vsub.f32 1.0, %v2306_v13 }
 0x39a   :  { %v1585_v43 = vmul.f32 %v4614_v38, %v4614_v38  ;;  %v2182_v54 = vmul.f32 %v2168_v58, %v4571_v27  ;;  %v2281_v5 = vmul.f32 2.0, %v2267_v30  ;;  %v2236_v48 = vadd.f32 %v2222_v46, %v4522_v52  ;;  %v5180_v46 = vld [vmem:[#allocation46_spill] sm:$0xff] }
 0x39b   :  { %v1598_v42 = vmul.f32 -2.5052108e-08, %v1584_v18  ;;  %v2321_v33 = vsub.f32 1.0, %v2307_v1  ;;  %v4630_v32 = vmul.f32 %v2402_v11, %v2387_v39  ;;  %v2183_v14 = vmul.f32 %v2169_v44, %v4576_v6 }
 0x39c   :  { %v1599_v0 = vmul.f32 -2.5052108e-08, %v1585_v43  ;;  %v2294_v29 = vsub.f32 %v4119_v20, %v2280_v50  ;;  %v1752_v53 = vmul.f32 0.5, %v4271_v12  ;;  %v2237_v55 = vadd.f32 %v2223_v22, %v4527_v31 }
 0x39d   :  { %v1612_v51 = vadd.f32 2.7557319e-06, %v1598_v42  ;;  %v2210_v17 = vmul.f32 %v4571_v27, %v4561_v62  ;;  %v2211_v19 = vmul.f32 %v4576_v6, %v4567_v47  ;;  %v2196_v63 = vadd.f32 -0.16666667, %v2182_v54  ;;  %v5179_v6 = vld [vmem:[#allocation36_spill] sm:$0xff] }
 0x39e   :  { %v1613_v52 = vadd.f32 2.7557319e-06, %v1599_v0  ;;  %v2295_v13 = vsub.f32 %v4123_v3, %v2281_v5  ;;  %v1753_v34 = vmul.f32 0.5, %v4309_v35  ;;  %v2334_v2 = vmul.f32 %v2320_v26, %v2236_v48  ;;  %v5182_v3 = vld [vmem:[#allocation38_spill] sm:$0xff]  ;;  %v2354_v5 = vpop.permute.xlu0 %2353 }
 0x39f   :  { %v1626_v28 = vmul.f32 %v1612_v51, %v1584_v18  ;;  %v2060_v21 = vmul.f32 0.0009676536, %v5177_v61  ;;  %v2061_v45 = vmul.f32 0.0009676536, %v5178_v25  ;;  %v2197_v31 = vadd.f32 -0.16666667, %v2183_v14 }
 0x3a0   :  { %v1627_v20 = vmul.f32 %v1613_v52, %v1585_v43  ;;  %v2308_v1 = vmul.f32 2.0, %v2294_v29  ;;  %v1766_v27 = vfloor.f32 %v1752_v53  ;;  %v2335_v30 = vmul.f32 %v2321_v33, %v2237_v55 }
 0x3a1   :  { %v1640_v41 = vadd.f32 -0.0001984127, %v1626_v28  ;;  %v5181_v39 = vsub.f32 %v5179_v6, %v5180_v46  ;;  %v5184_v57 = vsub.f32 %v5182_v3, %v5183_v49  ;;  %v2224_v60 = vmul.f32 %v2210_v17, %v2196_v63  ;;  %v5186_v46 = vld [vmem:[#allocation44_spill] sm:$0xff]  ;;  %v5187_v3 = vld [vmem:[#allocation37_spill] sm:$0xff] }
 0x3a2   :  { %v1641_v40 = vadd.f32 -0.0001984127, %v1627_v20  ;;  %v2309_v11 = vmul.f32 2.0, %v2295_v13  ;;  %v1767_v50 = vfloor.f32 %v1753_v34  ;;  %v1710_v22 = vmul.f32 %v1584_v18, %v4609_v59 }
 0x3a3   :  { %v4647_v58 = vsub.f32 %v5181_v39, %v2060_v21  ;;  %v4652_v36 = vsub.f32 %v5184_v57, %v2061_v45  ;;  %v1654_v44 = vmul.f32 %v1640_v41, %v1584_v18  ;;  %v2225_v42 = vmul.f32 %v2211_v19, %v2197_v31  ;;  %v5185_v31 = vld [vmem:[#allocation39_spill] sm:$0xff] }
 0x3a4   :  { %v1655_v4 = vmul.f32 %v1641_v40, %v1585_v43  ;;  %v2322_v48 = vsub.f32 1.0, %v2308_v1  ;;  %v1780_v0 = vmul.f32 2.0, %v1766_v27  ;;  %v1711_v29 = vmul.f32 %v1585_v43, %v4614_v38  ;;  %v2358_v40 = vpop.permute.xlu0 %2357 }
 0x3a5   :  { %v4657_v26 = vmul.f32 %v4647_v58, %v4647_v58  ;;  %v4661_v54 = vmul.f32 %v4652_v36, %v4652_v36  ;;  %v1668_v33 = vadd.f32 0.008333334, %v1654_v44  ;;  %v2238_v55 = vadd.f32 %v2224_v60, %v4561_v62 }
 0x3a6   :  { %v1669_v14 = vadd.f32 0.008333334, %v1655_v4  ;;  %v2323_v17 = vsub.f32 1.0, %v2309_v11  ;;  %v1781_v63 = vmul.f32 2.0, %v1767_v50  ;;  %v2256_v19 = vmul.f32 0.5, %v5177_v61 }
 0x3a7   :  { %v2102_v51 = vmul.f32 -2.5052108e-08, %v4657_v26  ;;  %v2103_v53 = vmul.f32 -2.5052108e-08, %v4661_v54  ;;  %v1682_v52 = vmul.f32 %v1668_v33, %v1584_v18  ;;  %v2239_v20 = vadd.f32 %v2225_v42, %v4567_v47  ;;  %v5188_v47 = vld [vmem:[#allocation28_spill] sm:$0xff]  ;;  %v5190_v42 = vld [vmem:[#allocation49_spill] sm:$0xff] }
 0x3a8   :  { %v1683_v13 = vmul.f32 %v1669_v14, %v1585_v43  ;;  %v2257_v45 = vmul.f32 0.5, %v5178_v25  ;;  %v2058_v1 = vmul.f32 0.0009676536, %v5185_v31  ;;  %v1794_v27 = vsub.f32 %v4271_v12, %v1780_v0  ;;  %v5191_v33 = vld [vmem:[#allocation31_spill] sm:$0xff] }
 0x3a9   :  { %v2116_v28 = vadd.f32 2.7557319e-06, %v2102_v51  ;;  %v2117_v34 = vadd.f32 2.7557319e-06, %v2103_v53  ;;  %v1696_v21 = vadd.f32 -0.16666667, %v1682_v52  ;;  %v2336_v43 = vmul.f32 %v2322_v48, %v2238_v55 }
 0x3aa   :  { %v1697_v41 = vadd.f32 -0.16666667, %v1683_v13  ;;  %v1795_v6 = vsub.f32 %v4309_v35, %v1781_v63  ;;  %v2059_v39 = vmul.f32 0.0009676536, %v5186_v46  ;;  %v5189_v49 = vsub.f32 %v5187_v3, %v5188_v47 }
 0x3ab   :  { %v2130_v62 = vmul.f32 %v2116_v28, %v4657_v26  ;;  %v2131_v18 = vmul.f32 %v2117_v34, %v4661_v54  ;;  %v1724_v60 = vmul.f32 %v1710_v22, %v1696_v21  ;;  %v2270_v50 = vfloor.f32 %v2256_v19 }
 0x3ac   :  { %v4679_v57 = vsub.f32 %v5189_v49, %v2058_v1  ;;  %v2337_v12 = vmul.f32 %v2323_v17, %v2239_v20  ;;  %v2271_v4 = vfloor.f32 %v2257_v45  ;;  %v5192_v0 = vsub.f32 %v5190_v42, %v5191_v33  ;;  %v4701_v20 = vpop.permute.xlu0 %2365 }
 0x3ad   :  { %v2144_v11 = vadd.f32 -0.0001984127, %v2130_v62  ;;  %v2145_v44 = vadd.f32 -0.0001984127, %v2131_v18  ;;  %v1725_v48 = vmul.f32 %v1711_v29, %v1697_v41  ;;  %v1808_v51 = vmul.f32 2.0, %v1794_v27 }
 0x3ae   :  { %v4684_v14 = vsub.f32 %v5192_v0, %v2059_v39  ;;  %v2086_v35 = vmul.f32 %v4679_v57, %v4679_v57  ;;  %v4690_v22 = vmul.f32 %v2354_v5, %v2334_v2  ;;  %v4692_v52 = vmul.f32 %v2354_v5, %v2335_v30  ;;  %v5194_v0 = vld [vmem:[#allocation33_spill] sm:$0xff] }
 0x3af   :  { %v2158_v53 = vmul.f32 %v2144_v11, %v4657_v26  ;;  %v2159_v55 = vmul.f32 %v2145_v44, %v4661_v54  ;;  %v1738_v13 = vadd.f32 %v1724_v60, %v4609_v59  ;;  %v1809_v28 = vmul.f32 2.0, %v1795_v6  ;;  %v1862_v11 = vpop.permute.xlu1 %1861 }
 0x3b0   :  { %v4696_v17 = vmul.f32 %v4684_v14, %v4684_v14  ;;  %v2100_v63 = vmul.f32 -2.5052108e-08, %v2086_v35  ;;  %v2284_v19 = vmul.f32 2.0, %v2270_v50  ;;  %v4699_v29 = vmul.f32 %v2358_v40, %v2336_v43  ;;  %v2406_v60 = vpop.permute.xlu0 %2405 }
 0x3b1   :  { %v2172_v34 = vadd.f32 0.008333334, %v2158_v53  ;;  %v2285_v21 = vmul.f32 2.0, %v2271_v4  ;;  %v4704_v30 = vmul.f32 %v2358_v40, %v2337_v12  ;;  %v1739_v5 = vadd.f32 %v1725_v48, %v4614_v38  ;;  %v5193_v4 = vld [vmem:[#allocation34_spill] sm:$0xff] }
 0x3b2   :  { %v2101_v2 = vmul.f32 -2.5052108e-08, %v4696_v17  ;;  %v2114_v45 = vadd.f32 2.7557319e-06, %v2100_v63  ;;  %v1822_v1 = vsub.f32 1.0, %v1808_v51  ;;  %v2214_v59 = vmul.f32 %v4657_v26, %v4647_v58 }
 0x3b3   :  { %v2173_v41 = vadd.f32 0.008333334, %v2159_v55  ;;  %v2215_v27 = vmul.f32 %v4661_v54, %v4652_v36  ;;  %v1823_v43 = vsub.f32 1.0, %v1809_v28  ;;  %v2186_v39 = vmul.f32 %v2172_v34, %v4657_v26 }
 0x3b4   :  { %v2115_v62 = vadd.f32 2.7557319e-06, %v2101_v2  ;;  %v2128_v18 = vmul.f32 %v2114_v45, %v2086_v35  ;;  %v1836_v6 = vmul.f32 %v1822_v1, %v1738_v13  ;;  %v2298_v3 = vsub.f32 %v5177_v61, %v2284_v19 }
 0x3b5   :  { %v2299_v40 = vsub.f32 %v5178_v25, %v2285_v21  ;;  %v2254_v49 = vmul.f32 0.5, %v5185_v31  ;;  %v1837_v44 = vmul.f32 %v1823_v43, %v1739_v5  ;;  %v2187_v50 = vmul.f32 %v2173_v41, %v4661_v54  ;;  %v4725_v41 = vpop.permute.xlu1 %2361  ;;  %v5195_v43 = vld [vmem:[#allocation51_spill] sm:$0xff] }
 0x3b6   :  { %v2129_v38 = vmul.f32 %v2115_v62, %v4696_v17  ;;  %v2142_v47 = vadd.f32 -0.0001984127, %v2128_v18  ;;  %v2255_v12 = vmul.f32 0.5, %v5186_v46  ;;  %v2388_v42 = vadd.f32 %v4448_v10, %v5193_v4 }
 0x3b7   :  { %v2268_v61 = vfloor.f32 %v2254_v49  ;;  %v2389_v25 = vadd.f32 %v4453_v9, %v5194_v0  ;;  %v2200_v48 = vadd.f32 -0.16666667, %v2186_v39  ;;  %v2312_v51 = vmul.f32 2.0, %v2298_v3 }
 0x3b8   :  { %v2143_v26 = vadd.f32 -0.0001984127, %v2129_v38  ;;  %v2156_v33 = vmul.f32 %v2142_v47, %v2086_v35  ;;  %v2269_v53 = vfloor.f32 %v2255_v12  ;;  %v2430_v55 = vmul.f32 %v2406_v60, %v2388_v42  ;;  %v5198_v12 = vld [vmem:[#allocation58_spill] sm:$0xff] }
 0x3b9   :  { %v2282_v28 = vmul.f32 2.0, %v2268_v61  ;;  %v2431_v54 = vmul.f32 %v2406_v60, %v2389_v25  ;;  %v1878_v34 = vmul.f32 %v1862_v11, %v1836_v6  ;;  %v2313_v19 = vmul.f32 2.0, %v2299_v40 }
 0x3ba   :  { %v2157_v63 = vmul.f32 %v2143_v26, %v4696_v17  ;;  %v2170_v13 = vadd.f32 0.008333334, %v2156_v33  ;;  %v2283_v21 = vmul.f32 2.0, %v2269_v53  ;;  %v2442_v10 = vadd.f32 %v2430_v55, %v4624_v23  ;;  %v5201_v33 = vld [vmem:[#allocation29_spill] sm:$0xff]  ;;  %v2410_v53 = vpop.permute.xlu0 %2409  ;;  %v5202_v55 = vld [vmem:[#allocation32_spill] sm:$0xff] }
 0x3bb   :  { %v2201_v2 = vadd.f32 -0.16666667, %v2187_v50  ;;  %v2455_v1 = vadd.f32 %v2431_v54, %v4630_v32  ;;  %v2228_v9 = vmul.f32 %v2214_v59, %v2200_v48  ;;  %v2212_v62 = vmul.f32 %v2086_v35, %v4679_v57  ;;  %v5197_v50 = vld [vmem:[#allocation45_spill] sm:$0xff]  ;;  %v4756_v48 = vpop.permute.xlu1 %1865 }
 0x3bc   :  { %v2171_v45 = vadd.f32 0.008333334, %v2157_v63  ;;  %v2184_v5 = vmul.f32 %v2170_v13, %v2086_v35  ;;  %v2296_v18 = vsub.f32 %v5185_v31, %v2282_v28  ;;  %v1558_v39 = vmul.f32 0.0009676536, %v5195_v43 }
 0x3bd   :  { %v2297_v40 = vsub.f32 %v5186_v46, %v2283_v21  ;;  %v1559_v23 = vmul.f32 0.0009676536, %v4392_v15  ;;  %v1879_v38 = vmul.f32 %v1862_v11, %v1837_v44  ;;  %v2326_v47 = vsub.f32 1.0, %v2312_v51  ;;  %v5200_v46 = vld [vmem:[#allocation30_spill] sm:$0xff]  ;;  %v5203_v21 = vld [vmem:[#allocation57_spill] sm:$0xff] }
 0x3be   :  { %v2185_v6 = vmul.f32 %v2171_v45, %v4696_v17  ;;  %v2198_v3 = vadd.f32 -0.16666667, %v2184_v5  ;;  %v2213_v32 = vmul.f32 %v4696_v17, %v4684_v14  ;;  %v5196_v59 = vsub.f32 %v4316_v56, %v4390_v24 }
 0x3bf   :  { %v2229_v31 = vmul.f32 %v2215_v27, %v2201_v2  ;;  %v5199_v4 = vsub.f32 %v5197_v50, %v5198_v12  ;;  %v4746_v26 = vadd.f32 %v5200_v46, %v1878_v34  ;;  %v2242_v11 = vadd.f32 %v2228_v9, %v4647_v58 }
 0x3c0   :  { %v4738_v35 = vsub.f32 %v5196_v59, %v1558_v39  ;;  %v2199_v49 = vadd.f32 -0.16666667, %v2185_v6  ;;  %v2226_v60 = vmul.f32 %v2212_v62, %v2198_v3  ;;  %v2310_v44 = vmul.f32 2.0, %v2296_v18 }
 0x3c1   :  { %v4743_v42 = vsub.f32 %v5199_v4, %v1559_v23  ;;  %v2311_v24 = vmul.f32 2.0, %v2297_v40  ;;  %v2390_v61 = vadd.f32 %v4690_v22, %v5201_v33  ;;  %v2327_v0 = vsub.f32 1.0, %v2313_v19 }
 0x3c2   :  { %v1586_v17 = vmul.f32 %v4738_v35, %v4738_v35  ;;  %v2227_v56 = vmul.f32 %v2213_v32, %v2199_v49  ;;  %v2240_v25 = vadd.f32 %v2226_v60, %v4679_v57  ;;  %v1754_v58 = vmul.f32 0.5, %v5195_v43  ;;  %v5204_v60 = vld [vmem:[#allocation40_spill] sm:$0xff] }
 0x3c3   :  { %v1587_v27 = vmul.f32 %v4743_v42, %v4743_v42  ;;  %v4760_v63 = vadd.f32 %v5202_v55, %v1879_v38  ;;  %v2243_v13 = vadd.f32 %v2229_v31, %v4652_v36  ;;  %v1755_v54 = vmul.f32 0.5, %v4392_v15  ;;  %v2414_v31 = vpop.permute.xlu1 %2413 }
 0x3c4   :  { %v1600_v51 = vmul.f32 -2.5052108e-08, %v1586_v17  ;;  %v2241_v34 = vadd.f32 %v2227_v56, %v4684_v14  ;;  %v2324_v22 = vsub.f32 1.0, %v2310_v44  ;;  %v2391_v57 = vadd.f32 %v4692_v52, %v5203_v21  ;;  %v5206_v56 = vld [vmem:[#allocation54_spill] sm:$0xff] }
 0x3c5   :  { %v1601_v28 = vmul.f32 -2.5052108e-08, %v1587_v27  ;;  %v2340_v2 = vmul.f32 %v2326_v47, %v2242_v11  ;;  %v2325_v45 = vsub.f32 1.0, %v2311_v24  ;;  %v2432_v9 = vmul.f32 %v2410_v53, %v2390_v61  ;;  %v5207_v24 = vld [vmem:[#allocation55_spill] sm:$0xff] }
 0x3c6   :  { %v1614_v19 = vadd.f32 2.7557319e-06, %v1600_v51  ;;  %v2338_v62 = vmul.f32 %v2324_v22, %v2240_v25  ;;  %v1768_v39 = vfloor.f32 %v1754_v58  ;;  %v2433_v6 = vmul.f32 %v2410_v53, %v2391_v57 }
 0x3c7   :  { %v1615_v5 = vadd.f32 2.7557319e-06, %v1601_v28  ;;  %v2341_v3 = vmul.f32 %v2327_v0, %v2243_v13  ;;  %v2443_v40 = vadd.f32 %v2442_v10, %v2432_v9  ;;  %v2392_v23 = vadd.f32 %v4699_v29, %v4580_v8  ;;  %v5205_v10 = vld [vmem:[#allocation56_spill] sm:$0xff]  ;;  %v5210_v0 = vld [vmem:[#allocation18_spill] sm:$0xff] }
 0x3c8   :  { %v1628_v18 = vmul.f32 %v1614_v19, %v1586_v17  ;;  %v2339_v14 = vmul.f32 %v2325_v45, %v2241_v34  ;;  %v1769_v32 = vfloor.f32 %v1755_v54  ;;  %v2456_v59 = vadd.f32 %v2455_v1, %v2433_v6 }
 0x3c9   :  { %v1629_v36 = vmul.f32 %v1615_v5, %v1587_v27  ;;  %v2393_v47 = vadd.f32 %v4704_v30, %v4584_v7  ;;  %v2434_v49 = vmul.f32 %v2414_v31, %v2392_v23  ;;  %v2062_v50 = vmul.f32 0.0009676536, %v5204_v60  ;;  %v5209_v30 = vld [vmem:[#allocation50_spill] sm:$0xff] }
 0x3ca   :  { %v1642_v38 = vadd.f32 -0.0001984127, %v1628_v18  ;;  %v2380_v12 = vmul.f32 %v4725_v41, %v2338_v62  ;;  %v1782_v46 = vmul.f32 2.0, %v1768_v39  ;;  %v2063_v11 = vmul.f32 0.0009676536, %v5205_v10  ;;  %v4796_v18 = vpop.permute.xlu1 %2369  ;;  %v2418_v39 = vpop.permute.xlu0 %2417 }
 0x3cb   :  { %v1643_v52 = vadd.f32 -0.0001984127, %v1629_v36  ;;  %v2435_v8 = vmul.f32 %v2414_v31, %v2393_v47  ;;  %v2444_v29 = vadd.f32 %v2443_v40, %v2434_v49  ;;  %v5208_v1 = vsub.f32 %v5206_v56, %v5207_v24 }
 0x3cc   :  { %v1656_v4 = vmul.f32 %v1642_v38, %v1586_v17  ;;  %v2381_v61 = vmul.f32 %v4725_v41, %v2339_v14  ;;  %v5211_v25 = vsub.f32 %v5209_v30, %v5210_v0  ;;  %v2258_v58 = vmul.f32 0.5, %v5204_v60 }
 0x3cd   :  { %v1657_v44 = vmul.f32 %v1643_v52, %v1587_v27  ;;  %v4777_v33 = vsub.f32 %v5208_v1, %v2062_v50  ;;  %v2457_v55 = vadd.f32 %v2456_v59, %v2435_v8  ;;  %v2394_v28 = vadd.f32 %v2380_v12, %v4617_v16 }
 0x3ce   :  { %v1670_v7 = vadd.f32 0.008333334, %v1656_v4  ;;  %v4783_v51 = vsub.f32 %v5211_v25, %v2063_v11  ;;  %v1783_v34 = vmul.f32 2.0, %v1769_v32  ;;  %v2259_v22 = vmul.f32 0.5, %v5205_v10  ;;  %v2422_v8 = vpop.permute.xlu1 %2421 }
 0x3cf   :  { %v1671_v53 = vadd.f32 0.008333334, %v1657_v44  ;;  %v2090_v13 = vmul.f32 %v4777_v33, %v4777_v33  ;;  %v1712_v21 = vmul.f32 %v1586_v17, %v4738_v35  ;;  %v2395_v45 = vadd.f32 %v2381_v61, %v4622_v37 }
 0x3d0   :  { %v1684_v54 = vmul.f32 %v1670_v7, %v1586_v17  ;;  %v2091_v41 = vmul.f32 %v4783_v51, %v4783_v51  ;;  %v1713_v9 = vmul.f32 %v1587_v27, %v4743_v42  ;;  %v1796_v62 = vsub.f32 %v5195_v43, %v1782_v46 }
 0x3d1   :  { %v1685_v19 = vmul.f32 %v1671_v53, %v1587_v27  ;;  %v2104_v57 = vmul.f32 -2.5052108e-08, %v2090_v13  ;;  %v2272_v40 = vfloor.f32 %v2258_v58  ;;  %v2436_v23 = vmul.f32 %v2418_v39, %v2394_v28 }
 0x3d2   :  { %v1698_v5 = vadd.f32 -0.16666667, %v1684_v54  ;;  %v2105_v16 = vmul.f32 -2.5052108e-08, %v2091_v41  ;;  %v1797_v14 = vsub.f32 %v4392_v15, %v1783_v34  ;;  %v2273_v17 = vfloor.f32 %v2259_v22 }
 0x3d3   :  { %v1699_v6 = vadd.f32 -0.16666667, %v1685_v19  ;;  %v2118_v36 = vadd.f32 2.7557319e-06, %v2104_v57  ;;  %v2437_v32 = vmul.f32 %v2418_v39, %v2395_v45  ;;  %v2382_v37 = vmul.f32 %v4701_v20, %v2340_v2  ;;  %v5212_v2 = vld [vmem:[#allocation27_spill] sm:$0xff] }
 0x3d4   :  { %v2119_v38 = vadd.f32 2.7557319e-06, %v2105_v16  ;;  %v1726_v59 = vmul.f32 %v1712_v21, %v1698_v5  ;;  %v2445_v27 = vadd.f32 %v2444_v29, %v2436_v23  ;;  %v2383_v43 = vmul.f32 %v4701_v20, %v2341_v3  ;;  %v5213_v3 = vld [vmem:[#allocation41_spill] sm:$0xff] }
 0x3d5   :  { %v2132_v31 = vmul.f32 %v2118_v36, %v2090_v13  ;;  %v1727_v52 = vmul.f32 %v1713_v9, %v1699_v6  ;;  %v2458_v49 = vadd.f32 %v2457_v55, %v2437_v32  ;;  %v1810_v50 = vmul.f32 2.0, %v1796_v62 }
 0x3d6   :  { %v2133_v47 = vmul.f32 %v2119_v38, %v2091_v41  ;;  %v2286_v4 = vmul.f32 2.0, %v2272_v40  ;;  %v2396_v46 = vadd.f32 %v2382_v37, %v4746_v26  ;;  %v1811_v11 = vmul.f32 2.0, %v1797_v14  ;;  %v2426_v37 = vpop.permute.xlu1 %2425 }
 0x3d7   :  { %v2146_v12 = vadd.f32 -0.0001984127, %v2132_v31  ;;  %v2287_v44 = vmul.f32 2.0, %v2273_v17  ;;  %v2397_v56 = vadd.f32 %v2383_v43, %v4760_v63  ;;  %2682 = vtanh.f32 %v5212_v2 }
 0x3d8   :  { %v2147_v15 = vadd.f32 -0.0001984127, %v2133_v47  ;;  %v1740_v29 = vadd.f32 %v1726_v59, %v4738_v35  ;;  %v2438_v20 = vmul.f32 %v2422_v8, %v2396_v46  ;;  %2684 = vtanh.f32 %v5213_v3 }
 0x3d9   :  { %v2160_v24 = vmul.f32 %v2146_v12, %v2090_v13  ;;  %v1741_v1 = vadd.f32 %v1727_v52, %v4743_v42  ;;  %v2439_v7 = vmul.f32 %v2422_v8, %v2397_v56  ;;  %v1824_v30 = vsub.f32 1.0, %v1810_v50 }
 0x3da   :  { %v2161_v61 = vmul.f32 %v2147_v15, %v2091_v41  ;;  %v2300_v0 = vsub.f32 %v5204_v60, %v2286_v4  ;;  %v2446_v25 = vadd.f32 %v2445_v27, %v2438_v20  ;;  %v1825_v58 = vsub.f32 1.0, %v1811_v11 }
 0x3db   :  { %v2174_v26 = vadd.f32 0.008333334, %v2160_v24  ;;  %v2301_v63 = vsub.f32 %v5205_v10, %v2287_v44  ;;  %v2459_v55 = vadd.f32 %v2458_v49, %v2439_v7  ;;  %v1838_v28 = vmul.f32 %v1824_v30, %v1740_v29  ;;  %v2471_v29 = vpop.permute.xlu0 %2470 }
 0x3dc   :  { %v2175_v53 = vadd.f32 0.008333334, %v2161_v61  ;;  %v1839_v54 = vmul.f32 %v1825_v58, %v1741_v1  ;;  %v2216_v19 = vmul.f32 %v2090_v13, %v4777_v33  ;;  %v2314_v42 = vmul.f32 2.0, %v2300_v0 }
 0x3dd   :  { %v2188_v35 = vmul.f32 %v2174_v26, %v2090_v13  ;;  %v2217_v57 = vmul.f32 %v2091_v41, %v4783_v51  ;;  %v2315_v45 = vmul.f32 2.0, %v2301_v63  ;;  %v1880_v60 = vmul.f32 %v4756_v48, %v1838_v28 }
 0x3de   :  { %v2189_v34 = vmul.f32 %v2175_v53, %v2091_v41  ;;  %v1881_v9 = vmul.f32 %v4756_v48, %v1839_v54  ;;  %v2328_v39 = vsub.f32 1.0, %v2314_v42  ;;  %v2735_v4 = vmov 1966171168  }
 0x3df   :  { %v2202_v22 = vadd.f32 -0.16666667, %v2188_v35  ;;  %v2329_v40 = vsub.f32 1.0, %v2315_v45  ;;  %v2479_v46 = vunpack.c.l.s4 %v2735_v4  ;;  %v2481_v11 = vlaneseq }
 0x3e0   :  { %v2203_v21 = vadd.f32 -0.16666667, %v2189_v34 }
 0x3e1   :  { %v2230_v5 = vmul.f32 %v2216_v19, %v2202_v22  ;;  %v2683_v10 = vpop.eup %2682  ;;  %v2480_v56 = vunpack.c.0.s8 %v2479_v46  ;;  %v2482_v2 = vshrl.u32 %v2481_v11, 7  ;;  %vm2495_vm4 = vcmp.lt.s32.totalorder %v2481_v11, 256 }
 0x3e2   :  { %v2231_v62 = vmul.f32 %v2217_v57, %v2203_v21  ;;  %v2685_v6 = vpop.eup %2684  ;;  %v1894_v13 = vadd.f32 %v2683_v10, %v1880_v60 }
 0x3e3   :  { %v2244_v16 = vadd.f32 %v2230_v5, %v4777_v33  ;;  %v1895_v14 = vadd.f32 %v2685_v6, %v1881_v9  ;;  %v2483_v61 = vsub.s32 %v2480_v56, %v2482_v2 }
 0x3e4   :  { %v2245_v36 = vadd.f32 %v2231_v62, %v4783_v51 }
 0x3e5   :  { %v2342_v23 = vmul.f32 %v2328_v39, %v2244_v16 }
 0x3e6   :  { %v2343_v38 = vmul.f32 %v2329_v40, %v2245_v36 }
 0x3e7   :  { %v2384_v41 = vmul.f32 %v4796_v18, %v2342_v23 }
 0x3e8   :  { %v2385_v17 = vmul.f32 %v4796_v18, %v2343_v38 }
 0x3e9   :  { %v2398_v32 = vadd.f32 %v2384_v41, %v1894_v13 }
 0x3ea   :  { %v2399_v48 = vadd.f32 %v2385_v17, %v1895_v14 }
 0x3eb   :  { %v2440_v59 = vmul.f32 %v2426_v37, %v2398_v32 }
 0x3ec   :  { %v2441_v31 = vmul.f32 %v2426_v37, %v2399_v48 }
 0x3ed   :  { %v2447_v33 = vsel %vm1264_vm2, %v2440_v59, 0.0 }
 0x3ee   :  { %v2448_v27 = vadd.f32 %v2447_v33, %v2446_v25  ;;  %v2460_v43 = vsel %vm1264_vm2, %v2441_v31, 0.0 }
 0x3ef   :  { %v2461_v51 = vadd.f32 %v2460_v43, %v2459_v55 }
 0x3f0   :  { %v2449_v52 = vrot.slane %v2448_v27, 4 }
 0x3f1   :  { %v2462_v47 = vrot.slane %v2461_v51, 4 }
 0x3f2   :  { %v2450_v49 = vadd.f32 %v2449_v52, %v2448_v27 }
 0x3f3   :  { %v2463_v50 = vadd.f32 %v2462_v47, %v2461_v51 }
 0x3f4   :  { %v2451_v12 = vrot.slane %v2450_v49, 2 }
 0x3f5   :  { %v2464_v18 = vrot.slane %v2463_v50, 2 }
 0x3f6   :  { %v2452_v15 = vadd.f32 %v2451_v12, %v2450_v49 }
 0x3f7   :  { %v2465_v44 = vadd.f32 %v2464_v18, %v2463_v50 }
 0x3f8   :  { %v2453_v8 = vrot.slane %v2452_v15, 1 }
 0x3f9   :  { %v2466_v24 = vrot.slane %v2465_v44, 1 }
 0x3fa   :  { %v2454_v20 = vadd.f32 %v2453_v8, %v2452_v15 }
 0x3fb   :  { %v2467_v3 = vadd.f32 %v2466_v24, %v2465_v44 }
 0x3fc   :  { %v2473_v1 = vadd.f32 %v2471_v29, %v2454_v20 }
 0x3fd   :  { %v2474_v7 = vadd.f32 %v2471_v29, %v2467_v3 }
 0x3ff   :  { %v2477_v30 = vcombine.low %v2473_v1, %v2474_v7 }
 0x401   :  { %v2484_v26 = vrot.slane %v2477_v30, %v2483_v61 }
 0x403   :  { %v2491_v0 = vrot.slane %v2484_v26, %v2483_v61 }
 0x405   :  { %2497 = vst.msk [vmem:[#allocation2] sm:$0x3] %vm2495_vm4, %v2491_v0 }
 0x406   :  { %2704 = shalt.err (!%p2701_p4)
}
 0x407   :  { %s2705_s17 = scalar_lea.hbm %s4833_s2, 32 }
 0x408   :  { %p2706_p5 = scmp.ne.s32.totalorder %s4833_s2, %s2705_s17  ;;  %p2709_p6 = scmp.lt.u32.totalorder %s2705_s17, %s4833_s2 }
 0x40a   :  { %p2711_p7 = pnand %p2709_p6, %p2706_p5 }
 0x40c   :  { %2714 = shalt.err (!%p2711_p7)
}
 0x40d   :  { %2507 = dma.vmem_to_hbm [thread:$0]  %s2505_s13, 32, %s4833_s2, [#allocation3]  }
 0x40e   :  { %2715 = dma.done.wait [#allocation3], 32  }
 0x40f   :  { %2716 = vsyncadd [#allocation3], 4294967264 }
 0x410   :  { %2511 = vsyncpa [#allocation3], 1 }

</bundles_post_ra>
